<compile_context>
chip_gen: v7x
topology: tpu7x:2x2x1
jax: 0.10.0
libtpu: 0.0.40
codegen_flags: <defaults>
</compile_context>

<pallas_src>
import math

import jax
import jax.numpy as jnp
from jax.experimental import pallas as pl
from jax.experimental.pallas import tpu as pltpu


_INV_SQRT2 = 1.0 / math.sqrt(2.0)


# ----------------------------- Pallas kernel ------------------------------- #

def _ffn_fused_kernel(x_ref, w1_ref, b1_ref, w2_ref, b2_ref, o_ref, acc_ref):
    """Fused FFN with a d_ff reduction axis.

    Grid: (m_tiles, f_tiles)  ->  axis 0 "parallel", axis 1 "arbitrary".
    Block shapes (per step):
      x:  (bm, d_model) bf16     w1: (d_model, tf) bf16   b1: (1, tf) f32
      w2: (tf, d_model) bf16     b2: (1, d_model) f32
      o:  (bm, d_model) f32      acc scratch: (bm, d_model) f32
    """
    f = pl.program_id(1)

    @pl.when(f == 0)
    def _():
        acc_ref[...] = jnp.zeros_like(acc_ref)

    # First linear (bf16 operands, f32 accumulate on the MXU) + bias in f32.
    h = jnp.dot(x_ref[...], w1_ref[...],
                preferred_element_type=jnp.float32) + b1_ref[...]
    # Exact (erf) GELU in f32, matching torch.nn.GELU(approximate='none').
    h = 0.5 * h * (1.0 + jax.lax.erf(h * _INV_SQRT2))
    # TODO(synk): nn.Dropout is identity here (eval mode); no RNG dropout applied.
    # Second linear: bf16 operands, accumulate this d_ff tile's contribution.
    acc_ref[...] += jnp.dot(h.astype(jnp.bfloat16), w2_ref[...],
                            preferred_element_type=jnp.float32)

    @pl.when(f == pl.num_programs(1) - 1)
    def _():
        o_ref[...] = (acc_ref[...] + b2_ref[...]).astype(o_ref.dtype)


# ------------------------------- wrapper ------------------------------------ #

def _round_up(x, m):
    return ((x + m - 1) // m) * m


def _pick_tf(d_ff):
    # d_ff reduction tile: must divide d_ff exactly (it is a contraction axis,
    # so Pallas' OOB padding of a partial block would corrupt the accumulation).
    for tf in (512, 256, 128):
        if d_ff % tf == 0:
            return tf
    return d_ff


def _vmem_budget_bytes(bm, d_model, tf):
    dbl = 2  # default double-buffering on pipelined inputs/outputs
    est = (bm * d_model * 2 * dbl          # x tile (bf16)
           + d_model * tf * 2 * dbl        # W1 tile (bf16)
           + tf * d_model * 2 * dbl        # W2 tile (bf16)
           + 8 * tf * 4 * dbl              # b1 tile (f32, sublane-padded)
           + 8 * d_model * 4 * dbl         # b2 (f32, sublane-padded)
           + bm * d_model * 4 * dbl        # out tile (f32)
           + bm * d_model * 4)             # f32 accumulator scratch
    # Generous headroom for compiler-internal scratch, capped well under
    # v7x's 64 MiB physical VMEM.
    return int(min(48 * 1024 * 1024, max(16 * 1024 * 1024, 2 * est)))


def ffn_forward(x, params, *, block_m=256):
    """FeedForwardNetwork forward.  x: (..., d_model) float32 -> float32."""
    orig_shape = x.shape
    d_model = orig_shape[-1]
    d_ff = params["w1"].shape[1]

    M = 1
    for s in orig_shape[:-1]:
        M *= int(s)

    # Row tile: multiple of 8 sublanes; no host-side padding of x needed —
    # a partial last block is masked by Pallas.
    bm = min(_round_up(max(block_m, 8), 8), _round_up(M, 8))
    tf = _pick_tf(d_ff)
    grid = (pl.cdiv(M, bm), d_ff // tf)

    # bf16 MXU operands (f32 accumulate stays inside the kernel).  In a real
    # model x / weights would already live in bf16; the casts here stand in
    # for that.
    x2 = x.reshape(M, d_model).astype(jnp.bfloat16)
    w1 = params["w1"].astype(jnp.bfloat16)
    w2 = params["w2"].astype(jnp.bfloat16)
    b1 = params["b1"].reshape(1, d_ff).astype(jnp.float32)
    b2 = params["b2"].reshape(1, d_model).astype(jnp.float32)

    cost = pl.CostEstimate(
        flops=4 * M * d_model * d_ff,               # two matmuls
        transcendentals=M * d_ff,                   # erf per hidden element
        bytes_accessed=(M * d_model * 2             # x (bf16)
                        + 2 * d_model * d_ff * 2    # W1 + W2 (bf16)
                        + (d_ff + d_model) * 4      # biases
                        + M * d_model * 4),         # output (f32)
    )

    out = pl.pallas_call(
        _ffn_fused_kernel,
        out_shape=jax.ShapeDtypeStruct((M, d_model), jnp.float32),
        grid=grid,
        in_specs=[
            pl.BlockSpec((bm, d_model), lambda i, f: (i, 0)),    # x row tile
            pl.BlockSpec((d_model, tf), lambda i, f: (0, f)),    # W1 d_ff tile
            pl.BlockSpec((1, tf),       lambda i, f: (0, f)),    # b1 d_ff tile
            pl.BlockSpec((tf, d_model), lambda i, f: (f, 0)),    # W2 d_ff tile
            pl.BlockSpec((1, d_model),  lambda i, f: (0, 0)),    # b2 (resident)
        ],
        out_specs=pl.BlockSpec((bm, d_model), lambda i, f: (i, 0)),
        scratch_shapes=[pltpu.VMEM((bm, d_model), jnp.float32)],
        compiler_params=pltpu.CompilerParams(
            dimension_semantics=("parallel", "arbitrary"),
            vmem_limit_bytes=_vmem_budget_bytes(bm, d_model, tf),
        ),
        cost_estimate=cost,
    )(x2, w1, b1, w2, b2)

    return out.reshape(orig_shape)


# -------------------------- references (pure JAX) ---------------------------- #

def ffn_reference_bf16(x, params):
    """Matches the kernel's math (bf16 MXU operands, f32 accumulate/elementwise)."""
    xb = x.astype(jnp.bfloat16)
    w1 = params["w1"].astype(jnp.bfloat16)
    w2 = params["w2"].astype(jnp.bfloat16)
    h = jnp.dot(xb, w1, preferred_element_type=jnp.float32) + params["b1"]
    h = 0.5 * h * (1.0 + jax.lax.erf(h * _INV_SQRT2))
    return (jnp.dot(h.astype(jnp.bfloat16), w2,
                    preferred_element_type=jnp.float32) + params["b2"])


def ffn_reference_f32(x, params):
    """Full-precision reference of the original module (eval mode)."""
    h = jnp.dot(x, params["w1"], precision=jax.lax.Precision.HIGHEST) + params["b1"]
    h = 0.5 * h * (1.0 + jax.lax.erf(h * _INV_SQRT2))
    return jnp.dot(h, params["w2"], precision=jax.lax.Precision.HIGHEST) + params["b2"]


# ------------------------- deterministic param init ------------------------- #

def xavier_uniform(key, fan_out, fan_in):
    # Matches nn.init.xavier_uniform_ on a (out, in) torch weight; stored
    # transposed as (in, out) so the kernel computes x @ W directly.
    bound = math.sqrt(6.0 / (fan_in + fan_out))
    w = jax.random.uniform(key, (fan_out, fan_in), jnp.float32, -bound, bound)
    return jnp.transpose(w)


def init_ffn(key, d_model, d_ff):
    k1, k2 = jax.random.split(key)
    return dict(
        w1=xavier_uniform(k1, d_ff, d_model),
        b1=jnp.zeros((d_ff,), jnp.float32),
        w2=xavier_uniform(k2, d_model, d_ff),
        b2=jnp.zeros((d_model,), jnp.float32),
    )


# ---------------------------------- main ------------------------------------ #

if __name__ == "__main__":
    # Lane-dense small shapes: d_model = 128 (lane width), d_ff = 1024,
    # M = batch*seq = 1024 -> row grid of 4 tiles of 256 and 2 d_ff tiles of
    # 512 (exercises both the parallel row axis and the reduction axis).
    B, S, D, FF = 4, 256, 128, 1024

    key = jax.random.PRNGKey(0)
    kx, kp = jax.random.split(key)
    x = jax.random.normal(kx, (B, S, D), jnp.float32)
    params = init_ffn(kp, D, FF)

    out = jax.block_until_ready(ffn_forward(x, params))
    assert out.shape == (B, S, D) and out.dtype == jnp.float32
    assert bool(jnp.all(jnp.isfinite(out)))

    # Tight check against a reference using identical bf16-operand math.
    ref_bf16 = jax.block_until_ready(ffn_reference_bf16(x, params))
    err_bf16 = float(jnp.max(jnp.abs(out - ref_bf16)))
    assert err_bf16 < 2e-3, f"mismatch vs bf16-operand reference: {err_bf16}"

    # Loose sanity check against the full-f32 module semantics.
    ref_f32 = jax.block_until_ready(ffn_reference_f32(x, params))
    err_f32 = float(jnp.max(jnp.abs(out - ref_f32)))
    assert err_f32 < 1e-1, f"mismatch vs f32 reference: {err_f32}"

    print("KERNEL_OK")
</pallas_src>

<mosaic_0001>
module attributes {stable_mosaic.version = 11 : i64} {
  func.func @_ffn_fused_kernel(%arg0: i32, %arg1: i32, %arg2: memref<256x128xbf16, #tpu.memory_space<vmem>>, %arg3: memref<128x512xbf16, #tpu.memory_space<vmem>>, %arg4: memref<1x512xf32, #tpu.memory_space<vmem>>, %arg5: memref<512x128xbf16, #tpu.memory_space<vmem>>, %arg6: memref<1x128xf32, #tpu.memory_space<vmem>>, %arg7: memref<256x128xf32, #tpu.memory_space<vmem>>, %arg8: memref<256x128xf32, #tpu.memory_space<vmem>>) attributes {dimension_semantics = [#tpu.dimension_semantics<parallel>, #tpu.dimension_semantics<arbitrary>], iteration_bounds = array<i64: 4, 2>, scalar_prefetch = 0 : i64, scratch_operands = 1 : i64, tpu.core_type = #tpu.core_type<tc>, window_params = [{transform_indices = @transform_0, window_bounds = array<i64: 256, 128>}, {transform_indices = @transform_1, window_bounds = array<i64: 128, 512>}, {transform_indices = @transform_2, window_bounds = array<i64: 1, 512>}, {transform_indices = @transform_3, window_bounds = array<i64: 512, 128>}, {pipeline_mode = #tpu.pipeline_mode<synchronous>, transform_indices = @transform_4, window_bounds = array<i64: 1, 128>}, {transform_indices = @transform_5, window_bounds = array<i64: 256, 128>}]} {
    %c0_i32 = arith.constant 0 : i32
    %0 = arith.cmpi eq, %arg1, %c0_i32 : i32
    %1 = arith.extui %0 : i1 to i32
    %c0_i32_0 = arith.constant 0 : i32
    %2 = arith.cmpi ne, %1, %c0_i32_0 : i32
    scf.if %2 {
      %cst_17 = arith.constant 0.000000e+00 : f32
      %26 = vector.broadcast %cst_17 : f32 to vector<256x128xf32>
      %c0_18 = arith.constant 0 : index
      %c0_19 = arith.constant 0 : index
      %27 = vector.load %arg8[%c0_18, %c0_19] : memref<256x128xf32, #tpu.memory_space<vmem>>, vector<256x128xf32>
      tpu.vector_store %arg8[%c0_18, %c0_19], %26 {strides = array<i32>} : memref<256x128xf32, #tpu.memory_space<vmem>>, vector<256x128xf32>,
    } else {
    }
    %c0 = arith.constant 0 : index
    %c0_1 = arith.constant 0 : index
    %3 = vector.load %arg2[%c0, %c0_1] : memref<256x128xbf16, #tpu.memory_space<vmem>>, vector<256x128xbf16>
    %c0_2 = arith.constant 0 : index
    %c0_3 = arith.constant 0 : index
    %4 = vector.load %arg3[%c0_2, %c0_3] : memref<128x512xbf16, #tpu.memory_space<vmem>>, vector<128x512xbf16>
    %cst = arith.constant dense<0.000000e+00> : vector<256x512xf32>
    %5 = tpu.matmul %3, %4, %cst {dimension_numbers = #tpu.dot_dimension_numbers<[1], [0], [0], [1], [0, 0, 1, 1], [], []>} : vector<256x128xbf16>, vector<128x512xbf16>, vector<256x512xf32> -> vector<256x512xf32>
    %c0_4 = arith.constant 0 : index
    %c0_5 = arith.constant 0 : index
    %6 = vector.load %arg4[%c0_4, %c0_5] : memref<1x512xf32, #tpu.memory_space<vmem>>, vector<1x512xf32>
    %7 = vector.broadcast %6 : vector<1x512xf32> to vector<256x512xf32>
    %8 = arith.addf %5, %7 : vector<256x512xf32>
    %cst_6 = arith.constant 5.000000e-01 : f32
    %9 = vector.broadcast %cst_6 : f32 to vector<256x512xf32>
    %10 = arith.mulf %9, %8 : vector<256x512xf32>
    %cst_7 = arith.constant 0.707106769 : f32
    %11 = vector.broadcast %cst_7 : f32 to vector<256x512xf32>
    %12 = arith.mulf %8, %11 : vector<256x512xf32>
    %13 = math.erf %12 : vector<256x512xf32>
    %cst_8 = arith.constant 1.000000e+00 : f32
    %14 = vector.broadcast %cst_8 : f32 to vector<256x512xf32>
    %15 = arith.addf %14, %13 : vector<256x512xf32>
    %16 = arith.mulf %10, %15 : vector<256x512xf32>
    %c0_9 = arith.constant 0 : index
    %c0_10 = arith.constant 0 : index
    %17 = vector.load %arg8[%c0_9, %c0_10] : memref<256x128xf32, #tpu.memory_space<vmem>>, vector<256x128xf32>
    %18 = arith.truncf %16 : vector<256x512xf32> to vector<256x512xbf16>
    %c0_11 = arith.constant 0 : index
    %c0_12 = arith.constant 0 : index
    %19 = vector.load %arg5[%c0_11, %c0_12] : memref<512x128xbf16, #tpu.memory_space<vmem>>, vector<512x128xbf16>
    %cst_13 = arith.constant dense<0.000000e+00> : vector<256x128xf32>
    %20 = tpu.matmul %18, %19, %cst_13 {dimension_numbers = #tpu.dot_dimension_numbers<[1], [0], [0], [1], [0, 0, 1, 1], [], []>} : vector<256x512xbf16>, vector<512x128xbf16>, vector<256x128xf32> -> vector<256x128xf32>
    %21 = arith.addf %17, %20 : vector<256x128xf32>
    %c0_14 = arith.constant 0 : index
    %c0_15 = arith.constant 0 : index
    %22 = vector.load %arg8[%c0_14, %c0_15] : memref<256x128xf32, #tpu.memory_space<vmem>>, vector<256x128xf32>
    tpu.vector_store %arg8[%c0_14, %c0_15], %21 {strides = array<i32>} : memref<256x128xf32, #tpu.memory_space<vmem>>, vector<256x128xf32>,
    %c1_i32 = arith.constant 1 : i32
    %23 = arith.cmpi eq, %arg1, %c1_i32 : i32
    %24 = arith.extui %23 : i1 to i32
    %c0_i32_16 = arith.constant 0 : i32
    %25 = arith.cmpi ne, %24, %c0_i32_16 : i32
    scf.if %25 {
      %c0_17 = arith.constant 0 : index
      %c0_18 = arith.constant 0 : index
      %26 = vector.load %arg8[%c0_17, %c0_18] : memref<256x128xf32, #tpu.memory_space<vmem>>, vector<256x128xf32>
      %c0_19 = arith.constant 0 : index
      %c0_20 = arith.constant 0 : index
      %27 = vector.load %arg6[%c0_19, %c0_20] : memref<1x128xf32, #tpu.memory_space<vmem>>, vector<1x128xf32>
      %28 = vector.broadcast %27 : vector<1x128xf32> to vector<256x128xf32>
      %29 = arith.addf %26, %28 : vector<256x128xf32>
      %c0_21 = arith.constant 0 : index
      %c0_22 = arith.constant 0 : index
      %30 = vector.load %arg7[%c0_21, %c0_22] : memref<256x128xf32, #tpu.memory_space<vmem>>, vector<256x128xf32>
      tpu.vector_store %arg7[%c0_21, %c0_22], %29 {strides = array<i32>} : memref<256x128xf32, #tpu.memory_space<vmem>>, vector<256x128xf32>,
    } else {
    }
    return
  }
  func.func @transform_0(%arg0: i32, %arg1: i32) -> (i32, i32) {
    %c0_i32 = arith.constant 0 : i32
    %c0_i32_0 = arith.constant 0 : i32
    return %arg0, %c0_i32 : i32, i32
  }
  func.func @transform_1(%arg0: i32, %arg1: i32) -> (i32, i32) {
    %c0_i32 = arith.constant 0 : i32
    %c0_i32_0 = arith.constant 0 : i32
    return %c0_i32, %arg1 : i32, i32
  }
  func.func @transform_2(%arg0: i32, %arg1: i32) -> (i32, i32) {
    %c0_i32 = arith.constant 0 : i32
    %c0_i32_0 = arith.constant 0 : i32
    return %c0_i32, %arg1 : i32, i32
  }
  func.func @transform_3(%arg0: i32, %arg1: i32) -> (i32, i32) {
    %c0_i32 = arith.constant 0 : i32
    %c0_i32_0 = arith.constant 0 : i32
    return %arg1, %c0_i32 : i32, i32
  }
  func.func @transform_4(%arg0: i32, %arg1: i32) -> (i32, i32) {
    %c0_i32 = arith.constant 0 : i32
    %c0_i32_0 = arith.constant 0 : i32
    %c0_i32_1 = arith.constant 0 : i32
    return %c0_i32, %c0_i32_0 : i32, i32
  }
  func.func @transform_5(%arg0: i32, %arg1: i32) -> (i32, i32) {
    %c0_i32 = arith.constant 0 : i32
    %c0_i32_0 = arith.constant 0 : i32
    return %arg0, %c0_i32 : i32, i32
  }
}

</mosaic_0001>

<bundles_post_ra>
// kernel: tpu_custom_call.1
= control target key start
LH: loop header
LB: loop body
LE: loop exit
PB: predicated region body
PF: predicated region fallthrough
CT: control target
= control target key end

     0   :  { %s5608_s0 = inlined_call_operand.hbm [shape: bf16[1024,128], index: 0, kind: input, shape index: {}]   ;;  %s5609_s1 = inlined_call_operand.hbm [shape: bf16[128,1024], index: 1, kind: input, shape index: {}]   ;;  %s5610_s2 = inlined_call_operand.hbm [shape: f32[1,1024], index: 2, kind: input, shape index: {}]   ;;  %s5611_s3 = inlined_call_operand.hbm [shape: bf16[1024,128], index: 3, kind: input, shape index: {}]   ;;  %s5612_s4 = inlined_call_operand.vmem [shape: f32[1,128], index: 4, kind: input, shape index: {}]   ;;  %s5613_s5 = inlined_call_operand.hbm [shape: f32[1024,128], index: 5, kind: output, shape index: {}]  }
   0x1   :  { %5630 = sst [smem:[#allocation54_spill]] %s5608_s0 }
   0x2   :  { %5631 = sst [smem:[#allocation55_spill]] %s5609_s1 }
   0x3   :  { %5632 = sst [smem:[#allocation56_spill]] %s5612_s4 }
   0x4   :  { %5633 = sst [smem:[#allocation57_spill]] %s5613_s5 }
   0x5   :  { %10 = vsyncpa [#allocation4], 0 }
   0x6   :  { %12 = vsyncpa [#allocation4 + $0x1], 0 }
   0x7   :  { %13 = vsyncpa [#allocation7], 0 }
   0x8   :  { %15 = vsyncpa [#allocation7 + $0x1], 0 }
   0x9   :  { %16 = vsyncpa [#allocation10], 0 }
   0xa   :  { %18 = vsyncpa [#allocation10 + $0x1], 0 }
   0xb   :  { %19 = vsyncpa [#allocation5], 0 }
   0xc   :  { %21 = vsyncpa [#allocation5 + $0x1], 0  ;;  %s3902_s18 = smov 0   ;;  %s3904_s19 = smov 0  }
   0xd   :  { %s3906_s20 = smov 0   ;;  %s3908_s21 = smov 0  }
   0xe   :  { %s3910_s22 = smov 0   ;;  %s3912_s23 = smov 0  }
   0xf   :  { %s3914_s24 = smov 0   ;;  %s3916_s25 = smov 0  }
  0x10   :  { %s3918_s26 = smov 0   ;;  %s3920_s27 = smov 0  }
  0x11   :  { %s3922_s28 = smov 0  }
  0x12 LB: > { %5634 = sst [smem:[#allocation16_spill]] %s3824_s20  ;;  %p5616_p0 = scmp.eq.s32.totalorder %s3856_s28, 0  ;;  %s3856_s28 = sphi %s3922_s28, %s27_s28   ;;  %s3852_s27 = sphi %s3920_s27, %s5765_s27   ;;  %s3848_s26 = sphi %s3918_s26, %s5771_s26   ;;  %s3844_s25 = sphi %s3916_s25, %s5763_s25   ;;  %s3840_s24 = sphi %s3914_s24, %s5770_s24   ;;  %s3836_s23 = sphi %s3912_s23, %s5762_s23   ;;  %s3832_s22 = sphi %s3910_s22, %s5769_s22   ;;  %s3828_s21 = sphi %s3908_s21, %s5768_s21   ;;  %s3824_s20 = sphi %s3906_s20, %s5760_s20   ;;  %s3820_s19 = sphi %s3904_s19, %s5767_s19   ;;  %s3816_s18 = sphi %s3902_s18, %s5766_s18  }
  0x13   : > { %5635 = sst [smem:[#allocation17_spill]] %s3836_s23  ;;  %p79_p1 = scmp.ne.s32.totalorder %s3824_s20, %s3820_s19 }
  0x14   : > { %5636 = sst [smem:[#allocation18_spill]] %s3844_s25  ;;  %p5615_p3 = scmp.lt.s32.totalorder %s3856_s28, 8 }
  0x15   : > { %5637 = sst [smem:[#allocation19_spill]] %s3852_s27  ;;  %p81_p4 = por %p79_p1, %p5616_p0 }
  0x16   : > { %s232_s30 = sand.u32 1, %s3856_s28   ;;  %s3968_s6 = sand.u32 1, %s3824_s20  }
  0x17   : > { %s5614_s7 = sshll.u32 %s3968_s6, 8  ;;  %s2900_s8 = sshll.u32 %s3848_s26, 8 }
  0x18   : > { %s5638_s1 = sld [smem:[#allocation55_spill]]  ;;  %s236_s12 = scalar_lea.vmem [#allocation6], %s5614_s7 }
  0x19   : > { %s243_s13 = sshll.u32 %s236_s12, 4  ;;  %p3981_p5 = pnand %p5615_p3, %p81_p4  ;;  %s3985_s13 = int_to_ptr.vmem [resolvable:$true] %s243_s13 }
  0x1a   : > { %s3988_s15 = scalar_lea.sflag [#allocation7], %s232_s30 }
  0x1b   : > { %s5639_s14 = scalar_select %p3981_p5, 1, 0 }
  0x1c   : > { %p3994_p8 = pneg %p3981_p5 }
  0x1e   : > { %s3975_s11 = scalar_lea.hbm %s5638_s1, %s2900_s8  ;;  %s3611_s10 = scalar_lea.hbm %s5638_s1, 8192 }
  0x1f   : > { %s3606_s16 = scalar_lea.hbm %s3975_s11, 4096  ;;  %p3612_p11 = scmp.lt.u32.totalorder %s3975_s11, %s5638_s1 }
  0x20   : > { %p3607_p7 = scmp.ne.s32.totalorder %s3975_s11, %s3606_s16  ;;  %p3613_p12 = scmp.lt.u32.totalorder %s3611_s10, %s3606_s16 }
  0x21   : > { %p3615_p1 = scmp.lt.u32.totalorder %s3606_s16, %s3975_s11 }
  0x22   : > { %p3609_p9 = pnand %p3994_p8, %p3607_p7  ;;  %p3614_p13 = por %p3613_p12, %p3612_p11 }
  0x24   : > { %p3610_p10 = pneg %p3609_p9  ;;  %p3616_p4 = por %p3615_p1, %p3614_p13 }
  0x26   : > { %p3617_p3 = pnand %p3616_p4, %p3610_p10 }
  0x28   : > { %3620 = shalt.err (!%p3617_p3)
}
  0x29   : > { %s3621_s30 = scalar_lea.vmem %s3985_s13, 4096  ;;  %s3858_s8 = smov [#allocation6]  }
  0x2a   : > { %p3622_p7 = scmp.ne.s32.totalorder %s3985_s13, %s3621_s30  ;;  %s3626_s9 = sshll.u32 %s3858_s8, 4  ;;  %s3627_s9 = int_to_ptr.vmem [resolvable:$false] %s3626_s9 }
  0x2b   : > { %s3628_s7 = scalar_lea.vmem %s3627_s9, 8192  ;;  %p3629_p0 = scmp.lt.s32.totalorder %s3985_s13, %s3627_s9 }
  0x2c   : > { %p3624_p9 = pnand %p3622_p7, %p3994_p8  ;;  %p3630_p6 = scmp.lt.s32.totalorder %s3628_s7, %s3621_s30 }
  0x2e   : > { %p3625_p2 = pneg %p3624_p9  ;;  %p3631_p11 = por %p3630_p6, %p3629_p0 }
  0x30   : > { %p3632_p12 = pnand %p3631_p11, %p3625_p2 }
  0x32   : > { %3635 = shalt.err (!%p3632_p12)
}
  0x33   : > { %s3859_s16 = smov 512   ;;  %s3860_s10 = smov 256  }
  0x34   : > { %s3861_s12 = smov 16   ;;  %p291_p0 = scmp.lt.s32.totalorder %s3856_s28, 9 }
  0x35   : > { %3144 = dma.hbm_to_vmem [thread:$0]  (!%p3981_p5), %s3975_s11, 4096, %s3985_s13, %s3988_s15, %s3859_s16, %s3860_s10, %s3861_s12  }
  0x36   : > { %p5641_p2 = scmp.ge.s32.totalorder %s3856_s28, 1  ;;  %s4026_s8 = sadd.s32 4294967295, %s3856_s28  }
  0x37   : > { %s2790_s9 = sadd.s32 4294967294, %s3856_s28   ;;  %s36_s7 = sadd.s32 1, %s3848_s26 }
  0x38   : > { %p4021_p3 = pnand %p5641_p2, %p291_p0  ;;  %s39_s29 = sadd.s32 1, %s3852_s27 }
  0x39   : > { %p37_p6 = scmp.ge.s32.totalorder %s36_s7, 2  ;;  %s46_s11 = sadd.s32 1, %s3836_s23 }
  0x3a   : > { %s5642_s30 = scalar_select %p4021_p3, 1, 0 }
  0x3b   : > { %p53_p10 = scmp.ne.s32.totalorder %s3836_s23, %s3832_s22  ;;  %p5618_p13 = scmp.ne.s32.totalorder %s3832_s22, %s3828_s21 }
  0x3c   : > { %s5773_s7 = smov (%p37_p6, %s36_s7), 0  ;;  %s5775_s29 = smov (!%p37_p6, %s39_s29), %s3852_s27 }
  0x3d   : > { %5643 = sst [smem:[#allocation20_spill]] %s5773_s7  ;;  %p5644_p1 = scmp.eq.s32.totalorder %s3856_s28, 0 }
  0x3e   : > { %p60_p7 = scmp.eq.s32.totalorder %s4026_s8, 0  ;;  %p41_p9 = scmp.ge.s32.totalorder %s5775_s29, 4 }
  0x3f   : > { %p4044_p4 = por %p5644_p1, %p53_p10  ;;  %s69_s16 = ssub.s32 %s3848_s26, %s5773_s7 }
  0x40   : > { %p4054_p11 = por %p60_p7, %p5618_p13  ;;  %p70_p12 = scmp.eq.s32.totalorder %s69_s16, 0 }
  0x41   : > { %s5777_s29 = smov (%p41_p9, %s5775_s29), 0  ;;  %s5648_s12 = sadd.s32 1, %s3824_s20 }
  0x42   : > { %s5646_s10 = scalar_select %p4054_p11, 1, 0 }
  0x43   : > { %5647 = sst [smem:[#allocation21_spill]] %s5777_s29  ;;  %s43_s5 = ssub.s32 %s3852_s27, %s5777_s29 }
  0x44   : > { %s4063_s1 = scalar_select %p70_p12, %s3824_s20, %s5648_s12  }
  0x45   : > { %p5650_p0 = scmp.ne.s32.totalorder %s3820_s19, %s3816_s18  ;;  %p44_p6 = scmp.eq.s32.totalorder %s43_s5, 0 }
  0x46   : > { %5649 = sst [smem:[#allocation22_spill]] %s4063_s1  ;;  %p182_p1 = scmp.eq.s32.totalorder %s4026_s8, 7 }
  0x47   : > { %p4070_p2 = por %p5650_p0, %p60_p7  ;;  %p188_p13 = scmp.eq.s32.totalorder %s2790_s9, 7 }
  0x48   : > { %s211_s7 = sand.u32 1, %s3836_s23   ;;  %p4082_p9 = por %p182_p1, %p53_p10 }
  0x49   : > { %s5651_s25 = scalar_select %p4070_p2, 1, 0 }
  0x4a   : > { %s4077_s16 = scalar_select %p44_p6, %s3836_s23, %s46_s11  }
  0x4b   : > { %s5653_s4 = scalar_select %p4082_p9, 1, 0 }
  0x4c   : > { %5652 = sst [smem:[#allocation23_spill]] %s4077_s16  ;;  %p5654_p12 = scmp.ne.s32.totalorder %s3832_s22, %s3828_s21 }
  0x4d   : > { %s2793_s18 = sshll.u32 %s211_s7, 7  ;;  %s2899_s29 = sshll.u32 %s3852_s27, 11 }
  0x4e   : > { %p4089_p11 = por %p188_p13, %p5654_p12  ;;  %s5657_s0 = sld [smem:[#allocation54_spill]] }
  0x4f   : > { %s215_s9 = scalar_lea.vmem [#allocation3], %s2793_s18  ;;  %p5658_p10 = scmp.lt.s32.totalorder %s3856_s28, 8 }
  0x50   : > { %s5655_s12 = scalar_select %p4089_p11, 1, 0 }
  0x51   : > { %s222_s11 = sshll.u32 %s215_s9, 4  ;;  %p4105_p13 = pnand %p5658_p10, %p4044_p4  ;;  %s4099_s11 = int_to_ptr.vmem [resolvable:$true] %s222_s11 }
  0x52   : > { %5656 = sst [smem:[#allocation24_spill]] %s5655_s12  ;;  %s2799_s27 = sshll.u32 %s3968_s6, 2 }
  0x53   : > { %s4110_s1 = scalar_lea.sflag [#allocation4], %s211_s7  ;;  %p3638_p0 = pneg %p4105_p13 }
  0x54   : > { %s4097_s5 = scalar_lea.hbm %s5657_s0, %s2899_s29  ;;  %s3641_s18 = scalar_lea.hbm %s5657_s0, 8192 }
  0x55   : > { %s3636_s20 = scalar_lea.hbm %s4097_s5, 2048  ;;  %p3642_p4 = scmp.lt.u32.totalorder %s4097_s5, %s5657_s0 }
  0x56   : > { %p3637_p7 = scmp.ne.s32.totalorder %s4097_s5, %s3636_s20  ;;  %p3643_p12 = scmp.lt.u32.totalorder %s3641_s18, %s3636_s20 }
  0x57   : > { %p3645_p11 = scmp.lt.u32.totalorder %s3636_s20, %s4097_s5 }
  0x58   : > { %p3639_p6 = pnand %p3638_p0, %p3637_p7  ;;  %p3644_p10 = por %p3643_p12, %p3642_p4 }
  0x5a   : > { %p3640_p1 = pneg %p3639_p6  ;;  %p3646_p9 = por %p3645_p11, %p3644_p10 }
  0x5c   : > { %p3647_p2 = pnand %p3646_p9, %p3640_p1 }
  0x5e   : > { %3650 = shalt.err (!%p3647_p2)
}
  0x5f   : > { %s3651_s7 = scalar_lea.vmem %s4099_s11, 2048  ;;  %s3862_s29 = smov [#allocation3]  }
  0x60   : > { %p3652_p7 = scmp.ne.s32.totalorder %s4099_s11, %s3651_s7  ;;  %s3656_s13 = sshll.u32 %s3862_s29, 4  ;;  %s3657_s13 = int_to_ptr.vmem [resolvable:$false] %s3656_s13 }
  0x61   : > { %s3658_s23 = scalar_lea.vmem %s3657_s13, 4096  ;;  %p3659_p5 = scmp.lt.s32.totalorder %s4099_s11, %s3657_s13 }
  0x62   : > { %p3654_p6 = pnand %p3652_p7, %p3638_p0  ;;  %p3660_p4 = scmp.lt.s32.totalorder %s3658_s23, %s3651_s7 }
  0x64   : > { %p3655_p3 = pneg %p3654_p6  ;;  %p3661_p12 = por %p3660_p4, %p3659_p5 }
  0x66   : > { %p3662_p11 = pnand %p3661_p12, %p3655_p3 }
  0x68   : > { %3665 = shalt.err (!%p3662_p11)
}
  0x69   : > { %s3863_s20 = smov 64   ;;  %s3864_s18 = smov 4  }
  0x6a   : > { %3141 = dma.hbm_to_vmem [thread:$0]  (!%p4105_p13), %s4097_s5, 2048, %s4099_s11, %s4110_s1, %s3863_s20, %s3863_s20, %s3864_s18  }
  0x6b   : > { %s2901_s9 = sshll.u32 %s3848_s26, 6  ;;  %s257_s23 = scalar_lea.vmem [#allocation8], %s2799_s27 }
  0x6c   : > { %s4145_s13 = scalar_lea.hbm %s5610_s2, %s2901_s9  ;;  %s265_s0 = sshll.u32 %s257_s23, 4  ;;  %s266_s0 = int_to_ptr.vmem [resolvable:$true] %s265_s0 }
  0x6d   : > { %s3666_s12 = scalar_lea.hbm %s4145_s13, 64  ;;  %s3671_s11 = scalar_lea.hbm %s5610_s2, 128 }
  0x6e   : > { %p3667_p5 = scmp.ne.s32.totalorder %s4145_s13, %s3666_s12  ;;  %p3672_p9 = scmp.lt.u32.totalorder %s4145_s13, %s5610_s2 }
  0x6f   : > { %p3673_p13 = scmp.lt.u32.totalorder %s3671_s11, %s3666_s12  ;;  %p3675_p1 = scmp.lt.u32.totalorder %s3666_s12, %s4145_s13 }
  0x70   : > { %p3669_p3 = pnand %p3667_p5, %p3994_p8 }
  0x71   : > { %p3674_p0 = por %p3673_p13, %p3672_p9 }
  0x72   : > { %p3670_p2 = pneg %p3669_p3 }
  0x73   : > { %p3676_p10 = por %p3675_p1, %p3674_p0 }
  0x75   : > { %p3677_p7 = pnand %p3676_p10, %p3670_p2 }
  0x77   : > { %3680 = shalt.err (!%p3677_p7)
}
  0x78   : > { %s3681_s27 = scalar_lea.vmem %s266_s0, 64  ;;  %s3865_s29 = smov [#allocation8]  }
  0x79   : > { %p3682_p6 = scmp.ne.s32.totalorder %s266_s0, %s3681_s27  ;;  %s3686_s7 = sshll.u32 %s3865_s29, 4  ;;  %s3687_s7 = int_to_ptr.vmem [resolvable:$false] %s3686_s7 }
  0x7a   : > { %s3688_s23 = scalar_lea.vmem %s3687_s7, 128  ;;  %p3689_p11 = scmp.lt.s32.totalorder %s266_s0, %s3687_s7 }
  0x7b   : > { %p3684_p4 = pnand %p3682_p6, %p3994_p8  ;;  %p3690_p5 = scmp.lt.s32.totalorder %s3688_s23, %s3681_s27 }
  0x7d   : > { %p3685_p12 = pneg %p3684_p4  ;;  %p3691_p3 = por %p3690_p5, %p3689_p11 }
  0x7f   : > { %p3692_p9 = pnand %p3691_p3, %p3685_p12 }
  0x81   : > { %3695 = shalt.err (!%p3692_p9)
}
  0x82   : > { %p5660_p13 = scmp.ne.s32.totalorder %s5639_s14, 0  ;;  %s2902_s12 = sshll.u32 %s3848_s26, 12 }
  0x83   : > { %s4171_s11 = scalar_lea.hbm %s5611_s3, %s2902_s12  ;;  %s5661_s1 = sshll.u32 %s3968_s6, 8 }
  0x84   : > { %3147 = dma.hbm_to_vmem [thread:$0]  (!%p5660_p13), %s4145_s13, 64, %s266_s0, %s3988_s15  }
  0x85   : > { %s276_s9 = scalar_lea.vmem [#allocation9], %s5661_s1  ;;  %s273_s29 = scalar_lea.sflag [#allocation10], %s3968_s6 }
  0x86   : > { %s283_s27 = sshll.u32 %s276_s9, 4  ;;  %s3696_s7 = scalar_lea.hbm %s4171_s11, 4096  ;;  %s4175_s27 = int_to_ptr.vmem [resolvable:$true] %s283_s27 }
  0x87   : > { %p3697_p2 = scmp.ne.s32.totalorder %s4171_s11, %s3696_s7  ;;  %s3701_s13 = scalar_lea.hbm %s5611_s3, 8192 }
  0x88   : > { %p3702_p10 = scmp.lt.u32.totalorder %s4171_s11, %s5611_s3  ;;  %p3703_p7 = scmp.lt.u32.totalorder %s3701_s13, %s3696_s7 }
  0x89   : > { %p3699_p0 = pnand %p3697_p2, %p3994_p8  ;;  %p3705_p4 = scmp.lt.u32.totalorder %s3696_s7, %s4171_s11 }
  0x8a   : > { %p3704_p6 = por %p3703_p7, %p3702_p10 }
  0x8b   : > { %p3700_p1 = pneg %p3699_p0 }
  0x8c   : > { %p3706_p12 = por %p3705_p4, %p3704_p6 }
  0x8e   : > { %p3707_p11 = pnand %p3706_p12, %p3700_p1 }
  0x90   : > { %3710 = shalt.err (!%p3707_p11)
}
  0x91   : > { %s3711_s16 = scalar_lea.vmem %s4175_s27, 4096  ;;  %s3866_s5 = smov [#allocation9]  }
  0x92   : > { %p3712_p5 = scmp.ne.s32.totalorder %s4175_s27, %s3711_s16  ;;  %s3716_s1 = sshll.u32 %s3866_s5, 4  ;;  %s3717_s1 = int_to_ptr.vmem [resolvable:$false] %s3716_s1 }
  0x93   : > { %s3718_s9 = scalar_lea.vmem %s3717_s1, 8192  ;;  %p3719_p2 = scmp.lt.s32.totalorder %s4175_s27, %s3717_s1 }
  0x94   : > { %p3714_p3 = pnand %p3712_p5, %p3994_p8  ;;  %p3720_p0 = scmp.lt.s32.totalorder %s3718_s9, %s3711_s16 }
  0x96   : > { %p3715_p9 = pneg %p3714_p3  ;;  %p3721_p10 = por %p3720_p0, %p3719_p2 }
  0x98   : > { %p3722_p7 = pnand %p3721_p10, %p3715_p9 }
  0x9a   : > { %3725 = shalt.err (!%p3722_p7)
}
  0x9b   : > { %3150 = dma.hbm_to_vmem [thread:$0]  (!%p5660_p13), %s4171_s11, 4096, %s4175_s27, %s273_s29, %s3863_s20, %s3863_s20, %s3864_s18  }
  0x9c   : > { %p5662_p8 = scmp.ne.s32.totalorder %s5642_s30, 0 }
  0x9e   : > { %295 = sbr.rel (%p5662_p8) target bundleno = 923 (0x39b), region = 40 }
  0xa5   : > { %s4207_s17 = sand.u32 1, %s3832_s22   ;;  %p5663_p1 = scmp.ne.s32.totalorder %s5646_s10, 0 }
  0xa6   : > { %s2806_s7 = sshll.u32 %s4207_s17, 7  ;;  %s298_s0 = scalar_lea.sflag [#allocation4], %s4207_s17 }
  0xa7   : > { %s4211_s14 = scalar_lea.vmem [#allocation3], %s2806_s7 }
  0xa8   : > { %3799 = dma.done.wait (%p5663_p1), %s298_s0, 2048  }
  0xa9   : > { %3801 = vsyncadd (%p5663_p1), %s298_s0, 4294965248  ;;  %s306_s6 = sand.u32 1, %s4026_s8   ;;  %s308_s30 = sand.u32 1, %s3820_s19  }
  0xaa   : > { %s2807_s20 = sshll.u32 %s308_s30, 8  ;;  %s307_s18 = scalar_lea.sflag [#allocation7], %s306_s6 }
  0xab   : > { %s4219_s11 = scalar_lea.vmem [#allocation6], %s2807_s20  ;;  %p5664_p13 = scmp.ne.s32.totalorder %s5651_s25, 0 }
  0xad   : > { %3803 = dma.done.wait (%p5664_p13), %s307_s18, 4160  }
  0xae   : > { %3805 = vsyncadd (%p5664_p13), %s307_s18, 4294963136  ;;  %s2808_s27 = sshll.u32 %s308_s30, 2  ;;  %s325_s10 = scalar_lea.sflag [#allocation10], %s308_s30 }
  0xaf   : > { %s4225_s29 = scalar_lea.vmem [#allocation8], %s2808_s27  ;;  %s4227_s15 = scalar_lea.vmem [#allocation9], %s2807_s20 }
  0xb0   : > { %3807 = dma.done.wait (%p5664_p13), %s325_s10, 4096  }
  0xb1   : > { %3809 = vsyncadd (%p5664_p13), %s325_s10, 4294963200  ;;  %s2810_s8 = sshll.u32 %s4207_s17, 8  ;;  %p2811_p6 = scmp.ne.s32.totalorder %s3840_s24, 0 }
  0xb2   : > { %s4234_s13 = scalar_lea.vmem [#allocation11], %s2810_s8  ;;  %v3867_v0 = vmov (!%p2811_p6), 0.0  }
  0xb3   : > { %379 = sbr.rel (%p2811_p6) target bundleno = 195 (0xc3), region = 60  ;;  %380 = vst [vmem:[#allocation2] sm:$0xff] (!%p2811_p6), %v3867_v0  ;;  %381 = vst [vmem:[#allocation2 + $0x8] sm:$0xff] (!%p2811_p6), %v3867_v0 }
  0xb4   : > { %382 = vst [vmem:[#allocation2 + $0x10] sm:$0xff] (!%p2811_p6), %v3867_v0  ;;  %383 = vst [vmem:[#allocation2 + $0x18] sm:$0xff] (!%p2811_p6), %v3867_v0 }
  0xb5   : > { %384 = vst [vmem:[#allocation2 + $0x20] sm:$0xff] (!%p2811_p6), %v3867_v0  ;;  %385 = vst [vmem:[#allocation2 + $0x28] sm:$0xff] (!%p2811_p6), %v3867_v0 }
  0xb6   : > { %386 = vst [vmem:[#allocation2 + $0x30] sm:$0xff] (!%p2811_p6), %v3867_v0  ;;  %387 = vst [vmem:[#allocation2 + $0x38] sm:$0xff] (!%p2811_p6), %v3867_v0 }
  0xb7   : > { %388 = vst [vmem:[#allocation2 + $0x40] sm:$0xff] (!%p2811_p6), %v3867_v0  ;;  %389 = vst [vmem:[#allocation2 + $0x48] sm:$0xff] (!%p2811_p6), %v3867_v0 }
  0xb8   : > { %390 = vst [vmem:[#allocation2 + $0x50] sm:$0xff] (!%p2811_p6), %v3867_v0  ;;  %391 = vst [vmem:[#allocation2 + $0x58] sm:$0xff] (!%p2811_p6), %v3867_v0 }
  0xb9   : > { %392 = vst [vmem:[#allocation2 + $0x60] sm:$0xff] (!%p2811_p6), %v3867_v0  ;;  %393 = vst [vmem:[#allocation2 + $0x68] sm:$0xff] (!%p2811_p6), %v3867_v0 }
  0xba   : > { %394 = vst [vmem:[#allocation2 + $0x70] sm:$0xff] %v3867_v0  ;;  %395 = vst [vmem:[#allocation2 + $0x78] sm:$0xff] %v3867_v0 }
  0xbb   : > { %396 = vst [vmem:[#allocation2 + $0x80] sm:$0xff] %v3867_v0  ;;  %397 = vst [vmem:[#allocation2 + $0x88] sm:$0xff] %v3867_v0 }
  0xbc   : > { %398 = vst [vmem:[#allocation2 + $0x90] sm:$0xff] %v3867_v0  ;;  %399 = vst [vmem:[#allocation2 + $0x98] sm:$0xff] %v3867_v0 }
  0xbd   : > { %400 = vst [vmem:[#allocation2 + $0xa0] sm:$0xff] %v3867_v0  ;;  %401 = vst [vmem:[#allocation2 + $0xa8] sm:$0xff] %v3867_v0 }
  0xbe   : > { %402 = vst [vmem:[#allocation2 + $0xb0] sm:$0xff] %v3867_v0  ;;  %403 = vst [vmem:[#allocation2 + $0xb8] sm:$0xff] %v3867_v0 }
  0xbf   : > { %404 = vst [vmem:[#allocation2 + $0xc0] sm:$0xff] %v3867_v0  ;;  %405 = vst [vmem:[#allocation2 + $0xc8] sm:$0xff] %v3867_v0 }
  0xc0   : > { %406 = vst [vmem:[#allocation2 + $0xd0] sm:$0xff] %v3867_v0  ;;  %407 = vst [vmem:[#allocation2 + $0xd8] sm:$0xff] %v3867_v0 }
  0xc1   : > { %408 = vst [vmem:[#allocation2 + $0xe0] sm:$0xff] %v3867_v0  ;;  %409 = vst [vmem:[#allocation2 + $0xe8] sm:$0xff] %v3867_v0 }
  0xc2   : > { %410 = vst [vmem:[#allocation2 + $0xf0] sm:$0xff] %v3867_v0  ;;  %411 = vst [vmem:[#allocation2 + $0xf8] sm:$0xff] %v3867_v0 }
  0xc3 PF: > { %v3254_v1 = vld [vmem:[%s4219_s11 + $0x4] ss:$16 sps:$4 sm:$0xff]   ;;  %v3256_v2 = vld [vmem:[%s4219_s11 + $0xc] ss:$16 sps:$4 sm:$0xff]   ;;  %v3868_v3 = vmov 0   ;;  %p2892_p4 = scmp.ne.s32.totalorder %s3840_s24, 1 }
  0xc4   : > { %786 = vmatprep.mubr.bf16.mxu0 %v3868_v3  ;;  %979 = vmatprep.mubr.bf16.mxu1 %v3868_v3  ;;  %v3258_v4 = vld [vmem:[%s4219_s11] ss:$16 sps:$4 sm:$0xff]   ;;  %v3259_v5 = vld [vmem:[%s4219_s11 + $0x8] ss:$16 sps:$4 sm:$0xff]   ;;  %v3260_v6 = vld [vmem:[%s4219_s11 + $0x24] ss:$16 sps:$4 sm:$0xff]  }
  0xc5   : > { %754 = vmatprep.subr.bf16.mxu0 %v3254_v1  ;;  %947 = vmatprep.subr.bf16.mxu1 %v3256_v2  ;;  %v3262_v7 = vld [vmem:[%s4219_s11 + $0x2c] ss:$16 sps:$4 sm:$0xff]   ;;  %v3264_v8 = vld [vmem:[%s4219_s11 + $0x20] ss:$16 sps:$4 sm:$0xff]   ;;  %v3265_v9 = vld [vmem:[%s4219_s11 + $0x28] ss:$16 sps:$4 sm:$0xff]  }
  0xc6   : > { %755 = vmatpush1.bf16.msra.mxu0 %v3258_v4  ;;  %948 = vmatpush1.bf16.msra.mxu1 %v3259_v5  ;;  %v3266_v10 = vld [vmem:[%s4219_s11 + $0x44] ss:$16 sps:$4 sm:$0xff]   ;;  %v3268_v11 = vld [vmem:[%s4219_s11 + $0x4c] ss:$16 sps:$4 sm:$0xff]   ;;  %v3270_v12 = vld [vmem:[%s4219_s11 + $0x40] ss:$16 sps:$4 sm:$0xff]  }
  0xc7   : > { %756 = vmatprep.subr.bf16.mxu0 %v3260_v6  ;;  %949 = vmatprep.subr.bf16.mxu1 %v3262_v7  ;;  %v3271_v13 = vld [vmem:[%s4219_s11 + $0x48] ss:$16 sps:$4 sm:$0xff]   ;;  %v3272_v14 = vld [vmem:[%s4219_s11 + $0x64] ss:$16 sps:$4 sm:$0xff]   ;;  %v3274_v15 = vld [vmem:[%s4219_s11 + $0x6c] ss:$16 sps:$4 sm:$0xff]  }
  0xc8   : > { %v3276_v16 = vld [vmem:[%s4219_s11 + $0x60] ss:$16 sps:$4 sm:$0xff]   ;;  %v3277_v17 = vld [vmem:[%s4219_s11 + $0x68] ss:$16 sps:$4 sm:$0xff]   ;;  %v3278_v18 = vld [vmem:[%s4219_s11 + $0x84] ss:$16 sps:$4 sm:$0xff]  }
  0xc9   : > { %v3280_v19 = vld [vmem:[%s4219_s11 + $0x8c] ss:$16 sps:$4 sm:$0xff]   ;;  %v3282_v20 = vld [vmem:[%s4219_s11 + $0x80] ss:$16 sps:$4 sm:$0xff]   ;;  %v3283_v21 = vld [vmem:[%s4219_s11 + $0x88] ss:$16 sps:$4 sm:$0xff]  }
  0xca   : > { %757 = vmatpush1.bf16.msra.mxu0 %v3264_v8  ;;  %950 = vmatpush1.bf16.msra.mxu1 %v3265_v9  ;;  %v3284_v22 = vld [vmem:[%s4219_s11 + $0xa4] ss:$16 sps:$4 sm:$0xff]   ;;  %v3286_v23 = vld [vmem:[%s4219_s11 + $0xac] ss:$16 sps:$4 sm:$0xff]   ;;  %v3288_v24 = vld [vmem:[%s4219_s11 + $0xa0] ss:$16 sps:$4 sm:$0xff]  }
  0xcb   : > { %758 = vmatprep.subr.bf16.mxu0 %v3266_v10  ;;  %951 = vmatprep.subr.bf16.mxu1 %v3268_v11  ;;  %v3289_v25 = vld [vmem:[%s4219_s11 + $0xa8] ss:$16 sps:$4 sm:$0xff]   ;;  %v3290_v26 = vld [vmem:[%s4219_s11 + $0xc4] ss:$16 sps:$4 sm:$0xff]   ;;  %v3292_v27 = vld [vmem:[%s4219_s11 + $0xcc] ss:$16 sps:$4 sm:$0xff]  }
  0xcc   : > { %v3294_v28 = vld [vmem:[%s4219_s11 + $0xc0] ss:$16 sps:$4 sm:$0xff]   ;;  %v3295_v29 = vld [vmem:[%s4219_s11 + $0xc8] ss:$16 sps:$4 sm:$0xff]   ;;  %v3296_v30 = vld [vmem:[%s4219_s11 + $0xe4] ss:$16 sps:$4 sm:$0xff]  }
  0xcd   : > { %v3298_v31 = vld [vmem:[%s4219_s11 + $0xec] ss:$16 sps:$4 sm:$0xff]   ;;  %v3300_v32 = vld [vmem:[%s4219_s11 + $0xe0] ss:$16 sps:$4 sm:$0xff]   ;;  %v3301_v33 = vld [vmem:[%s4219_s11 + $0xe8] ss:$16 sps:$4 sm:$0xff]  }
  0xce   : > { %759 = vmatpush1.bf16.msra.mxu0 %v3270_v12  ;;  %952 = vmatpush1.bf16.msra.mxu1 %v3271_v13  ;;  %v3302_v34 = vld [vmem:[%s4211_s14] sm:$0xff]   ;;  %v3316_v35 = vld [vmem:[%s4227_s15 + $0x40] sm:$0xff]   ;;  %v3322_v40 = vld [vmem:[%s4227_s15 + $0x48] sm:$0xff]   ;;  %s5753_s12 = sld [smem:[#allocation56_spill]] (!%p2892_p4) }
  0xcf   : > { %760 = vmatprep.subr.bf16.mxu0 %v3272_v14  ;;  %953 = vmatprep.subr.bf16.mxu1 %v3274_v15  ;;  %v3303_v36 = vld [vmem:[%s4211_s14 + $0x8] sm:$0xff]   ;;  %v3323_v41 = vld [vmem:[%s4227_s15 + $0xc8] sm:$0xff]   ;;  %v3326_v45 = vld [vmem:[%s4227_s15 + $0x50] sm:$0xff]  }
  0xd0   : > { %v3317_v37 = vld [vmem:[%s4227_s15 + $0xc0] sm:$0xff]   ;;  %v3324_v42 = vld [vmem:[%s4227_s15 + $0x8] sm:$0xff]   ;;  %v3327_v46 = vld [vmem:[%s4227_s15 + $0xd0] sm:$0xff]  }
  0xd1   : > { %v3318_v38 = vld [vmem:[%s4227_s15] sm:$0xff]   ;;  %v3304_v43 = vld [vmem:[%s4211_s14 + $0x10] sm:$0xff]   ;;  %v3328_v47 = vld [vmem:[%s4227_s15 + $0x10] sm:$0xff]  }
  0xd2   : > { %761 = vmatpush1.bf16.msra.mxu0 %v3276_v16  ;;  %954 = vmatpush1.bf16.msra.mxu1 %v3277_v17  ;;  %v3319_v39 = vld [vmem:[%s4227_s15 + $0x80] sm:$0xff]   ;;  %v3325_v44 = vld [vmem:[%s4227_s15 + $0x88] sm:$0xff]   ;;  %v3329_v48 = vld [vmem:[%s4227_s15 + $0x90] sm:$0xff]  }
  0xd3   : > { %762 = vmatprep.subr.bf16.mxu0 %v3278_v18  ;;  %955 = vmatprep.subr.bf16.mxu1 %v3280_v19  ;;  %v3330_v49 = vld [vmem:[%s4227_s15 + $0x58] sm:$0xff]   ;;  %v3305_v52 = vld [vmem:[%s4211_s14 + $0x18] sm:$0xff]   ;;  %v3334_v54 = vld [vmem:[%s4227_s15 + $0x60] sm:$0xff]   ;;  %v478_v19 = vlaneseq }
  0xd4   : > { %v3331_v50 = vld [vmem:[%s4227_s15 + $0xd8] sm:$0xff]   ;;  %v3335_v55 = vld [vmem:[%s4227_s15 + $0xe0] sm:$0xff]   ;;  %v3338_v58 = vld [vmem:[%s4227_s15 + $0x68] sm:$0xff]  }
  0xd5   : > { %v3332_v51 = vld [vmem:[%s4227_s15 + $0x18] sm:$0xff]   ;;  %v3336_v56 = vld [vmem:[%s4227_s15 + $0x20] sm:$0xff]   ;;  %v3339_v59 = vld [vmem:[%s4227_s15 + $0xe8] sm:$0xff]  }
  0xd6   : > { %763 = vmatpush1.bf16.msra.mxu0 %v3282_v20  ;;  %956 = vmatpush1.bf16.msra.mxu1 %v3283_v21  ;;  %v3333_v53 = vld [vmem:[%s4227_s15 + $0x98] sm:$0xff]   ;;  %v3337_v57 = vld [vmem:[%s4227_s15 + $0xa0] sm:$0xff]   ;;  %v3340_v60 = vld [vmem:[%s4227_s15 + $0x28] sm:$0xff]   ;;  %v479_v20 = vshrl.u32 %v478_v19, 7 }
  0xd7   : > { %764 = vmatprep.subr.bf16.mxu0 %v3284_v22  ;;  %957 = vmatprep.subr.bf16.mxu1 %v3286_v23  ;;  %v3306_v61 = vld [vmem:[%s4211_s14 + $0x20] sm:$0xff]   ;;  %v3341_v62 = vld [vmem:[%s4227_s15 + $0xa8] sm:$0xff]   ;;  %v3342_v63 = vld [vmem:[%s4227_s15 + $0x70] sm:$0xff]  }
  0xd8   : > { %v3343_v0 = vld [vmem:[%s4227_s15 + $0xf0] sm:$0xff]   ;;  %v3307_v4 = vld [vmem:[%s4211_s14 + $0x28] sm:$0xff]   ;;  %v3308_v5 = vld [vmem:[%s4211_s14 + $0x30] sm:$0xff]   ;;  %v480_v21 = vsub.s32 0, %v479_v20  ;;  %v488_v22 = vsub.s32 2, %v479_v20 }
  0xd9   : > { %v3344_v1 = vld [vmem:[%s4227_s15 + $0x30] sm:$0xff]   ;;  %v3310_v7 = vld [vmem:[%s4211_s14 + $0x40] sm:$0xff]   ;;  %v3311_v8 = vld [vmem:[%s4211_s14 + $0x48] sm:$0xff]  }
  0xda   : > { %765 = vmatpush1.bf16.msra.mxu0 %v3288_v24  ;;  %958 = vmatpush1.bf16.msra.mxu1 %v3289_v25  ;;  %v3345_v2 = vld [vmem:[%s4227_s15 + $0xb0] sm:$0xff]   ;;  %v3312_v9 = vld [vmem:[%s4211_s14 + $0x50] sm:$0xff]   ;;  %v3314_v11 = vld [vmem:[%s4211_s14 + $0x60] sm:$0xff]   ;;  %v484_v24 = vsub.s32 1, %v479_v20  ;;  %v492_v25 = vsub.s32 3, %v479_v20 }
  0xdb   : > { %766 = vmatprep.subr.bf16.mxu0 %v3290_v26  ;;  %959 = vmatprep.subr.bf16.mxu1 %v3292_v27  ;;  %v3309_v6 = vld [vmem:[%s4211_s14 + $0x38] sm:$0xff]   ;;  %v3315_v12 = vld [vmem:[%s4211_s14 + $0x68] sm:$0xff]   ;;  %v3346_v13 = vld [vmem:[%s4227_s15 + $0x78] sm:$0xff]  }
  0xdc   : > { %v3313_v10 = vld [vmem:[%s4211_s14 + $0x58] sm:$0xff]   ;;  %v3347_v14 = vld [vmem:[%s4227_s15 + $0xf8] sm:$0xff]   ;;  %v3320_v15 = vld [vmem:[%s4211_s14 + $0x70] sm:$0xff]  }
  0xdd   : > { %v3348_v16 = vld [vmem:[%s4227_s15 + $0x38] sm:$0xff]   ;;  %v3321_v18 = vld [vmem:[%s4211_s14 + $0x78] sm:$0xff]  }
  0xde   : > { %767 = vmatpush1.bf16.msra.mxu0 %v3294_v28  ;;  %960 = vmatpush1.bf16.msra.mxu1 %v3295_v29  ;;  %v3349_v17 = vld [vmem:[%s4227_s15 + $0xb8] sm:$0xff]  }
  0xdf   : > { %768 = vmatprep.subr.bf16.mxu0 %v3296_v30  ;;  %961 = vmatprep.subr.bf16.mxu1 %v3298_v31  ;;  %v476_v23 = vld [vmem:[%s4225_s29] sm:$0xf] }
  0xe0   : > { %v4350_v26 = vrot.slane %v476_v23, %v480_v21  ;;  %v4352_v27 = vrot.slane %v476_v23, %v488_v22  ;;  %v4354_v28 = vrot.slane %v476_v23, %v484_v24  ;;  %v4356_v29 = vrot.slane %v476_v23, %v492_v25 }
  0xe2   : > { %769 = vmatpush1.bf16.msra.mxu0 %v3300_v32  ;;  %962 = vmatpush1.bf16.msra.mxu1 %v3301_v33 }
  0xe3   : > { %2904 = vmatprep.subr.bf16.mxu0 %v3316_v35  ;;  %3016 = vmatprep.subr.bf16.mxu1 %v3317_v37 }
  0xe5   : > { %787 = vmatmul.mubr.bf16.vlgmr.msra.gmra.mrb[0].mxu0 %v3302_v34  ;;  %980 = vmatmul.mubr.bf16.vlgmr.msra.gmra.mrb[0].mxu1 %v3302_v34 }
  0xe6   : > { %796 = vmatprep.mubr.bf16.mxu0 %v3868_v3  ;;  %989 = vmatprep.mubr.bf16.mxu1 %v3868_v3 }
  0xe7   : > { %2905 = vmatpush3.bf16.msra.mxu0 %v3318_v38  ;;  %3017 = vmatpush3.bf16.msra.mxu1 %v3319_v39 }
  0xe8   : > { %2906 = vmatprep.subr.bf16.mxu0 %v3322_v40  ;;  %3018 = vmatprep.subr.bf16.mxu1 %v3323_v41 }
  0xeb   : > { %2907 = vmatpush3.bf16.msra.mxu0 %v3324_v42  ;;  %3019 = vmatpush3.bf16.msra.mxu1 %v3325_v44 }
  0xec   : > { %2908 = vmatprep.subr.bf16.mxu0 %v3326_v45  ;;  %3020 = vmatprep.subr.bf16.mxu1 %v3327_v46 }
  0xed   : > { %797 = vmatmul.mubr.bf16.gmra.mrb[4].mxu0 %v3303_v36  ;;  %990 = vmatmul.mubr.bf16.gmra.mrb[4].mxu1 %v3303_v36 }
  0xee   : > { %806 = vmatprep.mubr.bf16.mxu0 %v3868_v3  ;;  %999 = vmatprep.mubr.bf16.mxu1 %v3868_v3 }
  0xef   : > { %2909 = vmatpush3.bf16.msra.mxu0 %v3328_v47  ;;  %3021 = vmatpush3.bf16.msra.mxu1 %v3329_v48 }
  0xf0   : > { %2910 = vmatprep.subr.bf16.mxu0 %v3330_v49  ;;  %3022 = vmatprep.subr.bf16.mxu1 %v3331_v50 }
  0xf3   : > { %2911 = vmatpush3.bf16.msra.mxu0 %v3332_v51  ;;  %3023 = vmatpush3.bf16.msra.mxu1 %v3333_v53 }
  0xf4   : > { %2912 = vmatprep.subr.bf16.mxu0 %v3334_v54  ;;  %3024 = vmatprep.subr.bf16.mxu1 %v3335_v55 }
  0xf5   : > { %807 = vmatmul.mubr.bf16.gmra.mrb[8].mxu0 %v3304_v43  ;;  %1000 = vmatmul.mubr.bf16.gmra.mrb[8].mxu1 %v3304_v43 }
  0xf6   : > { %816 = vmatprep.mubr.bf16.mxu0 %v3868_v3  ;;  %1009 = vmatprep.mubr.bf16.mxu1 %v3868_v3 }
  0xf7   : > { %2913 = vmatpush3.bf16.msra.mxu0 %v3336_v56  ;;  %3025 = vmatpush3.bf16.msra.mxu1 %v3337_v57 }
  0xf8   : > { %2914 = vmatprep.subr.bf16.mxu0 %v3338_v58  ;;  %3026 = vmatprep.subr.bf16.mxu1 %v3339_v59 }
  0xfb   : > { %2915 = vmatpush3.bf16.msra.mxu0 %v3340_v60  ;;  %3027 = vmatpush3.bf16.msra.mxu1 %v3341_v62 }
  0xfc   : > { %2916 = vmatprep.subr.bf16.mxu0 %v3342_v63  ;;  %3028 = vmatprep.subr.bf16.mxu1 %v3343_v0 }
  0xfd   : > { %817 = vmatmul.mubr.bf16.gmra.mrb[12].mxu0 %v3305_v52  ;;  %1010 = vmatmul.mubr.bf16.gmra.mrb[12].mxu1 %v3305_v52 }
  0xfe   : > { %826 = vmatprep.mubr.bf16.mxu0 %v3868_v3  ;;  %1019 = vmatprep.mubr.bf16.mxu1 %v3868_v3 }
  0xff   : > { %2917 = vmatpush3.bf16.msra.mxu0 %v3344_v1  ;;  %3029 = vmatpush3.bf16.msra.mxu1 %v3345_v2 }
 0x100   : > { %2918 = vmatprep.subr.bf16.mxu0 %v3346_v13  ;;  %3030 = vmatprep.subr.bf16.mxu1 %v3347_v14 }
 0x103   : > { %2919 = vmatpush3.bf16.msra.mxu0 %v3348_v16  ;;  %3031 = vmatpush3.bf16.msra.mxu1 %v3349_v17 }
 0x105   : > { %827 = vmatmul.mubr.bf16.gmra.mrb[16].mxu0 %v3306_v61  ;;  %1020 = vmatmul.mubr.bf16.gmra.mrb[16].mxu1 %v3306_v61 }
 0x106   : > { %836 = vmatprep.mubr.bf16.mxu0 %v3868_v3  ;;  %1029 = vmatprep.mubr.bf16.mxu1 %v3868_v3 }
 0x10d   : > { %837 = vmatmul.mubr.bf16.gmra.mrb[20].mxu0 %v3307_v4  ;;  %1030 = vmatmul.mubr.bf16.gmra.mrb[20].mxu1 %v3307_v4 }
 0x10e   : > { %846 = vmatprep.mubr.bf16.mxu0 %v3868_v3  ;;  %1039 = vmatprep.mubr.bf16.mxu1 %v3868_v3 }
 0x115   : > { %847 = vmatmul.mubr.bf16.gmra.mrb[24].mxu0 %v3308_v5  ;;  %1040 = vmatmul.mubr.bf16.gmra.mrb[24].mxu1 %v3308_v5 }
 0x116   : > { %856 = vmatprep.mubr.bf16.mxu0 %v3868_v3  ;;  %1049 = vmatprep.mubr.bf16.mxu1 %v3868_v3 }
 0x11d   : > { %857 = vmatmul.mubr.bf16.gmra.mrb[28].mxu0 %v3309_v6  ;;  %1050 = vmatmul.mubr.bf16.gmra.mrb[28].mxu1 %v3309_v6 }
 0x11e   : > { %866 = vmatprep.mubr.bf16.mxu0 %v3868_v3  ;;  %1059 = vmatprep.mubr.bf16.mxu1 %v3868_v3 }
 0x125   : > { %867 = vmatmul.mubr.bf16.gmra.mrb[32].mxu0 %v3310_v7  ;;  %1060 = vmatmul.mubr.bf16.gmra.mrb[32].mxu1 %v3310_v7 }
 0x126   : > { %876 = vmatprep.mubr.bf16.mxu0 %v3868_v3  ;;  %1069 = vmatprep.mubr.bf16.mxu1 %v3868_v3 }
 0x12d   : > { %877 = vmatmul.mubr.bf16.gmra.mrb[36].mxu0 %v3311_v8  ;;  %1070 = vmatmul.mubr.bf16.gmra.mrb[36].mxu1 %v3311_v8 }
 0x12e   : > { %886 = vmatprep.mubr.bf16.mxu0 %v3868_v3  ;;  %1079 = vmatprep.mubr.bf16.mxu1 %v3868_v3 }
 0x135   : > { %887 = vmatmul.mubr.bf16.gmra.mrb[40].mxu0 %v3312_v9  ;;  %1080 = vmatmul.mubr.bf16.gmra.mrb[40].mxu1 %v3312_v9 }
 0x136   : > { %896 = vmatprep.mubr.bf16.mxu0 %v3868_v3  ;;  %1089 = vmatprep.mubr.bf16.mxu1 %v3868_v3 }
 0x13d   : > { %897 = vmatmul.mubr.bf16.gmra.mrb[44].mxu0 %v3313_v10  ;;  %1090 = vmatmul.mubr.bf16.gmra.mrb[44].mxu1 %v3313_v10 }
 0x13e   : > { %906 = vmatprep.mubr.bf16.mxu0 %v3868_v3  ;;  %1099 = vmatprep.mubr.bf16.mxu1 %v3868_v3 }
 0x145   : > { %907 = vmatmul.mubr.bf16.gmra.mrb[48].mxu0 %v3314_v11  ;;  %1100 = vmatmul.mubr.bf16.gmra.mrb[48].mxu1 %v3314_v11 }
 0x146   : > { %916 = vmatprep.mubr.bf16.mxu0 %v3868_v3  ;;  %1109 = vmatprep.mubr.bf16.mxu1 %v3868_v3 }
 0x14d   : > { %917 = vmatmul.mubr.bf16.gmra.mrb[52].mxu0 %v3315_v12  ;;  %1110 = vmatmul.mubr.bf16.gmra.mrb[52].mxu1 %v3315_v12 }
 0x14e   : > { %926 = vmatprep.mubr.bf16.mxu0 %v3868_v3  ;;  %1119 = vmatprep.mubr.bf16.mxu1 %v3868_v3 }
 0x155   : > { %927 = vmatmul.mubr.bf16.gmra.mrb[56].mxu0 %v3320_v15  ;;  %1120 = vmatmul.mubr.bf16.gmra.mrb[56].mxu1 %v3320_v15 }
 0x156   : > { %936 = vmatprep.mubr.bf16.mxu0 %v3868_v3  ;;  %1129 = vmatprep.mubr.bf16.mxu1 %v3868_v3 }
 0x15d   : > { %937 = vmatmul.mubr.bf16.gmra.mrb[60].mxu0 %v3321_v18  ;;  %1130 = vmatmul.mubr.bf16.gmra.mrb[60].mxu1 %v3321_v18 }
 0x1b8   : > { %v788_v30 = vpop.f32.mrb[0].mxu0  ;;  %v981_v3 = vpop.f32.mrb[0].mxu1 }
 0x1b9   : > { %v789_v31 = vadd.f32 %v788_v30, %v4350_v26  ;;  %v982_v32 = vadd.f32 %v981_v3, %v4352_v27  ;;  %v790_v33 = vpop.f32.mrb[1].mxu0  ;;  %v983_v34 = vpop.f32.mrb[1].mxu1 }
 0x1ba   : > { %v791_v35 = vadd.f32 %v790_v33, %v4354_v28  ;;  %v984_v36 = vadd.f32 %v983_v34, %v4356_v29  ;;  %v792_v37 = vpop.f32.mrb[2].mxu0  ;;  %v985_v38 = vpop.f32.mrb[2].mxu1 }
 0x1bb   : > { %v1268_v39 = vmul.f32 0.70710677, %v789_v31  ;;  %v1270_v40 = vmul.f32 0.70710677, %v982_v32  ;;  %v793_v43 = vadd.f32 %v792_v37, %v4350_v26  ;;  %v986_v44 = vadd.f32 %v985_v38, %v4352_v27  ;;  %v794_v45 = vpop.f32.mrb[3].mxu0  ;;  %v987_v46 = vpop.f32.mrb[3].mxu1 }
 0x1bc   : > { %v1269_v41 = vmul.f32 0.70710677, %v791_v35  ;;  %v1271_v42 = vmul.f32 0.70710677, %v984_v36  ;;  %v795_v47 = vadd.f32 %v794_v45, %v4354_v28  ;;  %v988_v48 = vadd.f32 %v987_v46, %v4356_v29 }
 0x1bd   : > { %3350 = verf.f32 %v1268_v39  ;;  %v1272_v49 = vmul.f32 0.70710677, %v793_v43  ;;  %v1274_v50 = vmul.f32 0.70710677, %v986_v44  ;;  %v1140_v4 = vmul.f32 0.5, %v789_v31 }
 0x1be   : > { %3352 = verf.f32 %v1270_v40  ;;  %v1273_v51 = vmul.f32 0.70710677, %v795_v47  ;;  %v1275_v53 = vmul.f32 0.70710677, %v988_v48  ;;  %v1142_v11 = vmul.f32 0.5, %v982_v32 }
 0x1bf   : > { %3354 = verf.f32 %v1269_v41  ;;  %v1141_v12 = vmul.f32 0.5, %v791_v35  ;;  %v4373_v13 = vmul.f32 0.5, %v984_v36  ;;  %v1144_v14 = vmul.f32 0.5, %v793_v43 }
 0x1c0   : > { %3356 = verf.f32 %v1271_v42  ;;  %v798_v52 = vpop.f32.mrb[4].mxu0  ;;  %v991_v55 = vpop.f32.mrb[4].mxu1  ;;  %v1146_v17 = vmul.f32 0.5, %v986_v44  ;;  %v4375_v22 = vmul.f32 0.5, %v795_v47  ;;  %v4377_v23 = vmul.f32 0.5, %v988_v48 }
 0x1c1   : > { %3358 = verf.f32 %v1272_v49  ;;  %v799_v54 = vadd.f32 %v798_v52, %v4350_v26  ;;  %v800_v56 = vpop.f32.mrb[5].mxu0  ;;  %v992_v57 = vadd.f32 %v991_v55, %v4352_v27  ;;  %v993_v59 = vpop.f32.mrb[5].mxu1 }
 0x1c2   : > { %3360 = verf.f32 %v1274_v50  ;;  %v801_v58 = vadd.f32 %v800_v56, %v4354_v28  ;;  %v802_v60 = vpop.f32.mrb[6].mxu0  ;;  %v994_v62 = vadd.f32 %v993_v59, %v4356_v29  ;;  %v995_v63 = vpop.f32.mrb[6].mxu1 }
 0x1c3   : > { %3362 = verf.f32 %v1273_v51  ;;  %v1276_v61 = vmul.f32 0.70710677, %v799_v54  ;;  %v804_v0 = vpop.f32.mrb[7].mxu0  ;;  %v1278_v1 = vmul.f32 0.70710677, %v992_v57  ;;  %v997_v2 = vpop.f32.mrb[7].mxu1  ;;  %v803_v7 = vadd.f32 %v802_v60, %v4350_v26 }
 0x1c4   : > { %3364 = verf.f32 %v1275_v53  ;;  %v1277_v5 = vmul.f32 0.70710677, %v801_v58  ;;  %v1279_v6 = vmul.f32 0.70710677, %v994_v62  ;;  %v996_v8 = vadd.f32 %v995_v63, %v4352_v27 }
 0x1c5   : > { %3366 = verf.f32 %v1276_v61  ;;  %v805_v9 = vadd.f32 %v804_v0, %v4354_v28  ;;  %v1280_v18 = vmul.f32 0.70710677, %v803_v7  ;;  %v998_v25 = vadd.f32 %v997_v2, %v4356_v29 }
 0x1c6   : > { %3368 = verf.f32 %v1278_v1  ;;  %v1282_v24 = vmul.f32 0.70710677, %v996_v8  ;;  %v4380_v32 = vmul.f32 0.5, %v799_v54  ;;  %v4382_v37 = vmul.f32 0.5, %v992_v57 }
 0x1c7   : > { %v3351_v10 = vpop.eup %3350  ;;  %3370 = verf.f32 %v1277_v5  ;;  %v1281_v33 = vmul.f32 0.70710677, %v805_v9  ;;  %v4384_v38 = vmul.f32 0.5, %v801_v58  ;;  %v4386_v39 = vmul.f32 0.5, %v994_v62 }
 0x1c8   : > { %v3353_v15 = vpop.eup %3352  ;;  %v1524_v16 = vadd.f32 1.0, %v3351_v10  ;;  %v808_v19 = vpop.f32.mrb[8].mxu0  ;;  %3372 = verf.f32 %v1279_v6  ;;  %v4392_v46 = vmul.f32 0.5, %v803_v7  ;;  %v1283_v50 = vmul.f32 0.70710677, %v998_v25 }
 0x1c9   : > { %v1001_v20 = vpop.f32.mrb[8].mxu1  ;;  %v3355_v21 = vpop.eup %3354  ;;  %v1526_v31 = vadd.f32 1.0, %v3353_v15  ;;  %3374 = verf.f32 %v1280_v18  ;;  %v809_v51 = vadd.f32 %v808_v19, %v4350_v26  ;;  %v4407_v63 = vmul.f32 0.5, %v996_v8 }
 0x1ca   : > { %v810_v30 = vpop.f32.mrb[9].mxu0  ;;  %v3357_v3 = vpop.eup %3356  ;;  %v4390_v43 = vmul.f32 %v1524_v16, %v1140_v4  ;;  %v1525_v44 = vadd.f32 1.0, %v3355_v21  ;;  %3376 = verf.f32 %v1282_v24  ;;  %v1002_v55 = vadd.f32 %v1001_v20, %v4352_v27 }
 0x1cb   : > { %v1003_v34 = vpop.f32.mrb[9].mxu1  ;;  %v812_v35 = vpop.f32.mrb[10].mxu0  ;;  %v4397_v53 = vmul.f32 %v1526_v31, %v1142_v11  ;;  %3378 = verf.f32 %v1281_v33  ;;  %v1527_v57 = vadd.f32 1.0, %v3357_v3  ;;  %v1284_v59 = vmul.f32 0.70710677, %v809_v51 }
 0x1cc   : > { %v3359_v36 = vpop.eup %3358  ;;  %v1005_v40 = vpop.f32.mrb[10].mxu1  ;;  %v811_v60 = vadd.f32 %v810_v30, %v4354_v28  ;;  %v4409_v0 = vmul.f32 0.5, %v805_v9  ;;  %v4411_v1 = vmul.f32 0.5, %v998_v25  ;;  %v4415_v5 = vmul.f32 %v1525_v44, %v1141_v12 }
 0x1cd   : > { %v4388_v41 = vpop.f32.mrb[11].mxu0  ;;  %v3361_v42 = vpop.eup %3360  ;;  %v1528_v45 = vadd.f32 1.0, %v3359_v36  ;;  %3380 = verf.f32 %v1283_v50  ;;  %v1286_v15 = vmul.f32 0.70710677, %v1002_v55  ;;  %v4428_v12 = vmul.f32 %v1527_v57, %v4373_v13 }
 0x1ce   : > { %v4394_v47 = vpop.f32.mrb[11].mxu1  ;;  %v3363_v48 = vpop.eup %3362  ;;  %v1530_v49 = vadd.f32 1.0, %v3361_v42  ;;  %3382 = verf.f32 %v1284_v59  ;;  %v1285_v19 = vmul.f32 0.70710677, %v811_v60  ;;  %v1004_v20 = vadd.f32 %v1003_v34, %v4356_v29 }
 0x1cf   : > { %v3365_v52 = vpop.eup %3364  ;;  %v4399_v54 = vmul.f32 %v1528_v45, %v1144_v14  ;;  %v1529_v7 = vadd.f32 1.0, %v3363_v48  ;;  %v4435_v30 = vmul.f32 0.5, %v809_v51  ;;  %3384 = verf.f32 %v1286_v15 }
 0x1d0   : > { %v3367_v56 = vpop.eup %3366  ;;  %v4402_v58 = vmul.f32 %v1530_v49, %v1146_v17  ;;  %v818_v2 = vpop.f32.mrb[12].mxu0  ;;  %v1531_v14 = vadd.f32 1.0, %v3365_v52  ;;  %v813_v3 = vadd.f32 %v812_v35, %v4350_v26  ;;  %v1006_v31 = vadd.f32 %v1005_v40, %v4352_v27 }
 0x1d1   : > { %v3369_v61 = vpop.eup %3368  ;;  %v1812_v62 = vpack.c.bf16 %v4399_v54, %v4390_v43  ;;  %v4413_v4 = vpop.f32.mrb[12].mxu1  ;;  %v1532_v9 = vadd.f32 1.0, %v3367_v56  ;;  %v1657_v13 = vmul.f32 %v1529_v7, %v4375_v22  ;;  %v4440_v42 = vmul.f32 0.5, %v1002_v55 }
 0x1d2   : > { %v1814_v6 = vpack.c.bf16 %v4402_v58, %v4397_v53  ;;  %v4419_v10 = vpop.f32.mrb[13].mxu0  ;;  %v4421_v11 = vpop.f32.mrb[13].mxu1  ;;  %v1534_v18 = vadd.f32 1.0, %v3369_v61  ;;  %3386 = verf.f32 %v1285_v19  ;;  %v1659_v34 = vmul.f32 %v1531_v14, %v4377_v23 }
 0x1d3   : > { %v3371_v8 = vpop.eup %3370  ;;  %v4423_v16 = vpop.f32.mrb[14].mxu0  ;;  %v4444_v44 = vmul.f32 %v1532_v9, %v4380_v32  ;;  %v1287_v45 = vmul.f32 0.70710677, %v1004_v20  ;;  %v1288_v48 = vmul.f32 0.70710677, %v813_v3  ;;  %v4449_v40 = vmul.f32 0.5, %v811_v60 }
 0x1d4   : > { %v4425_v17 = vpop.f32.mrb[14].mxu1  ;;  %v4431_v21 = vpop.f32.mrb[15].mxu0  ;;  %v1533_v36 = vadd.f32 1.0, %v3371_v8  ;;  %v4447_v50 = vmul.f32 %v1534_v18, %v4382_v37  ;;  %v1290_v51 = vmul.f32 0.70710677, %v1006_v31  ;;  %v815_v55 = vadd.f32 %v4388_v41, %v4354_v28 }
 0x1d5   : > { %v4433_v24 = vpop.f32.mrb[15].mxu1  ;;  %v3373_v25 = vpop.eup %3372  ;;  %3388 = verf.f32 %v1287_v45  ;;  %v1008_v23 = vadd.f32 %v4394_v47, %v4356_v29  ;;  %v4462_v57 = vmul.f32 0.5, %v1004_v20  ;;  %v819_v59 = vadd.f32 %v818_v2, %v4350_v26 }
 0x1d6   : > { %v3375_v33 = vpop.eup %3374  ;;  %v1535_v35 = vadd.f32 1.0, %v3373_v25  ;;  %v4460_v37 = vmul.f32 %v1533_v36, %v4384_v38  ;;  %3390 = verf.f32 %v1288_v48  ;;  %v4469_v7 = vmul.f32 0.5, %v813_v3 }
 0x1d7   : > { %v3377_v49 = vpop.eup %3376  ;;  %v1536_v52 = vadd.f32 1.0, %v3375_v33  ;;  %3392 = verf.f32 %v1290_v51  ;;  %v1289_v47 = vmul.f32 0.70710677, %v815_v55  ;;  %v1291_v18 = vmul.f32 0.70710677, %v1008_v23 }
 0x1d8   : > { %v3379_v22 = vpop.eup %3378  ;;  %v4455_v32 = vpop.f32.mrb[16].mxu0  ;;  %v1538_v41 = vadd.f32 1.0, %v3377_v49  ;;  %v4476_v9 = vmul.f32 %v1535_v35, %v4386_v39  ;;  %v1292_v2 = vmul.f32 0.70710677, %v819_v59  ;;  %v1012_v3 = vadd.f32 %v4413_v4, %v4352_v27 }
 0x1d9   : > { %v4457_v56 = vpop.f32.mrb[16].mxu1  ;;  %v4465_v60 = vpop.f32.mrb[17].mxu0  ;;  %v1537_v15 = vadd.f32 1.0, %v3379_v22  ;;  %v4481_v25 = vmul.f32 %v1536_v52, %v4392_v46  ;;  %3394 = verf.f32 %v1289_v47  ;;  %v821_v33 = vadd.f32 %v4419_v10, %v4354_v28 }
 0x1da   : > { %v4467_v61 = vpop.f32.mrb[17].mxu1  ;;  %v4471_v8 = vpop.f32.mrb[18].mxu0  ;;  %3396 = verf.f32 %v1291_v18  ;;  %v1014_v39 = vadd.f32 %v4421_v11, %v4356_v29  ;;  %v1813_v45 = vpack.c.bf16 %v1657_v13, %v4415_v5  ;;  %v1815_v48 = vpack.c.bf16 %v1659_v34, %v4428_v12 }
 0x1db   : > { %v4473_v14 = vpop.f32.mrb[18].mxu1  ;;  %v3381_v38 = vpop.eup %3380  ;;  %v4494_v46 = vmul.f32 %v1538_v41, %v4407_v63  ;;  %v4496_v51 = vmul.f32 0.5, %v1006_v31  ;;  %v1294_v4 = vmul.f32 0.70710677, %v1012_v3  ;;  %v4499_v10 = vmul.f32 %v1537_v15, %v4409_v0 }
 0x1dc   : > { %v4478_v19 = vpop.f32.mrb[19].mxu0  ;;  %v3383_v20 = vpop.eup %3382  ;;  %v1539_v35 = vadd.f32 1.0, %v3381_v38  ;;  %3398 = verf.f32 %v1292_v2  ;;  %v1293_v47 = vmul.f32 0.70710677, %v821_v33  ;;  %2164 = vmatprep.mubr.bf16.mxu0 %v1813_v45  ;;  %2325 = vmatprep.mubr.bf16.mxu1 %v1815_v48  ;;  %v4501_v5 = vmul.f32 0.5, %v815_v55 }
 0x1dd   : > { %v4487_v36 = vpop.f32.mrb[19].mxu1  ;;  %v3385_v49 = vpop.eup %3384  ;;  %v1540_v52 = vadd.f32 1.0, %v3383_v20  ;;  %v4503_v11 = vmul.f32 0.5, %v1008_v23  ;;  %v1295_v12 = vmul.f32 0.70710677, %v1014_v39  ;;  %v823_v63 = vadd.f32 %v4423_v16, %v4350_v26  ;;  %2165 = vmatmul.mubr.bf16.vlgmr.msra.gmra.mrb[64].mxu0 %v1812_v62  ;;  %2326 = vmatmul.mubr.bf16.vlgmr.msra.gmra.mrb[64].mxu1 %v1814_v6 }
 0x1de   : > { %v3387_v22 = vpop.eup %3386  ;;  %v1542_v13 = vadd.f32 1.0, %v3385_v49  ;;  %3400 = verf.f32 %v1294_v4  ;;  %v1016_v34 = vadd.f32 %v4425_v17, %v4352_v27  ;;  %v825_v16 = vadd.f32 %v4431_v21, %v4354_v28 }
 0x1df   : > { %v3389_v54 = vpop.eup %3388  ;;  %v4526_v53 = vmul.f32 %v1539_v35, %v4411_v1  ;;  %v1541_v58 = vadd.f32 1.0, %v3387_v22  ;;  %3402 = verf.f32 %v1293_v47  ;;  %v1296_v62 = vmul.f32 0.70710677, %v823_v63 }
 0x1e0   : > { %v4513_v0 = vpop.f32.mrb[20].mxu0  ;;  %v4515_v31 = vpop.f32.mrb[20].mxu1  ;;  %v4533_v17 = vmul.f32 %v1540_v52, %v4435_v30  ;;  %v4535_v21 = vmul.f32 0.5, %v819_v59  ;;  %3404 = verf.f32 %v1295_v12  ;;  %v1298_v38 = vmul.f32 0.70710677, %v1016_v34 }
 0x1e1   : > { %v4521_v55 = vpop.f32.mrb[21].mxu0  ;;  %v4523_v43 = vpop.f32.mrb[21].mxu1  ;;  %v4539_v1 = vmul.f32 0.5, %v1012_v3  ;;  %v4541_v2 = vmul.f32 0.5, %v821_v33  ;;  %v1297_v20 = vmul.f32 0.70710677, %v825_v16  ;;  %v1018_v45 = vadd.f32 %v4433_v24, %v4356_v29 }
 0x1e2   : > { %v4528_v6 = vpop.f32.mrb[22].mxu0  ;;  %v4530_v23 = vpop.f32.mrb[22].mxu1  ;;  %v4548_v30 = vmul.f32 %v1542_v13, %v4440_v42  ;;  %v4550_v59 = vmul.f32 0.5, %v1014_v39  ;;  %3406 = verf.f32 %v1296_v62  ;;  %v829_v49 = vadd.f32 %v4455_v32, %v4350_v26 }
 0x1e3   : > { %v3391_v41 = vpop.eup %3390  ;;  %v4537_v15 = vpop.f32.mrb[23].mxu0  ;;  %v4555_v3 = vmul.f32 %v1541_v58, %v4449_v40  ;;  %v1543_v33 = vadd.f32 1.0, %v3389_v54  ;;  %3408 = verf.f32 %v1298_v38  ;;  %v1299_v4 = vmul.f32 0.70710677, %v1018_v45 }
 0x1e4   : > { %v3393_v18 = vpop.eup %3392  ;;  %v4545_v48 = vpop.f32.mrb[23].mxu1  ;;  %v1544_v24 = vadd.f32 1.0, %v3391_v41  ;;  %3410 = verf.f32 %v1297_v20  ;;  %v1300_v47 = vmul.f32 0.70710677, %v829_v49  ;;  %v1022_v39 = vadd.f32 %v4457_v56, %v4352_v27 }
 0x1e5   : > { %v3395_v35 = vpop.eup %3394  ;;  %v1546_v52 = vadd.f32 1.0, %v3393_v18  ;;  %3412 = verf.f32 %v1299_v4  ;;  %v831_v32 = vadd.f32 %v4465_v60, %v4354_v28  ;;  %v4565_v58 = vmul.f32 0.5, %v823_v63 }
 0x1e6   : > { %v3397_v22 = vpop.eup %3396  ;;  %v1545_v42 = vadd.f32 1.0, %v3395_v35  ;;  %3414 = verf.f32 %v1300_v47  ;;  %v1024_v62 = vadd.f32 %v4467_v61, %v4356_v29  ;;  %v4574_v56 = vmul.f32 %v1543_v33, %v4462_v57 }
 0x1e7   : > { %v3399_v13 = vpop.eup %3398  ;;  %v1547_v54 = vadd.f32 1.0, %v3397_v22  ;;  %v4576_v60 = vmul.f32 0.5, %v1016_v34  ;;  %v4578_v18 = vmul.f32 0.5, %v825_v16  ;;  %v1302_v20 = vmul.f32 0.70710677, %v1022_v39 }
 0x1e8   : > { %v4561_v12 = vpop.f32.mrb[24].mxu0  ;;  %v4563_v40 = vpop.f32.mrb[24].mxu1  ;;  %v4585_v22 = vmul.f32 %v1544_v24, %v4469_v7  ;;  %v4588_v61 = vmul.f32 %v1546_v52, %v4496_v51  ;;  %v4590_v47 = vmul.f32 0.5, %v1018_v45  ;;  %v4592_v57 = vmul.f32 0.5, %v829_v49 }
 0x1e9   : > { %v4569_v41 = vpop.f32.mrb[25].mxu0  ;;  %v4571_v38 = vpop.f32.mrb[25].mxu1  ;;  %v1817_v7 = vpack.c.bf16 %v4499_v10, %v4460_v37  ;;  %v4604_v51 = vmul.f32 %v1547_v54, %v4503_v11  ;;  %v4606_v45 = vmul.f32 0.5, %v1022_v39  ;;  %v1303_v49 = vmul.f32 0.70710677, %v1024_v62 }
 0x1ea   : > { %5665 = vst [vmem:[#allocation25_spill] sm:$0xff] %v4571_v38  ;;  %v4580_v35 = vpop.f32.mrb[26].mxu0  ;;  %v4582_v63 = vpop.f32.mrb[26].mxu1  ;;  %v1301_v38 = vmul.f32 0.70710677, %v831_v32  ;;  %v1819_v52 = vpack.c.bf16 %v4526_v53, %v4476_v9  ;;  %3416 = verf.f32 %v1302_v20  ;;  %v1816_v11 = vpack.c.bf16 %v4481_v25, %v4444_v44 }
 0x1eb   : > { %5666 = vst [vmem:[#allocation26_spill] sm:$0xff] %v4580_v35  ;;  %5667 = vst [vmem:[#allocation27_spill] sm:$0xff] %v4582_v63  ;;  %v3401_v4 = vpop.eup %3400  ;;  %v4594_v34 = vpop.f32.mrb[27].mxu0  ;;  %v4599_v35 = vmul.f32 %v1545_v42, %v4501_v5  ;;  %v1548_v63 = vadd.f32 1.0, %v3399_v13  ;;  %2172 = vmatprep.mubr.bf16.mxu0 %v1817_v7  ;;  %v833_v5 = vadd.f32 %v4471_v8, %v4350_v26  ;;  %v4614_v13 = vmul.f32 0.5, %v831_v32 }
 0x1ec   : > { %v4596_v16 = vpop.f32.mrb[27].mxu1  ;;  %v3403_v33 = vpop.eup %3402  ;;  %v1026_v42 = vadd.f32 %v4473_v14, %v4352_v27  ;;  %2333 = vmatprep.mubr.bf16.mxu1 %v1819_v52  ;;  %v1818_v9 = vpack.c.bf16 %v4494_v46, %v4447_v50  ;;  %3418 = verf.f32 %v1301_v38  ;;  %2173 = vmatmul.mubr.bf16.gmra.mrb[68].mxu0 %v1816_v11  ;;  %v835_v44 = vadd.f32 %v4478_v19, %v4354_v28 }
 0x1ed   : > { %5668 = vst [vmem:[#allocation28_spill] sm:$0xff] %v4596_v16  ;;  %v3405_v24 = vpop.eup %3404  ;;  %v1550_v16 = vadd.f32 1.0, %v3401_v4  ;;  %v1549_v10 = vadd.f32 1.0, %v3403_v33  ;;  %v4621_v39 = vmul.f32 %v1548_v63, %v4535_v21  ;;  %v1304_v8 = vmul.f32 0.70710677, %v833_v5 }
 0x1ee   : > { %v3407_v37 = vpop.eup %3406  ;;  %v1551_v54 = vadd.f32 1.0, %v3405_v24  ;;  %v4625_v4 = vmul.f32 0.5, %v1024_v62  ;;  %3420 = verf.f32 %v1303_v49  ;;  %v1306_v32 = vmul.f32 0.70710677, %v1026_v42  ;;  %2334 = vmatmul.mubr.bf16.gmra.mrb[68].mxu1 %v1818_v9 }
 0x1ef   : > { %v3409_v53 = vpop.eup %3408  ;;  %v4634_v21 = vmul.f32 %v1550_v16, %v4539_v1  ;;  %3422 = verf.f32 %v1304_v8  ;;  %v1028_v62 = vadd.f32 %v4487_v36, %v4356_v29  ;;  %v839_v38 = vadd.f32 %v4513_v0, %v4350_v26 }
 0x1f0   : > { %v4623_v20 = vpop.f32.mrb[28].mxu0  ;;  %v3411_v14 = vpop.eup %3410  ;;  %v4645_v7 = vmul.f32 %v1549_v10, %v4541_v2  ;;  %v1552_v24 = vadd.f32 1.0, %v3407_v37  ;;  %v1554_v49 = vadd.f32 1.0, %v3409_v53  ;;  %3424 = verf.f32 %v1306_v32 }
 0x1f1   : > { %v4629_v50 = vpop.f32.mrb[28].mxu1  ;;  %v4631_v25 = vpop.f32.mrb[29].mxu0  ;;  %v4652_v36 = vmul.f32 %v1551_v54, %v4550_v59  ;;  %v1553_v52 = vadd.f32 1.0, %v3411_v14  ;;  %v1305_v0 = vmul.f32 0.70710677, %v835_v44  ;;  %v4654_v8 = vmul.f32 0.5, %v833_v5 }
 0x1f2   : > { %v3413_v46 = vpop.eup %3412  ;;  %v4640_v63 = vpop.f32.mrb[29].mxu1  ;;  %v1307_v11 = vmul.f32 0.70710677, %v1028_v62  ;;  %v1032_v2 = vadd.f32 %v4515_v31, %v4352_v27  ;;  %v841_v53 = vadd.f32 %v4521_v55, %v4354_v28  ;;  %v1034_v59 = vadd.f32 %v4523_v43, %v4356_v29 }
 0x1f3   : > { %v4642_v33 = vpop.f32.mrb[30].mxu0  ;;  %v3415_v19 = vpop.eup %3414  ;;  %v1555_v9 = vadd.f32 1.0, %v3413_v46  ;;  %3426 = verf.f32 %v1305_v0  ;;  %v4665_v54 = vmul.f32 %v1552_v24, %v4565_v58  ;;  %v4668_v5 = vmul.f32 %v1554_v49, %v4576_v60 }
 0x1f4   : > { %5669 = vst [vmem:[#allocation29_spill] sm:$0xff] %v4642_v33  ;;  %v4647_v1 = vpop.f32.mrb[30].mxu1  ;;  %v4649_v16 = vpop.f32.mrb[31].mxu0  ;;  %v1308_v33 = vmul.f32 0.70710677, %v839_v38  ;;  %v1556_v10 = vadd.f32 1.0, %v3415_v19  ;;  %v4673_v46 = vmul.f32 %v1553_v52, %v4578_v18  ;;  %3428 = verf.f32 %v1307_v11 }
 0x1f5   : > { %v4658_v37 = vpop.f32.mrb[31].mxu1  ;;  %v4670_v14 = vmul.f32 0.5, %v1026_v42  ;;  %v1310_v32 = vmul.f32 0.70710677, %v1032_v2  ;;  %v3417_v31 = vpop.eup %3416  ;;  %v4675_v19 = vmul.f32 0.5, %v835_v44  ;;  %v4682_v58 = vmul.f32 %v1555_v9, %v4590_v47 }
 0x1f6   : > { %v1309_v55 = vmul.f32 0.70710677, %v841_v53  ;;  %v4684_v60 = vmul.f32 0.5, %v1028_v62  ;;  %v4686_v42 = vmul.f32 0.5, %v839_v38  ;;  %3430 = verf.f32 %v1308_v33  ;;  %v3419_v44 = vpop.eup %3418 }
 0x1f7   : > { %v4693_v49 = vmul.f32 %v1556_v10, %v4592_v57  ;;  %3432 = verf.f32 %v1310_v32  ;;  %v1311_v52 = vmul.f32 0.70710677, %v1034_v59  ;;  %v1821_v11 = vpack.c.bf16 %v4599_v35, %v4555_v3 }
 0x1f8   : > { %v4677_v0 = vpop.f32.mrb[32].mxu0  ;;  %v4679_v43 = vpop.f32.mrb[32].mxu1  ;;  %v1558_v9 = vadd.f32 1.0, %v3417_v31  ;;  %v1823_v33 = vpack.c.bf16 %v4604_v51, %v4574_v56  ;;  %v1036_v57 = vadd.f32 %v4530_v23, %v4352_v27  ;;  %3434 = verf.f32 %v1309_v55 }
 0x1f9   : > { %v4688_v24 = vpop.f32.mrb[33].mxu0  ;;  %v4690_v18 = vpop.f32.mrb[33].mxu1  ;;  %2180 = vmatprep.mubr.bf16.mxu0 %v1821_v11  ;;  %v1820_v35 = vpack.c.bf16 %v4585_v22, %v4533_v17  ;;  %v1822_v31 = vpack.c.bf16 %v4588_v61, %v4548_v30  ;;  %v845_v56 = vadd.f32 %v4537_v15, %v4354_v28  ;;  %v1557_v51 = vadd.f32 1.0, %v3419_v44 }
 0x1fa   : > { %5670 = vst [vmem:[#allocation30_spill] sm:$0xff] %v4690_v18  ;;  %v4697_v47 = vpop.f32.mrb[34].mxu0  ;;  %v4699_v62 = vpop.f32.mrb[34].mxu1  ;;  %v843_v18 = vadd.f32 %v4528_v6, %v4350_v26  ;;  %3436 = verf.f32 %v1311_v52  ;;  %2341 = vmatprep.mubr.bf16.mxu1 %v1823_v33  ;;  %v1314_v55 = vmul.f32 0.70710677, %v1036_v57  ;;  %v4722_v22 = vmul.f32 %v1558_v9, %v4606_v45 }
 0x1fb   : > { %5671 = vst [vmem:[#allocation31_spill] sm:$0xff] %v4699_v62  ;;  %v3421_v38 = vpop.eup %3420  ;;  %v4707_v10 = vpop.f32.mrb[35].mxu0  ;;  %v4717_v62 = vmul.f32 0.5, %v1032_v2  ;;  %2181 = vmatmul.mubr.bf16.gmra.mrb[72].mxu0 %v1820_v35  ;;  %2342 = vmatmul.mubr.bf16.gmra.mrb[72].mxu1 %v1822_v31  ;;  %v1313_v17 = vmul.f32 0.70710677, %v845_v56  ;;  %v1038_v15 = vadd.f32 %v4545_v48, %v4356_v29  ;;  %v849_v30 = vadd.f32 %v4561_v12, %v4350_v26 }
 0x1fc   : > { %5672 = vst [vmem:[#allocation32_spill] sm:$0xff] %v4707_v10  ;;  %v4709_v32 = vpop.f32.mrb[35].mxu1  ;;  %v3423_v3 = vpop.eup %3422  ;;  %v1312_v23 = vmul.f32 0.70710677, %v843_v18  ;;  %v4719_v10 = vmul.f32 0.5, %v841_v53  ;;  %v1042_v53 = vadd.f32 %v4563_v40, %v4352_v27  ;;  %v4735_v45 = vmul.f32 %v1557_v51, %v4614_v13 }
 0x1fd   : > { %5673 = vst [vmem:[#allocation33_spill] sm:$0xff] %v4709_v32  ;;  %v3425_v6 = vpop.eup %3424  ;;  %v1559_v32 = vadd.f32 1.0, %v3421_v38  ;;  %v1560_v2 = vadd.f32 1.0, %v3423_v3  ;;  %v4737_v38 = vmul.f32 0.5, %v1034_v59  ;;  %v1315_v48 = vmul.f32 0.70710677, %v1038_v15 }
 0x1fe   : > { %3438 = verf.f32 %v1312_v23  ;;  %v3427_v61 = vpop.eup %3426  ;;  %v1562_v44 = vadd.f32 1.0, %v3425_v6  ;;  %v851_v12 = vadd.f32 %v4569_v41, %v4354_v28  ;;  %v4748_v35 = vmul.f32 0.5, %v843_v18 }
 0x1ff   : > { %3440 = verf.f32 %v1314_v55  ;;  %v3429_v3 = vpop.eup %3428  ;;  %v4746_v40 = vmul.f32 %v1559_v32, %v4625_v4  ;;  %v1316_v31 = vmul.f32 0.70710677, %v849_v30  ;;  %v1561_v6 = vadd.f32 1.0, %v3427_v61 }
 0x200   : > { %v4730_v52 = vpop.f32.mrb[36].mxu0  ;;  %v4732_v11 = vpop.f32.mrb[36].mxu1  ;;  %3442 = verf.f32 %v1313_v17  ;;  %v4752_v51 = vmul.f32 0.5, %v1036_v57  ;;  %v4754_v23 = vmul.f32 0.5, %v845_v56  ;;  %v4761_v4 = vmul.f32 %v1560_v2, %v4654_v8 }
 0x201   : > { %v4741_v9 = vpop.f32.mrb[37].mxu0  ;;  %v4743_v33 = vpop.f32.mrb[37].mxu1  ;;  %3444 = verf.f32 %v1315_v48  ;;  %v4764_v18 = vmul.f32 %v1562_v44, %v4670_v14  ;;  %v4766_v32 = vmul.f32 0.5, %v1038_v15  ;;  %v1318_v17 = vmul.f32 0.70710677, %v1042_v53 }
 0x202   : > { %5674 = vst [vmem:[#allocation34_spill] sm:$0xff] %v4741_v9  ;;  %5675 = vst [vmem:[#allocation35_spill] sm:$0xff] %v4743_v33  ;;  %v4750_v13 = vpop.f32.mrb[38].mxu0  ;;  %v3431_v59 = vpop.eup %3430  ;;  %v1563_v57 = vadd.f32 1.0, %v3429_v3  ;;  %v4770_v56 = vmul.f32 0.5, %v849_v30  ;;  %3446 = verf.f32 %v1316_v31  ;;  %v1825_v14 = vpack.c.bf16 %v4673_v46, %v4645_v7  ;;  %v5681_v31 = vld [vmem:[#allocation26_spill] sm:$0xff] }
 0x203   : > { %5676 = vst [vmem:[#allocation36_spill] sm:$0xff] %v4750_v13  ;;  %v4756_v41 = vpop.f32.mrb[38].mxu1  ;;  %v4758_v55 = vpop.f32.mrb[39].mxu0  ;;  %v1317_v48 = vmul.f32 0.70710677, %v851_v12  ;;  %v4772_v13 = vmul.f32 0.5, %v1042_v53  ;;  %v1827_v15 = vpack.c.bf16 %v4682_v58, %v4652_v36  ;;  %v4781_v44 = vmul.f32 %v1561_v6, %v4675_v19 }
 0x204   : > { %5677 = vst [vmem:[#allocation37_spill] sm:$0xff] %v4756_v41  ;;  %5678 = vst [vmem:[#allocation38_spill] sm:$0xff] %v4758_v55  ;;  %v3433_v33 = vpop.eup %3432  ;;  %v4768_v61 = vpop.f32.mrb[39].mxu1  ;;  %v5680_v55 = vld [vmem:[#allocation25_spill] sm:$0xff]  ;;  %v1564_v30 = vadd.f32 1.0, %v3431_v59  ;;  %3448 = verf.f32 %v1318_v17  ;;  %2188 = vmatprep.mubr.bf16.mxu0 %v1825_v14  ;;  %v1824_v7 = vpack.c.bf16 %v4665_v54, %v4621_v39  ;;  %v1826_v59 = vpack.c.bf16 %v4668_v5, %v4634_v21  ;;  %v5685_v5 = vld [vmem:[#allocation28_spill] sm:$0xff] }
 0x205   : > { %5679 = vst [vmem:[#allocation39_spill] sm:$0xff] %v4768_v61  ;;  %v3435_v41 = vpop.eup %3434  ;;  %v1044_v8 = vadd.f32 %v5680_v55, %v4356_v29  ;;  %v1566_v3 = vadd.f32 1.0, %v3433_v33  ;;  %v853_v61 = vadd.f32 %v5681_v31, %v4350_v26  ;;  %2349 = vmatprep.mubr.bf16.mxu1 %v1827_v15  ;;  %v5682_v55 = vld [vmem:[#allocation27_spill] sm:$0xff]  ;;  %3450 = verf.f32 %v1317_v48 }
 0x206   : > { %v3437_v2 = vpop.eup %3436  ;;  %v1046_v9 = vadd.f32 %v5682_v55, %v4352_v27  ;;  %v1565_v58 = vadd.f32 1.0, %v3435_v41  ;;  %v4800_v15 = vmul.f32 %v1563_v57, %v4684_v60  ;;  %2189 = vmatmul.mubr.bf16.gmra.mrb[76].mxu0 %v1824_v7  ;;  %v4806_v48 = vmul.f32 0.5, %v851_v12  ;;  %2350 = vmatmul.mubr.bf16.gmra.mrb[76].mxu1 %v1826_v59 }
 0x207   : > { %v1319_v53 = vmul.f32 0.70710677, %v1044_v8  ;;  %v1320_v33 = vmul.f32 0.70710677, %v853_v61  ;;  %v1567_v39 = vadd.f32 1.0, %v3437_v2  ;;  %v855_v21 = vadd.f32 %v4594_v34, %v4354_v28 }
 0x208   : > { %v4789_v36 = vpop.f32.mrb[40].mxu0  ;;  %v4791_v46 = vpop.f32.mrb[40].mxu1  ;;  %v1322_v54 = vmul.f32 0.70710677, %v1046_v9  ;;  %v1048_v55 = vadd.f32 %v5685_v5, %v4356_v29  ;;  %v859_v12 = vadd.f32 %v4623_v20, %v4350_v26  ;;  %v4822_v59 = vmul.f32 %v1566_v3, %v4717_v62 }
 0x209   : > { %v3439_v19 = vpop.eup %3438  ;;  %v4795_v6 = vpop.f32.mrb[41].mxu0  ;;  %3452 = verf.f32 %v1319_v53  ;;  %v4817_v53 = vmul.f32 %v1564_v30, %v4686_v42  ;;  %v4825_v34 = vmul.f32 %v1565_v58, %v4719_v10  ;;  %v4832_v42 = vmul.f32 0.5, %v853_v61 }
 0x20a   : > { %v4797_v17 = vpop.f32.mrb[41].mxu1  ;;  %v3441_v14 = vpop.eup %3440  ;;  %3454 = verf.f32 %v1320_v33  ;;  %v1568_v7 = vadd.f32 1.0, %v3439_v19  ;;  %v1323_v30 = vmul.f32 0.70710677, %v1048_v55  ;;  %v4834_v20 = vmul.f32 0.5, %v1046_v9 }
 0x20b   : > { %v4802_v31 = vpop.f32.mrb[42].mxu0  ;;  %v4804_v41 = vpop.f32.mrb[42].mxu1  ;;  %3456 = verf.f32 %v1322_v54  ;;  %v1570_v5 = vadd.f32 1.0, %v3441_v14  ;;  %v1052_v62 = vadd.f32 %v4629_v50, %v4352_v27  ;;  %v4850_v9 = vmul.f32 0.5, %v855_v21 }
 0x20c   : > { %5683 = vst [vmem:[#allocation25_spill] sm:$0xff] %v4802_v31  ;;  %5684 = vst [vmem:[#allocation26_spill] sm:$0xff] %v4804_v41  ;;  %v4812_v60 = vpop.f32.mrb[43].mxu0  ;;  %v4814_v57 = vpop.f32.mrb[43].mxu1  ;;  %v4830_v41 = vmul.f32 0.5, %v1044_v8  ;;  %v4839_v10 = vmul.f32 %v1568_v7, %v4748_v35 }
 0x20d   : > { %5686 = vst [vmem:[#allocation27_spill] sm:$0xff] %v4812_v60  ;;  %5687 = vst [vmem:[#allocation28_spill] sm:$0xff] %v4814_v57  ;;  %v3443_v2 = vpop.eup %3442  ;;  %v1321_v60 = vmul.f32 0.70710677, %v855_v21  ;;  %v4828_v57 = vmul.f32 %v1567_v39, %v4737_v38  ;;  %v1324_v31 = vmul.f32 0.70710677, %v859_v12  ;;  %v861_v38 = vadd.f32 %v4631_v25, %v4354_v28 }
 0x20e   : > { %v3445_v33 = vpop.eup %3444  ;;  %v1569_v54 = vadd.f32 1.0, %v3443_v2  ;;  %v4848_v58 = vmul.f32 %v1570_v5, %v4752_v51  ;;  %v1326_v14 = vmul.f32 0.70710677, %v1052_v62  ;;  %v4856_v2 = vmul.f32 0.5, %v1048_v55 }
 0x20f   : > { %v3447_v19 = vpop.eup %3446  ;;  %v1571_v3 = vadd.f32 1.0, %v3445_v33  ;;  %3458 = verf.f32 %v1321_v60  ;;  %v1325_v25 = vmul.f32 0.70710677, %v861_v38  ;;  %v1054_v5 = vadd.f32 %v4640_v63, %v4356_v29 }
 0x210   : > { %v4843_v8 = vpop.f32.mrb[44].mxu0  ;;  %v4845_v61 = vpop.f32.mrb[44].mxu1  ;;  %3460 = verf.f32 %v1323_v30  ;;  %v1572_v60 = vadd.f32 1.0, %v3447_v19  ;;  %v4863_v21 = vmul.f32 %v1569_v54, %v4754_v23  ;;  %v1829_v30 = vpack.c.bf16 %v4781_v44, %v4735_v45  ;;  %v5693_v23 = vld [vmem:[#allocation29_spill] sm:$0xff] }
 0x211   : > { %v4852_v50 = vpop.f32.mrb[45].mxu0  ;;  %v4854_v35 = vpop.f32.mrb[45].mxu1  ;;  %3462 = verf.f32 %v1324_v31  ;;  %v1831_v55 = vpack.c.bf16 %v4800_v15, %v4746_v40  ;;  %v863_v54 = vadd.f32 %v5693_v23, %v4350_v26  ;;  %v1056_v63 = vadd.f32 %v4647_v1, %v4352_v27 }
 0x212   : > { %5688 = vst [vmem:[#allocation40_spill] sm:$0xff] %v4854_v35  ;;  %v3449_v39 = vpop.eup %3448  ;;  %v4858_v7 = vpop.f32.mrb[46].mxu0  ;;  %v4878_v35 = vmul.f32 0.5, %v859_v12  ;;  %3464 = verf.f32 %v1326_v14  ;;  %v1327_v40 = vmul.f32 0.70710677, %v1054_v5  ;;  %2196 = vmatprep.mubr.bf16.mxu0 %v1829_v30  ;;  %v1828_v15 = vpack.c.bf16 %v4761_v4, %v4693_v49 }
 0x213   : > { %5689 = vst [vmem:[#allocation41_spill] sm:$0xff] %v4858_v7  ;;  %v4860_v33 = vpop.f32.mrb[46].mxu1  ;;  %v3451_v51 = vpop.eup %3450  ;;  %v1574_v44 = vadd.f32 1.0, %v3449_v39  ;;  %2357 = vmatprep.mubr.bf16.mxu1 %v1831_v55  ;;  %v4889_v12 = vmul.f32 0.5, %v1052_v62  ;;  %3466 = verf.f32 %v1325_v25  ;;  %v1330_v1 = vmul.f32 0.70710677, %v1056_v63 }
 0x214   : > { %5690 = vst [vmem:[#allocation42_spill] sm:$0xff] %v4860_v33  ;;  %v4871_v19 = vpop.f32.mrb[47].mxu0  ;;  %v4873_v31 = vpop.f32.mrb[47].mxu1  ;;  %v4876_v33 = vmul.f32 %v1571_v3, %v4766_v32  ;;  %v4887_v32 = vmul.f32 %v1572_v60, %v4770_v56  ;;  %v1328_v3 = vmul.f32 0.70710677, %v863_v54  ;;  %v1573_v23 = vadd.f32 1.0, %v3451_v51  ;;  %2197 = vmatmul.mubr.bf16.gmra.mrb[80].mxu0 %v1828_v15 }
 0x215   : > { %5691 = vst [vmem:[#allocation43_spill] sm:$0xff] %v4871_v19  ;;  %5692 = vst [vmem:[#allocation44_spill] sm:$0xff] %v4873_v31  ;;  %v3453_v7 = vpop.eup %3452  ;;  %3468 = verf.f32 %v1327_v40  ;;  %v1830_v39 = vpack.c.bf16 %v4764_v18, %v4722_v22  ;;  %v865_v49 = vadd.f32 %v4649_v16, %v4354_v28  ;;  %v1058_v60 = vadd.f32 %v4658_v37, %v4356_v29 }
 0x216   : > { %v3455_v45 = vpop.eup %3454  ;;  %v1575_v19 = vadd.f32 1.0, %v3453_v7  ;;  %3470 = verf.f32 %v1328_v3  ;;  %v869_v25 = vadd.f32 %v4677_v0, %v4350_v26  ;;  %v4908_v18 = vmul.f32 %v1574_v44, %v4772_v13 }
 0x217   : > { %v3457_v31 = vpop.eup %3456  ;;  %v1576_v14 = vadd.f32 1.0, %v3455_v45  ;;  %3472 = verf.f32 %v1330_v1  ;;  %v4910_v16 = vmul.f32 0.5, %v861_v38  ;;  %2358 = vmatmul.mubr.bf16.gmra.mrb[80].mxu1 %v1830_v39  ;;  %v1329_v30 = vmul.f32 0.70710677, %v865_v49 }
 0x218   : > { %v4895_v4 = vpop.f32.mrb[48].mxu0  ;;  %v4897_v56 = vpop.f32.mrb[48].mxu1  ;;  %v1578_v62 = vadd.f32 1.0, %v3457_v31  ;;  %v1062_v55 = vadd.f32 %v4679_v43, %v4352_v27  ;;  %v4919_v45 = vmul.f32 %v1573_v23, %v4806_v48  ;;  %v4921_v40 = vmul.f32 0.5, %v1054_v5 }
 0x219   : > { %v4903_v7 = vpop.f32.mrb[49].mxu0  ;;  %v4905_v51 = vpop.f32.mrb[49].mxu1  ;;  %v4923_v15 = vmul.f32 0.5, %v863_v54  ;;  %v1331_v13 = vmul.f32 0.70710677, %v1058_v60  ;;  %v4928_v3 = vmul.f32 %v1575_v19, %v4830_v41  ;;  %v4930_v43 = vmul.f32 0.5, %v1056_v63 }
 0x21a   : > { %v3459_v22 = vpop.eup %3458  ;;  %v4914_v31 = vpop.f32.mrb[50].mxu0  ;;  %3474 = verf.f32 %v1329_v30  ;;  %v1332_v1 = vmul.f32 0.70710677, %v869_v25  ;;  %v4935_v48 = vmul.f32 %v1576_v14, %v4832_v42  ;;  %v4938_v5 = vmul.f32 %v1578_v62, %v4834_v20  ;;  %v5697_v30 = vld [vmem:[#allocation30_spill] sm:$0xff] }
 0x21b   : > { %v4916_v37 = vpop.f32.mrb[50].mxu1  ;;  %v3461_v0 = vpop.eup %3460  ;;  %v1577_v54 = vadd.f32 1.0, %v3459_v22  ;;  %v1334_v23 = vmul.f32 0.70710677, %v1062_v55  ;;  %3476 = verf.f32 %v1331_v13  ;;  %v871_v41 = vadd.f32 %v4688_v24, %v4354_v28 }
 0x21c   : > { %5694 = vst [vmem:[#allocation29_spill] sm:$0xff] %v4916_v37  ;;  %v4925_v38 = vpop.f32.mrb[51].mxu0  ;;  %v3463_v44 = vpop.eup %3462  ;;  %v1579_v37 = vadd.f32 1.0, %v3461_v0  ;;  %3478 = verf.f32 %v1332_v1  ;;  %v1833_v42 = vpack.c.bf16 %v4863_v21, %v4825_v34  ;;  %v4948_v14 = vmul.f32 0.5, %v1058_v60 }
 0x21d   : > { %5695 = vst [vmem:[#allocation45_spill] sm:$0xff] %v4925_v38  ;;  %v4932_v39 = vpop.f32.mrb[51].mxu1  ;;  %v4940_v38 = vmul.f32 0.5, %v865_v49  ;;  %v3465_v19 = vpop.eup %3464  ;;  %v1580_v63 = vadd.f32 1.0, %v3463_v44  ;;  %v4950_v62 = vmul.f32 0.5, %v869_v25  ;;  %v1835_v22 = vpack.c.bf16 %v4876_v33, %v4828_v57 }
 0x21e   : > { %5696 = vst [vmem:[#allocation46_spill] sm:$0xff] %v4932_v39  ;;  %v1064_v39 = vadd.f32 %v5697_v30, %v4356_v29  ;;  %v3467_v20 = vpop.eup %3466  ;;  %v1333_v49 = vmul.f32 0.70710677, %v871_v41  ;;  %v4959_v44 = vmul.f32 %v1577_v54, %v4850_v9  ;;  %3480 = verf.f32 %v1334_v23  ;;  %2204 = vmatprep.mubr.bf16.mxu0 %v1833_v42  ;;  %v5701_v9 = vld [vmem:[#allocation31_spill] sm:$0xff] }
 0x21f   : > { %v3469_v13 = vpop.eup %3468  ;;  %v873_v34 = vadd.f32 %v4697_v47, %v4350_v26  ;;  %v4968_v57 = vmul.f32 %v1579_v37, %v4856_v2  ;;  %v4970_v33 = vmul.f32 0.5, %v1062_v55  ;;  %2365 = vmatprep.mubr.bf16.mxu1 %v1835_v22  ;;  %v1066_v54 = vadd.f32 %v5701_v9, %v4352_v27 }
 0x220   : > { %v4954_v0 = vpop.f32.mrb[52].mxu0  ;;  %v4956_v24 = vpop.f32.mrb[52].mxu1  ;;  %v1335_v1 = vmul.f32 0.70710677, %v1064_v39  ;;  %v1832_v23 = vpack.c.bf16 %v4839_v10, %v4817_v53  ;;  %3482 = verf.f32 %v1333_v49  ;;  %v1581_v22 = vadd.f32 1.0, %v3467_v20 }
 0x221   : > { %5698 = vst [vmem:[#allocation30_spill] sm:$0xff] %v4956_v24  ;;  %v4963_v21 = vpop.f32.mrb[53].mxu0  ;;  %v4965_v60 = vpop.f32.mrb[53].mxu1  ;;  %v1336_v2 = vmul.f32 0.70710677, %v873_v34  ;;  %v1583_v9 = vadd.f32 1.0, %v3469_v13  ;;  %v1834_v10 = vpack.c.bf16 %v4848_v58, %v4822_v59  ;;  %v879_v20 = vadd.f32 %v4730_v52, %v4350_v26 }
 0x222   : > { %5699 = vst [vmem:[#allocation47_spill] sm:$0xff] %v4963_v21  ;;  %5700 = vst [vmem:[#allocation48_spill] sm:$0xff] %v4965_v60  ;;  %v3471_v25 = vpop.eup %3470  ;;  %v4976_v30 = vpop.f32.mrb[54].mxu0  ;;  %v4981_v60 = vmul.f32 %v1580_v63, %v4878_v35  ;;  %v1582_v21 = vadd.f32 1.0, %v3465_v19  ;;  %3484 = verf.f32 %v1335_v1  ;;  %v1338_v24 = vmul.f32 0.70710677, %v1066_v54  ;;  %2205 = vmatmul.mubr.bf16.gmra.mrb[84].mxu0 %v1832_v23 }
 0x223   : > { %v4978_v47 = vpop.f32.mrb[54].mxu1  ;;  %v3473_v42 = vpop.eup %3472  ;;  %v1584_v53 = vadd.f32 1.0, %v3471_v25  ;;  %3486 = verf.f32 %v1336_v2  ;;  %v5704_v35 = vld [vmem:[#allocation32_spill] sm:$0xff]  ;;  %v4998_v1 = vmul.f32 0.5, %v871_v41  ;;  %2366 = vmatmul.mubr.bf16.gmra.mrb[84].mxu1 %v1834_v10  ;;  %v1072_v59 = vadd.f32 %v4732_v11, %v4352_v27 }
 0x224   : > { %5702 = vst [vmem:[#allocation31_spill] sm:$0xff] %v4978_v47  ;;  %v4983_v55 = vpop.f32.mrb[55].mxu0  ;;  %v4985_v37 = vpop.f32.mrb[55].mxu1  ;;  %v875_v63 = vadd.f32 %v5704_v35, %v4354_v28  ;;  %v1586_v49 = vadd.f32 1.0, %v3473_v42  ;;  %3488 = verf.f32 %v1338_v24  ;;  %v4996_v13 = vmul.f32 %v1582_v21, %v4889_v12 }
 0x225   : > { %5703 = vst [vmem:[#allocation49_spill] sm:$0xff] %v4983_v55  ;;  %v3475_v19 = vpop.eup %3474  ;;  %v5705_v55 = vld [vmem:[#allocation33_spill] sm:$0xff]  ;;  %v5003_v23 = vmul.f32 %v1581_v22, %v4910_v16  ;;  %v5005_v24 = vmul.f32 0.5, %v1064_v39  ;;  %v5007_v42 = vmul.f32 0.5, %v873_v34  ;;  %v5012_v41 = vmul.f32 %v1583_v9, %v4921_v40 }
 0x226   : > { %v1068_v47 = vadd.f32 %v5705_v55, %v4356_v29  ;;  %v1337_v25 = vmul.f32 0.70710677, %v875_v63  ;;  %v3477_v58 = vpop.eup %3476  ;;  %v1585_v21 = vadd.f32 1.0, %v3475_v19  ;;  %v5014_v55 = vmul.f32 0.5, %v1066_v54 }
 0x227   : > { %v3479_v12 = vpop.eup %3478  ;;  %v5021_v16 = vmul.f32 %v1584_v53, %v4923_v15  ;;  %v5024_v39 = vmul.f32 %v1586_v49, %v4930_v43  ;;  %v1340_v34 = vmul.f32 0.70710677, %v879_v20  ;;  %v1587_v54 = vadd.f32 1.0, %v3477_v58  ;;  %v5714_v53 = vld [vmem:[#allocation35_spill] sm:$0xff] }
 0x228   : > { %v1339_v2 = vmul.f32 0.70710677, %v1068_v47  ;;  %v5009_v52 = vpop.f32.mrb[56].mxu0  ;;  %3490 = verf.f32 %v1337_v25  ;;  %v5016_v11 = vpop.f32.mrb[56].mxu1  ;;  %v5030_v35 = vmul.f32 0.5, %v875_v63  ;;  %v5711_v25 = vld [vmem:[#allocation34_spill] sm:$0xff]  ;;  %v1074_v49 = vadd.f32 %v5714_v53, %v4356_v29 }
 0x229   : > { %5706 = vst [vmem:[#allocation32_spill] sm:$0xff] %v5009_v52  ;;  %5707 = vst [vmem:[#allocation33_spill] sm:$0xff] %v5016_v11  ;;  %v5018_v10 = vpop.f32.mrb[57].mxu0  ;;  %v5026_v22 = vpop.f32.mrb[57].mxu1  ;;  %v1342_v19 = vmul.f32 0.70710677, %v1072_v59  ;;  %v1839_v58 = vpack.c.bf16 %v4968_v57, %v4928_v3  ;;  %v5056_v57 = vmul.f32 %v1587_v54, %v4948_v14 }
 0x22a   : > { %5708 = vst [vmem:[#allocation50_spill] sm:$0xff] %v5018_v10  ;;  %3492 = verf.f32 %v1339_v2  ;;  %5709 = vst [vmem:[#allocation51_spill] sm:$0xff] %v5026_v22  ;;  %v5028_v40 = vpop.f32.mrb[58].mxu0  ;;  %v3481_v9 = vpop.eup %3480  ;;  %v881_v10 = vadd.f32 %v5711_v25, %v4354_v28  ;;  %v1588_v43 = vadd.f32 1.0, %v3479_v12  ;;  %v1837_v2 = vpack.c.bf16 %v4959_v44, %v4919_v45  ;;  %v5715_v45 = vld [vmem:[#allocation36_spill] sm:$0xff] }
 0x22b   : > { %5710 = vst [vmem:[#allocation52_spill] sm:$0xff] %v5028_v40  ;;  %v5034_v11 = vpop.f32.mrb[58].mxu1  ;;  %v5036_v15 = vpop.f32.mrb[59].mxu0  ;;  %v5047_v22 = vmul.f32 %v1585_v21, %v4940_v38  ;;  %v5049_v25 = vmul.f32 0.5, %v1068_v47  ;;  %v1590_v52 = vadd.f32 1.0, %v3481_v9  ;;  %3494 = verf.f32 %v1340_v34  ;;  %2373 = vmatprep.mubr.bf16.mxu1 %v1839_v58  ;;  %v5716_v38 = vld [vmem:[#allocation37_spill] sm:$0xff] }
 0x22c   : > { %5712 = vst [vmem:[#allocation34_spill] sm:$0xff] %v5034_v11  ;;  %5713 = vst [vmem:[#allocation53_spill] sm:$0xff] %v5036_v15  ;;  %v5044_v63 = vpop.f32.mrb[59].mxu1  ;;  %v3483_v40 = vpop.eup %3482  ;;  %v5051_v11 = vmul.f32 0.5, %v879_v20  ;;  %v1341_v12 = vmul.f32 0.70710677, %v881_v10  ;;  %2212 = vmatprep.mubr.bf16.mxu0 %v1837_v2  ;;  %v883_v3 = vadd.f32 %v5715_v45, %v4350_v26  ;;  %3496 = verf.f32 %v1342_v19 }
 0x22d   : > { %v3485_v15 = vpop.eup %3484  ;;  %v1343_v53 = vmul.f32 0.70710677, %v1074_v49  ;;  %v1076_v47 = vadd.f32 %v5716_v38, %v4352_v27  ;;  %v1836_v20 = vpack.c.bf16 %v4935_v48, %v4887_v32  ;;  %v5063_v34 = vmul.f32 %v1588_v43, %v4950_v62  ;;  %v5718_v48 = vld [vmem:[#allocation38_spill] sm:$0xff] }
 0x22e   : > { %v3487_v44 = vpop.eup %3486  ;;  %v1589_v9 = vadd.f32 1.0, %v3483_v40  ;;  %v5065_v2 = vmul.f32 0.5, %v1072_v59  ;;  %3498 = verf.f32 %v1341_v12  ;;  %v1591_v14 = vadd.f32 1.0, %v3485_v15  ;;  %v5719_v59 = vld [vmem:[#allocation39_spill] sm:$0xff] }
 0x22f   : > { %v3489_v21 = vpop.eup %3488  ;;  %3500 = verf.f32 %v1343_v53  ;;  %v1344_v54 = vmul.f32 0.70710677, %v883_v3  ;;  %v1346_v19 = vmul.f32 0.70710677, %v1076_v47  ;;  %2213 = vmatmul.mubr.bf16.gmra.mrb[88].mxu0 %v1836_v20  ;;  %v5072_v38 = vmul.f32 %v1590_v52, %v4970_v33 }
 0x230   : > { %v5067_v58 = vpop.f32.mrb[60].mxu0  ;;  %v5069_v45 = vpop.f32.mrb[60].mxu1  ;;  %v1838_v32 = vpack.c.bf16 %v4938_v5, %v4908_v18  ;;  %v885_v62 = vadd.f32 %v5718_v48, %v4354_v28  ;;  %v1078_v40 = vadd.f32 %v5719_v59, %v4356_v29  ;;  %v1592_v53 = vadd.f32 1.0, %v3487_v44 }
 0x231   : > { %5717 = vst [vmem:[#allocation35_spill] sm:$0xff] %v5069_v45  ;;  %v5080_v43 = vpop.f32.mrb[61].mxu0  ;;  %v5082_v12 = vpop.f32.mrb[61].mxu1  ;;  %v1594_v45 = vadd.f32 1.0, %v3489_v21  ;;  %3502 = verf.f32 %v1344_v54  ;;  %v889_v33 = vadd.f32 %v4789_v36, %v4350_v26  ;;  %v5090_v20 = vmul.f32 0.5, %v881_v10 }
 0x232   : > { %5720 = vst [vmem:[#allocation36_spill] sm:$0xff] %v5082_v12  ;;  %v3491_v15 = vpop.eup %3490  ;;  %v5086_v52 = vpop.f32.mrb[62].mxu0  ;;  %3504 = verf.f32 %v1346_v19  ;;  %2374 = vmatmul.mubr.bf16.gmra.mrb[88].mxu1 %v1838_v32  ;;  %v1345_v48 = vmul.f32 0.70710677, %v885_v62  ;;  %v1082_v59 = vadd.f32 %v4791_v46, %v4352_v27  ;;  %v5099_v21 = vmul.f32 %v1589_v9, %v4998_v1 }
 0x233   : > { %5721 = vst [vmem:[#allocation37_spill] sm:$0xff] %v5086_v52  ;;  %v5088_v18 = vpop.f32.mrb[62].mxu1  ;;  %v5094_v12 = vpop.f32.mrb[63].mxu0  ;;  %v5102_v36 = vmul.f32 %v1591_v14, %v5005_v24  ;;  %v5104_v54 = vmul.f32 0.5, %v1074_v49  ;;  %v1347_v10 = vmul.f32 0.70710677, %v1078_v40  ;;  %v5111_v46 = vmul.f32 %v1592_v53, %v5007_v42 }
 0x234   : > { %5722 = vst [vmem:[#allocation38_spill] sm:$0xff] %v5088_v18  ;;  %v3493_v5 = vpop.eup %3492  ;;  %v5096_v44 = vpop.f32.mrb[63].mxu1  ;;  %v1593_v18 = vadd.f32 1.0, %v3491_v15  ;;  %v5106_v19 = vmul.f32 0.5, %v883_v3  ;;  %v5108_v32 = vmul.f32 0.5, %v1076_v47  ;;  %3506 = verf.f32 %v1345_v48 }
 0x235   : > { %5723 = vst [vmem:[#allocation39_spill] sm:$0xff] %v5096_v44  ;;  %v1348_v52 = vmul.f32 0.70710677, %v889_v33  ;;  %v5114_v44 = vmul.f32 %v1594_v45, %v5014_v55  ;;  %v1595_v1 = vadd.f32 1.0, %v3493_v5  ;;  %v3495_v9 = vpop.eup %3494  ;;  %v5116_v24 = vmul.f32 0.5, %v885_v62 }
 0x236   : > { %3508 = verf.f32 %v1347_v10  ;;  %v1350_v49 = vmul.f32 0.70710677, %v1082_v59  ;;  %v891_v3 = vadd.f32 %v4795_v6, %v4354_v28  ;;  %v3497_v14 = vpop.eup %3496  ;;  %v1084_v47 = vadd.f32 %v4797_v17, %v4356_v29 }
 0x237   : > { %3510 = verf.f32 %v1348_v52  ;;  %v1841_v42 = vpack.c.bf16 %v5047_v22, %v5003_v23  ;;  %v1843_v55 = vpack.c.bf16 %v5056_v57, %v5012_v41  ;;  %v5127_v62 = vmul.f32 %v1593_v18, %v5030_v35  ;;  %v5724_v23 = vld [vmem:[#allocation25_spill] sm:$0xff]  ;;  %v5725_v35 = vld [vmem:[#allocation26_spill] sm:$0xff] }
 0x238   : > { %v3499_v45 = vpop.eup %3498  ;;  %v5129_v15 = vmul.f32 0.5, %v1078_v40  ;;  %v5131_v53 = vmul.f32 0.5, %v889_v33  ;;  %v1349_v6 = vmul.f32 0.70710677, %v891_v3  ;;  %v5134_v52 = vmul.f32 %v1595_v1, %v5049_v25 }
 0x239   : > { %v3501_v5 = vpop.eup %3500  ;;  %v1596_v17 = vadd.f32 1.0, %v3495_v9  ;;  %v1351_v48 = vmul.f32 0.70710677, %v1084_v47  ;;  %2220 = vmatprep.mubr.bf16.mxu0 %v1841_v42  ;;  %2381 = vmatprep.mubr.bf16.mxu1 %v1843_v55  ;;  %v893_v41 = vadd.f32 %v5724_v23, %v4350_v26  ;;  %v5138_v22 = vmul.f32 0.5, %v1082_v59  ;;  %v5726_v55 = vld [vmem:[#allocation27_spill] sm:$0xff] }
 0x23a   : > { %3512 = verf.f32 %v1350_v49  ;;  %v1086_v57 = vadd.f32 %v5725_v35, %v4352_v27  ;;  %v1840_v40 = vpack.c.bf16 %v5021_v16, %v4981_v60  ;;  %v1598_v18 = vadd.f32 1.0, %v3497_v14  ;;  %v5727_v60 = vld [vmem:[#allocation28_spill] sm:$0xff] }
 0x23b   : > { %v3503_v33 = vpop.eup %3502  ;;  %v1597_v25 = vadd.f32 1.0, %v3499_v45  ;;  %3514 = verf.f32 %v1349_v6  ;;  %v1352_v10 = vmul.f32 0.70710677, %v893_v41  ;;  %v1599_v9 = vadd.f32 1.0, %v3501_v5 }
 0x23c   : > { %v3505_v1 = vpop.eup %3504  ;;  %3516 = verf.f32 %v1351_v48  ;;  %v1354_v42 = vmul.f32 0.70710677, %v1086_v57  ;;  %2221 = vmatmul.mubr.bf16.gmra.mrb[92].mxu0 %v1840_v40  ;;  %v1842_v59 = vpack.c.bf16 %v5024_v39, %v4996_v13  ;;  %v1600_v49 = vadd.f32 1.0, %v3503_v33 }
 0x23d   : > { %3518 = verf.f32 %v1352_v10  ;;  %v895_v23 = vadd.f32 %v5726_v55, %v4354_v28  ;;  %v1088_v16 = vadd.f32 %v5727_v60, %v4356_v29  ;;  %v5151_v14 = vmul.f32 %v1596_v17, %v5051_v11 }
 0x23e   : > { %v1602_v45 = vadd.f32 1.0, %v3505_v1  ;;  %3520 = verf.f32 %v1354_v42  ;;  %2382 = vmatmul.mubr.bf16.gmra.mrb[92].mxu1 %v1842_v59  ;;  %v899_v6 = vadd.f32 %v4843_v8, %v4350_v26  ;;  %v3507_v5 = vpop.eup %3506  ;;  %v5156_v13 = vmul.f32 %v1598_v18, %v5065_v2 }
 0x23f   : > { %v5158_v39 = vmul.f32 0.5, %v891_v3  ;;  %v1353_v48 = vmul.f32 0.70710677, %v895_v23  ;;  %v1092_v35 = vadd.f32 %v4845_v61, %v4352_v27  ;;  %v5163_v11 = vmul.f32 %v1597_v25, %v5090_v20 }
 0x240   : > { %v3509_v40 = vpop.eup %3508  ;;  %v5166_v17 = vmul.f32 %v1599_v9, %v5104_v54  ;;  %v5168_v33 = vmul.f32 0.5, %v1084_v47  ;;  %v1355_v8 = vmul.f32 0.70710677, %v1088_v16  ;;  %v5171_v2 = vmul.f32 %v1600_v49, %v5106_v19 }
 0x241   : > { %v3511_v10 = vpop.eup %3510  ;;  %v5173_v3 = vmul.f32 0.5, %v893_v41  ;;  %v5175_v18 = vmul.f32 0.5, %v1086_v57  ;;  %v1356_v1 = vmul.f32 0.70710677, %v899_v6  ;;  %v5178_v61 = vmul.f32 %v1602_v45, %v5108_v32  ;;  %v5728_v41 = vld [vmem:[#allocation40_spill] sm:$0xff] }
 0x242   : > { %v1601_v20 = vadd.f32 1.0, %v3507_v5  ;;  %v5180_v25 = vmul.f32 0.5, %v895_v23  ;;  %3522 = verf.f32 %v1353_v48  ;;  %v1603_v54 = vadd.f32 1.0, %v3509_v40 }
 0x243   : > { %3524 = verf.f32 %v1355_v8  ;;  %v1358_v47 = vmul.f32 0.70710677, %v1092_v35  ;;  %v901_v9 = vadd.f32 %v4852_v50, %v4354_v28  ;;  %v1604_v42 = vadd.f32 1.0, %v3511_v10 }
 0x244   : > { %v3513_v19 = vpop.eup %3512  ;;  %v1094_v57 = vadd.f32 %v5728_v41, %v4356_v29  ;;  %v1845_v59 = vpack.c.bf16 %v5127_v62, %v5099_v21  ;;  %v1847_v32 = vpack.c.bf16 %v5134_v52, %v5102_v36  ;;  %v5190_v55 = vmul.f32 0.5, %v1088_v16  ;;  %v5729_v21 = vld [vmem:[#allocation41_spill] sm:$0xff]  ;;  %v5730_v16 = vld [vmem:[#allocation42_spill] sm:$0xff] }
 0x245   : > { %v3515_v49 = vpop.eup %3514  ;;  %v5192_v23 = vmul.f32 0.5, %v899_v6  ;;  %3526 = verf.f32 %v1356_v1  ;;  %v1357_v60 = vmul.f32 0.70710677, %v901_v9  ;;  %v5195_v50 = vmul.f32 %v1601_v20, %v5116_v24 }
 0x246   : > { %v3517_v45 = vpop.eup %3516  ;;  %3528 = verf.f32 %v1358_v47  ;;  %v1359_v5 = vmul.f32 0.70710677, %v1094_v57  ;;  %2228 = vmatprep.mubr.bf16.mxu0 %v1845_v59  ;;  %2389 = vmatprep.mubr.bf16.mxu1 %v1847_v32  ;;  %v903_v62 = vadd.f32 %v5729_v21, %v4350_v26  ;;  %v1731_v36 = vmul.f32 %v1603_v54, %v5129_v15 }
 0x247   : > { %v3519_v48 = vpop.eup %3518  ;;  %v1606_v52 = vadd.f32 1.0, %v3513_v19  ;;  %v1096_v6 = vadd.f32 %v5730_v16, %v4352_v27  ;;  %v1844_v40 = vpack.c.bf16 %v5111_v46, %v5063_v34  ;;  %v5205_v24 = vmul.f32 %v1604_v42, %v5131_v53  ;;  %v5731_v19 = vld [vmem:[#allocation43_spill] sm:$0xff]  ;;  %v5732_v46 = vld [vmem:[#allocation44_spill] sm:$0xff] }
 0x248   : > { %v3521_v8 = vpop.eup %3520  ;;  %v1605_v10 = vadd.f32 1.0, %v3515_v49  ;;  %v5207_v1 = vmul.f32 0.5, %v1092_v35  ;;  %3530 = verf.f32 %v1357_v60  ;;  %v1607_v20 = vadd.f32 1.0, %v3517_v45 }
 0x249   : > { %3532 = verf.f32 %v1359_v5  ;;  %v1360_v47 = vmul.f32 0.70710677, %v903_v62  ;;  %v1362_v41 = vmul.f32 0.70710677, %v1096_v6  ;;  %2229 = vmatmul.mubr.bf16.gmra.mrb[96].mxu0 %v1844_v40  ;;  %v1608_v15 = vadd.f32 1.0, %v3519_v48 }
 0x24a   : > { %v1846_v54 = vpack.c.bf16 %v5114_v44, %v5072_v38  ;;  %v905_v34 = vadd.f32 %v5731_v19, %v4354_v28  ;;  %v1098_v53 = vadd.f32 %v5732_v46, %v4356_v29  ;;  %v1610_v42 = vadd.f32 1.0, %v3521_v8 }
 0x24b   : > { %3534 = verf.f32 %v1360_v47  ;;  %v909_v35 = vadd.f32 %v4895_v4, %v4350_v26  ;;  %v1102_v59 = vadd.f32 %v4897_v56, %v4352_v27  ;;  %v5220_v49 = vmul.f32 %v1606_v52, %v5138_v22 }
 0x24c   : > { %v3523_v32 = vpop.eup %3522  ;;  %v5222_v60 = vmul.f32 0.5, %v901_v9  ;;  %3536 = verf.f32 %v1362_v41  ;;  %2390 = vmatmul.mubr.bf16.gmra.mrb[96].mxu1 %v1846_v54  ;;  %v1361_v38 = vmul.f32 0.70710677, %v905_v34  ;;  %v5225_v45 = vmul.f32 %v1605_v10, %v5158_v39 }
 0x24d   : > { %v3525_v44 = vpop.eup %3524  ;;  %v5228_v5 = vmul.f32 %v1607_v20, %v5168_v33  ;;  %v5230_v4 = vmul.f32 0.5, %v1094_v57  ;;  %v1363_v21 = vmul.f32 0.70710677, %v1098_v53  ;;  %v5232_v56 = vmul.f32 0.5, %v903_v62 }
 0x24e   : > { %v5234_v48 = vmul.f32 0.5, %v1096_v6  ;;  %3538 = verf.f32 %v1361_v38  ;;  %v1364_v22 = vmul.f32 0.70710677, %v909_v35  ;;  %v5237_v52 = vmul.f32 %v1608_v15, %v5173_v3 }
 0x24f   : > { %v3527_v9 = vpop.eup %3526  ;;  %v5240_v16 = vmul.f32 %v1610_v42, %v5175_v18  ;;  %3540 = verf.f32 %v1363_v21  ;;  %v1366_v39 = vmul.f32 0.70710677, %v1102_v59  ;;  %v1609_v40 = vadd.f32 1.0, %v3523_v32 }
 0x250   : > { %v3529_v33 = vpop.eup %3528  ;;  %v1611_v57 = vadd.f32 1.0, %v3525_v44  ;;  %3542 = verf.f32 %v1364_v22  ;;  %v911_v62 = vadd.f32 %v4903_v7, %v4354_v28  ;;  %v5244_v6 = vmul.f32 0.5, %v905_v34 }
 0x251   : > { %v1104_v8 = vadd.f32 %v4905_v51, %v4356_v29  ;;  %v1849_v3 = vpack.c.bf16 %v5195_v50, %v5163_v11  ;;  %v1851_v18 = vpack.c.bf16 %v1731_v36, %v5166_v17  ;;  %v1612_v20 = vadd.f32 1.0, %v3527_v9  ;;  %v5733_v50 = vld [vmem:[#allocation29_spill] sm:$0xff] }
 0x252   : > { %v3531_v10 = vpop.eup %3530  ;;  %v5251_v47 = vmul.f32 0.5, %v1098_v53  ;;  %v5253_v41 = vmul.f32 0.5, %v909_v35  ;;  %v1365_v15 = vmul.f32 0.70710677, %v911_v62  ;;  %v1614_v19 = vadd.f32 1.0, %v3529_v33  ;;  %v5736_v33 = vld [vmem:[#allocation30_spill] sm:$0xff] }
 0x253   : > { %v3533_v54 = vpop.eup %3532  ;;  %3544 = verf.f32 %v1366_v39  ;;  %v1367_v7 = vmul.f32 0.70710677, %v1104_v8  ;;  %2236 = vmatprep.mubr.bf16.mxu0 %v1849_v3  ;;  %2397 = vmatprep.mubr.bf16.mxu1 %v1851_v18  ;;  %v913_v51 = vadd.f32 %v4914_v31, %v4350_v26  ;;  %v1737_v11 = vmul.f32 %v1609_v40, %v5180_v25 }
 0x254   : > { %v1739_v17 = vmul.f32 %v1611_v57, %v5190_v55  ;;  %v1106_v36 = vadd.f32 %v5733_v50, %v4352_v27  ;;  %v1848_v34 = vpack.c.bf16 %v5171_v2, %v5151_v14  ;;  %v1613_v53 = vadd.f32 1.0, %v3531_v10  ;;  %v5734_v14 = vld [vmem:[#allocation45_spill] sm:$0xff] }
 0x255   : > { %v3535_v46 = vpop.eup %3534  ;;  %v5263_v42 = vmul.f32 0.5, %v1102_v59  ;;  %3546 = verf.f32 %v1365_v15  ;;  %v1368_v35 = vmul.f32 0.70710677, %v913_v51  ;;  %v1615_v38 = vadd.f32 1.0, %v3533_v54  ;;  %v5735_v59 = vld [vmem:[#allocation46_spill] sm:$0xff] }
 0x256   : > { %v3537_v32 = vpop.eup %3536  ;;  %3548 = verf.f32 %v1367_v7  ;;  %v1370_v31 = vmul.f32 0.70710677, %v1106_v36  ;;  %2237 = vmatmul.mubr.bf16.gmra.mrb[100].mxu0 %v1848_v34  ;;  %v1850_v25 = vpack.c.bf16 %v5178_v61, %v5156_v13  ;;  %v5268_v55 = vmul.f32 %v1612_v20, %v5192_v23 }
 0x257   : > { %v5271_v44 = vmul.f32 %v1614_v19, %v5207_v1  ;;  %v915_v2 = vadd.f32 %v5734_v14, %v4354_v28  ;;  %v1108_v21 = vadd.f32 %v5735_v59, %v4356_v29  ;;  %v1616_v9 = vadd.f32 1.0, %v3535_v46  ;;  %v5737_v46 = vld [vmem:[#allocation47_spill] sm:$0xff] }
 0x258   : > { %v3539_v22 = vpop.eup %3538  ;;  %v1618_v39 = vadd.f32 1.0, %v3537_v32  ;;  %3550 = verf.f32 %v1368_v35  ;;  %2398 = vmatmul.mubr.bf16.gmra.mrb[100].mxu1 %v1850_v25  ;;  %v919_v13 = vadd.f32 %v4954_v0, %v4350_v26  ;;  %v5279_v23 = vmul.f32 0.5, %v911_v62 }
 0x259   : > { %v3541_v61 = vpop.eup %3540  ;;  %3552 = verf.f32 %v1370_v31  ;;  %v1369_v1 = vmul.f32 0.70710677, %v915_v2  ;;  %v1112_v40 = vadd.f32 %v5736_v33, %v4352_v27  ;;  %v5284_v3 = vmul.f32 %v1613_v53, %v5222_v60 }
 0x25a   : > { %v3543_v57 = vpop.eup %3542  ;;  %v5287_v18 = vmul.f32 %v1615_v38, %v5230_v4  ;;  %v1239_v10 = vmul.f32 0.5, %v1104_v8  ;;  %v1371_v20 = vmul.f32 0.70710677, %v1108_v21  ;;  %v1617_v15 = vadd.f32 1.0, %v3539_v22 }
 0x25b   : > { %v5289_v54 = vmul.f32 0.5, %v913_v51  ;;  %v5291_v0 = vmul.f32 0.5, %v1106_v36  ;;  %3554 = verf.f32 %v1369_v1  ;;  %v5294_v62 = vmul.f32 %v1616_v9, %v5232_v56  ;;  %v5738_v36 = vld [vmem:[#allocation48_spill] sm:$0xff] }
 0x25c   : > { %v5297_v19 = vmul.f32 %v1618_v39, %v5234_v48  ;;  %v5299_v7 = vmul.f32 0.5, %v915_v2  ;;  %v1372_v60 = vmul.f32 0.70710677, %v919_v13  ;;  %v1619_v4 = vadd.f32 1.0, %v3541_v61 }
 0x25d   : > { %v3545_v50 = vpop.eup %3544  ;;  %v1620_v34 = vadd.f32 1.0, %v3543_v57  ;;  %v1374_v8 = vmul.f32 0.70710677, %v1112_v40  ;;  %v921_v51 = vadd.f32 %v5737_v46, %v4354_v28  ;;  %3556 = verf.f32 %v1371_v20  ;;  %v5741_v20 = vld [vmem:[#allocation32_spill] sm:$0xff] }
 0x25e   : > { %v1114_v53 = vadd.f32 %v5738_v36, %v4356_v29  ;;  %v1853_v56 = vpack.c.bf16 %v1737_v11, %v5225_v45  ;;  %v1855_v35 = vpack.c.bf16 %v1739_v17, %v5228_v5  ;;  %v5308_v32 = vmul.f32 %v1617_v15, %v5244_v6  ;;  %v5739_v6 = vld [vmem:[#allocation31_spill] sm:$0xff] }
 0x25f   : > { %v3547_v48 = vpop.eup %3546  ;;  %v5310_v38 = vmul.f32 0.5, %v1108_v21  ;;  %v5312_v31 = vmul.f32 0.5, %v919_v13  ;;  %v1373_v25 = vmul.f32 0.70710677, %v921_v51  ;;  %v1622_v2 = vadd.f32 1.0, %v3545_v50 }
 0x260   : > { %v3549_v14 = vpop.eup %3548  ;;  %3558 = verf.f32 %v1372_v60  ;;  %v1375_v59 = vmul.f32 0.70710677, %v1114_v53  ;;  %2244 = vmatprep.mubr.bf16.mxu0 %v1853_v56  ;;  %2405 = vmatprep.mubr.bf16.mxu1 %v1855_v35  ;;  %v923_v45 = vadd.f32 %v4976_v30, %v4350_v26  ;;  %v1747_v5 = vmul.f32 %v1619_v4, %v5251_v47  ;;  %v5742_v60 = vld [vmem:[#allocation33_spill] sm:$0xff] }
 0x261   : > { %3560 = verf.f32 %v1374_v8  ;;  %v1116_v11 = vadd.f32 %v5739_v6, %v4352_v27  ;;  %v1852_v17 = vpack.c.bf16 %v5237_v52, %v5205_v24  ;;  %v5322_v22 = vmul.f32 %v1620_v34, %v5253_v41  ;;  %v5740_v52 = vld [vmem:[#allocation49_spill] sm:$0xff]  ;;  %v5744_v6 = vld [vmem:[#allocation51_spill] sm:$0xff] }
 0x262   : > { %v3551_v21 = vpop.eup %3550  ;;  %v1621_v9 = vadd.f32 1.0, %v3547_v48  ;;  %v5324_v39 = vmul.f32 0.5, %v1112_v40  ;;  %3562 = verf.f32 %v1373_v25  ;;  %v1623_v61 = vadd.f32 1.0, %v3549_v14  ;;  %v5743_v14 = vld [vmem:[#allocation50_spill] sm:$0xff] }
 0x263   : > { %v3553_v13 = vpop.eup %3552  ;;  %3564 = verf.f32 %v1375_v59  ;;  %v1376_v30 = vmul.f32 0.70710677, %v923_v45  ;;  %v1378_v47 = vmul.f32 0.70710677, %v1116_v11  ;;  %2245 = vmatmul.mubr.bf16.gmra.mrb[104].mxu0 %v1852_v17  ;;  %v5327_v1 = vmul.f32 %v1622_v2, %v5263_v42 }
 0x264   : > { %v1854_v24 = vpack.c.bf16 %v5240_v16, %v5220_v49  ;;  %v925_v41 = vadd.f32 %v5740_v52, %v4354_v28  ;;  %v1118_v33 = vadd.f32 %v4985_v37, %v4356_v29  ;;  %v1624_v57 = vadd.f32 1.0, %v3551_v21  ;;  %v5745_v52 = vld [vmem:[#allocation52_spill] sm:$0xff] }
 0x265   : > { %v3555_v40 = vpop.eup %3554  ;;  %3566 = verf.f32 %v1376_v30  ;;  %v929_v15 = vadd.f32 %v5741_v20, %v4350_v26  ;;  %v1122_v50 = vadd.f32 %v5742_v60, %v4352_v27  ;;  %v1626_v42 = vadd.f32 1.0, %v3553_v13 }
 0x266   : > { %v5339_v4 = vmul.f32 0.5, %v921_v51  ;;  %3568 = verf.f32 %v1378_v47  ;;  %2406 = vmatmul.mubr.bf16.gmra.mrb[104].mxu1 %v1854_v24  ;;  %v1377_v49 = vmul.f32 0.70710677, %v925_v41  ;;  %v5342_v16 = vmul.f32 %v1621_v9, %v5279_v23 }
 0x267   : > { %v5344_v34 = vmul.f32 %v1623_v61, %v1239_v10  ;;  %v5346_v37 = vmul.f32 0.5, %v1114_v53  ;;  %v1379_v8 = vmul.f32 0.70710677, %v1118_v33  ;;  %v3557_v46 = vpop.eup %3556  ;;  %v1625_v36 = vadd.f32 1.0, %v3555_v40 }
 0x268   : > { %v5348_v56 = vmul.f32 0.5, %v923_v45  ;;  %3570 = verf.f32 %v1377_v49  ;;  %v1380_v35 = vmul.f32 0.70710677, %v929_v15  ;;  %v5351_v51 = vmul.f32 %v1624_v57, %v5289_v54 }
 0x269   : > { %v5353_v48 = vmul.f32 0.5, %v1116_v11  ;;  %3572 = verf.f32 %v1379_v8  ;;  %v1382_v25 = vmul.f32 0.70710677, %v1122_v50  ;;  %v5356_v10 = vmul.f32 %v1626_v42, %v5291_v0 }
 0x26a   : > { %v3559_v23 = vpop.eup %3558  ;;  %v5358_v53 = vmul.f32 0.5, %v925_v41  ;;  %3574 = verf.f32 %v1380_v35  ;;  %v931_v2 = vadd.f32 %v5743_v14, %v4354_v28  ;;  %v1627_v45 = vadd.f32 1.0, %v3557_v46 }
 0x26b   : > { %v3561_v59 = vpop.eup %3560  ;;  %v1124_v54 = vadd.f32 %v5744_v6, %v4356_v29  ;;  %v1857_v11 = vpack.c.bf16 %v5308_v32, %v5284_v3  ;;  %v1859_v17 = vpack.c.bf16 %v1747_v5, %v5287_v18  ;;  %v5368_v0 = vmul.f32 %v1625_v36, %v5299_v7  ;;  %v5746_v18 = vld [vmem:[#allocation34_spill] sm:$0xff] }
 0x26c   : > { %v3563_v21 = vpop.eup %3562  ;;  %v5370_v9 = vmul.f32 0.5, %v1118_v33  ;;  %v5372_v13 = vmul.f32 0.5, %v929_v15  ;;  %v1381_v61 = vmul.f32 0.70710677, %v931_v2  ;;  %v1628_v47 = vadd.f32 1.0, %v3559_v23  ;;  %v5748_v23 = vld [vmem:[#allocation35_spill] sm:$0xff] }
 0x26d   : > { %v3565_v30 = vpop.eup %3564  ;;  %3576 = verf.f32 %v1382_v25  ;;  %v1383_v24 = vmul.f32 0.70710677, %v1124_v54  ;;  %2252 = vmatprep.mubr.bf16.mxu0 %v1857_v11  ;;  %2413 = vmatprep.mubr.bf16.mxu1 %v1859_v17  ;;  %v933_v3 = vadd.f32 %v5745_v52, %v4350_v26  ;;  %v1630_v32 = vadd.f32 1.0, %v3561_v59 }
 0x26e   : > { %3578 = verf.f32 %v1381_v61  ;;  %v1126_v7 = vadd.f32 %v5746_v18, %v4352_v27  ;;  %v1856_v5 = vpack.c.bf16 %v5294_v62, %v5268_v55  ;;  %v1755_v33 = vmul.f32 %v1627_v45, %v5310_v38  ;;  %v5747_v55 = vld [vmem:[#allocation53_spill] sm:$0xff] }
 0x26f   : > { %v3567_v41 = vpop.eup %3566  ;;  %v5381_v40 = vmul.f32 0.5, %v1122_v50  ;;  %3580 = verf.f32 %v1383_v24  ;;  %v1384_v57 = vmul.f32 0.70710677, %v933_v3  ;;  %v1629_v15 = vadd.f32 1.0, %v3563_v21 }
 0x270   : > { %v3569_v20 = vpop.eup %3568  ;;  %v1631_v60 = vadd.f32 1.0, %v3565_v30  ;;  %v1386_v42 = vmul.f32 0.70710677, %v1126_v7  ;;  %2253 = vmatmul.mubr.bf16.gmra.mrb[108].mxu0 %v1856_v5  ;;  %v1858_v49 = vpack.c.bf16 %v5297_v19, %v5271_v44  ;;  %v5386_v8 = vmul.f32 %v1628_v47, %v5312_v31 }
 0x271   : > { %3582 = verf.f32 %v1384_v57  ;;  %v935_v62 = vadd.f32 %v5747_v55, %v4354_v28  ;;  %v1128_v38 = vadd.f32 %v5044_v63, %v4356_v29  ;;  %v5393_v46 = vmul.f32 %v1630_v32, %v5324_v39 }
 0x272   : > { %v3571_v50 = vpop.eup %3570  ;;  %v1632_v36 = vadd.f32 1.0, %v3567_v41  ;;  %3584 = verf.f32 %v1386_v42  ;;  %2414 = vmatmul.mubr.bf16.gmra.mrb[108].mxu1 %v1858_v49  ;;  %v5397_v44 = vadd.f32 %v5067_v58, %v4350_v26  ;;  %v1634_v31 = vadd.f32 1.0, %v3569_v20 }
 0x273   : > { %v3573_v19 = vpop.eup %3572  ;;  %v5399_v35 = vmul.f32 0.5, %v931_v2  ;;  %v1385_v25 = vmul.f32 0.70710677, %v935_v62  ;;  %v5403_v14 = vadd.f32 %v5748_v23, %v4352_v27  ;;  %v5406_v39 = vmul.f32 %v1629_v15, %v5339_v4  ;;  %v5750_v15 = vld [vmem:[#allocation37_spill] sm:$0xff] }
 0x274   : > { %v3575_v63 = vpop.eup %3574  ;;  %v5409_v59 = vmul.f32 %v1631_v60, %v5346_v37  ;;  %v5411_v45 = vmul.f32 0.5, %v1124_v54  ;;  %v1387_v58 = vmul.f32 0.70710677, %v1128_v38  ;;  %v1633_v6 = vadd.f32 1.0, %v3571_v50 }
 0x275   : > { %v1635_v11 = vadd.f32 1.0, %v3573_v19  ;;  %v1256_v17 = vmul.f32 0.5, %v933_v3  ;;  %3586 = verf.f32 %v1385_v25  ;;  %v5414_v2 = vmul.f32 %v1632_v36, %v5348_v56  ;;  %v5749_v56 = vld [vmem:[#allocation36_spill] sm:$0xff]  ;;  %v5752_v36 = vld [vmem:[#allocation39_spill] sm:$0xff] }
 0x276   : > { %v1258_v21 = vmul.f32 0.5, %v1126_v7  ;;  %3588 = verf.f32 %v1387_v58  ;;  %v1388_v61 = vmul.f32 0.70710677, %v5397_v44  ;;  %v5418_v4 = vmul.f32 %v1634_v31, %v5353_v48 }
 0x277   : > { %v3577_v30 = vpop.eup %3576  ;;  %v1636_v37 = vadd.f32 1.0, %v3575_v63  ;;  %v1390_v54 = vmul.f32 0.70710677, %v5403_v14  ;;  %v5423_v47 = vadd.f32 %v5080_v43, %v4354_v28  ;;  %v1257_v52 = vmul.f32 0.5, %v935_v62 }
 0x278   : > { %v3579_v24 = vpop.eup %3578  ;;  %v5427_v3 = vadd.f32 %v5749_v56, %v4356_v29  ;;  %v1861_v32 = vpack.c.bf16 %v5368_v0, %v5342_v16  ;;  %v1863_v18 = vpack.c.bf16 %v1755_v33, %v5344_v34  ;;  %v1761_v7 = vmul.f32 %v1633_v6, %v5358_v53  ;;  %v5751_v53 = vld [vmem:[#allocation38_spill] sm:$0xff] }
 0x279   : > { %v3581_v48 = vpop.eup %3580  ;;  %v1763_v5 = vmul.f32 %v1635_v11, %v5370_v9  ;;  %v1259_v41 = vmul.f32 0.5, %v1128_v38  ;;  %v1389_v43 = vmul.f32 0.70710677, %v5423_v47  ;;  %v1638_v57 = vadd.f32 1.0, %v3577_v30 }
 0x27a   : > { %3590 = verf.f32 %v1388_v61  ;;  %v1391_v20 = vmul.f32 0.70710677, %v5427_v3  ;;  %2260 = vmatprep.mubr.bf16.mxu0 %v1861_v32  ;;  %2421 = vmatprep.mubr.bf16.mxu1 %v1863_v18  ;;  %v943_v60 = vadd.f32 %v5750_v15, %v4350_v26  ;;  %v5439_v34 = vmul.f32 %v1636_v37, %v5372_v13 }
 0x27b   : > { %v3583_v16 = vpop.eup %3582  ;;  %3592 = verf.f32 %v1390_v54  ;;  %v1136_v0 = vadd.f32 %v5751_v53, %v4352_v27  ;;  %v1860_v9 = vpack.c.bf16 %v5351_v51, %v5322_v22  ;;  %v1637_v42 = vadd.f32 1.0, %v3579_v24 }
 0x27c   : > { %v3585_v33 = vpop.eup %3584  ;;  %v1639_v49 = vadd.f32 1.0, %v3581_v48  ;;  %v1640_v55 = vadd.f32 1.0, %v3583_v16  ;;  %3594 = verf.f32 %v1389_v43  ;;  %v1392_v38 = vmul.f32 0.70710677, %v943_v60 }
 0x27d   : > { %v1642_v62 = vadd.f32 1.0, %v3585_v33  ;;  %3596 = verf.f32 %v1391_v20  ;;  %v1394_v26 = vmul.f32 0.70710677, %v1136_v0  ;;  %2261 = vmatmul.mubr.bf16.gmra.mrb[112].mxu0 %v1860_v9  ;;  %v1862_v13 = vpack.c.bf16 %v5356_v10, %v5327_v1 }
 0x27e   : > { %v1768_v50 = vmul.f32 %v1640_v55, %v1256_v17  ;;  %v945_v27 = vadd.f32 %v5094_v12, %v4354_v28  ;;  %v1138_v22 = vadd.f32 %v5752_v36, %v4356_v29  ;;  %3598 = verf.f32 %v1392_v38 }
 0x27f   : > { %v3587_v51 = vpop.eup %3586  ;;  %v5451_v19 = vmul.f32 %v1642_v62, %v1258_v21  ;;  %v1865_v31 = vpack.c.bf16 %v1761_v7, %v5406_v39  ;;  %v1867_v25 = vpack.c.bf16 %v1763_v5, %v5409_v59  ;;  %v1766_v63 = vmul.f32 %v1638_v57, %v5381_v40  ;;  %2422 = vmatmul.mubr.bf16.gmra.mrb[112].mxu1 %v1862_v13 }
 0x280   : > { %v3589_v23 = vpop.eup %3588  ;;  %v1641_v58 = vadd.f32 1.0, %v3587_v51  ;;  %3600 = verf.f32 %v1394_v26  ;;  %v1393_v1 = vmul.f32 0.70710677, %v945_v27  ;;  %v1765_v28 = vmul.f32 %v1637_v42, %v5399_v35  ;;  %v1780_v51 = vld [vmem:[#allocation2] sm:$0xff] }
 0x281   : > { %v1643_v12 = vadd.f32 1.0, %v3589_v23  ;;  %v1395_v10 = vmul.f32 0.70710677, %v1138_v22  ;;  %2268 = vmatprep.mubr.bf16.mxu0 %v1865_v31  ;;  %2429 = vmatprep.mubr.bf16.mxu1 %v1867_v25  ;;  %v1864_v29 = vpack.c.bf16 %v5414_v2, %v5386_v8  ;;  %v1767_v39 = vmul.f32 %v1639_v49, %v5411_v45 }
 0x282   : > { %v1769_v6 = vmul.f32 %v1641_v58, %v1257_v52  ;;  %3602 = verf.f32 %v1393_v1  ;;  %v1866_v40 = vpack.c.bf16 %v5418_v4, %v5393_v46  ;;  %v1868_v11 = vpack.c.bf16 %v1768_v50, %v5439_v34  ;;  %v1781_v58 = vld [vmem:[#allocation2 + $0x8] sm:$0xff] }
 0x283   : > { %v1771_v59 = vmul.f32 %v1643_v12, %v1259_v41  ;;  %3604 = verf.f32 %v1395_v10  ;;  %v1870_v35 = vpack.c.bf16 %v5451_v19, %v1766_v63  ;;  %v1260_v4 = vmul.f32 0.5, %v5397_v44 }
 0x284   : > { %v3591_v17 = vpop.eup %3590  ;;  %v1869_v21 = vpack.c.bf16 %v1769_v6, %v1765_v28  ;;  %v1264_v24 = vmul.f32 0.5, %v943_v60  ;;  %v1262_v56 = vmul.f32 0.5, %v5403_v14  ;;  %v1266_v18 = vmul.f32 0.5, %v1136_v0 }
 0x285   : > { %v3593_v61 = vpop.eup %3592  ;;  %2269 = vmatmul.mubr.bf16.gmra.mrb[116].mxu0 %v1864_v29  ;;  %v1871_v30 = vpack.c.bf16 %v1771_v59, %v1767_v39  ;;  %v1644_v45 = vadd.f32 1.0, %v3591_v17  ;;  %v1261_v41 = vmul.f32 0.5, %v5423_v47  ;;  %v1265_v34 = vmul.f32 0.5, %v945_v27  ;;  %v1782_v17 = vld [vmem:[#allocation2 + $0x10] sm:$0xff] }
 0x286   : > { %v3595_v37 = vpop.eup %3594  ;;  %2276 = vmatprep.mubr.bf16.mxu0 %v1869_v21  ;;  %v1646_v54 = vadd.f32 1.0, %v3593_v61  ;;  %v1263_v44 = vmul.f32 0.5, %v5427_v3  ;;  %v1267_v60 = vmul.f32 0.5, %v1138_v22 }
 0x287   : > { %v3597_v8 = vpop.eup %3596  ;;  %2430 = vmatmul.mubr.bf16.gmra.mrb[116].mxu1 %v1866_v40  ;;  %v1645_v32 = vadd.f32 1.0, %v3595_v37  ;;  %v1772_v5 = vmul.f32 %v1644_v45, %v1260_v4  ;;  %v1783_v45 = vld [vmem:[#allocation2 + $0x18] sm:$0xff] }
 0x288   : > { %v3599_v2 = vpop.eup %3598  ;;  %2437 = vmatprep.mubr.bf16.mxu1 %v1871_v30  ;;  %v1647_v43 = vadd.f32 1.0, %v3597_v8  ;;  %v1774_v15 = vmul.f32 %v1646_v54, %v1262_v56 }
 0x289   : > { %v1648_v52 = vadd.f32 1.0, %v3599_v2  ;;  %v1773_v33 = vmul.f32 %v1645_v32, %v1261_v41 }
 0x28a   : > { %v3601_v46 = vpop.eup %3600  ;;  %v1775_v49 = vmul.f32 %v1647_v43, %v1263_v44 }
 0x28b   : > { %v1650_v48 = vadd.f32 1.0, %v3601_v46  ;;  %v1776_v57 = vmul.f32 %v1648_v52, %v1264_v24 }
 0x28c   : > { %v3603_v7 = vpop.eup %3602 }
 0x28d   : > { %v3605_v20 = vpop.eup %3604  ;;  %v1778_v16 = vmul.f32 %v1650_v48, %v1266_v18  ;;  %v1649_v53 = vadd.f32 1.0, %v3603_v7  ;;  %2277 = vmatmul.mubr.bf16.gmra.mrb[120].mxu0 %v1868_v11  ;;  %v1872_v14 = vpack.c.bf16 %v1776_v57, %v1772_v5  ;;  %v1784_v5 = vld [vmem:[#allocation2 + $0x20] sm:$0xff] }
 0x28e   : > { %v1651_v9 = vadd.f32 1.0, %v3605_v20 }
 0x28f   : > { %v1777_v0 = vmul.f32 %v1649_v53, %v1265_v34  ;;  %v1874_v42 = vpack.c.bf16 %v1778_v16, %v1774_v15  ;;  %2438 = vmatmul.mubr.bf16.gmra.mrb[120].mxu1 %v1870_v35  ;;  %v1785_v16 = vld [vmem:[#allocation2 + $0x28] sm:$0xff] }
 0x290   : > { %v1779_v55 = vmul.f32 %v1651_v9, %v1267_v60 }
 0x291   : > { %v1873_v47 = vpack.c.bf16 %v1777_v0, %v1773_v33 }
 0x292   : > { %v1875_v62 = vpack.c.bf16 %v1779_v55, %v1775_v49 }
 0x293   : > { %2284 = vmatprep.mubr.bf16.mxu0 %v1873_v47 }
 0x294   : > { %2445 = vmatprep.mubr.bf16.mxu1 %v1875_v62  ;;  %v1786_v62 = vld [vmem:[#allocation2 + $0x30] sm:$0xff] }
 0x295   : > { %2285 = vmatmul.mubr.bf16.gmra.mrb[124].mxu0 %v1872_v14 }
 0x297   : > { %2446 = vmatmul.mubr.bf16.gmra.mrb[124].mxu1 %v1874_v42 }
 0x2b0   : > { %v2920_v38 = vpop.f32.mrb[64].mxu0  ;;  %v3032_v26 = vpop.f32.mrb[64].mxu1 }
 0x2b1   : > { %v2921_v50 = vpop.f32.mrb[65].mxu0  ;;  %v3033_v13 = vpop.f32.mrb[65].mxu1 }
 0x2b2   : > { %v2922_v3 = vadd.f32 %v2921_v50, %v2920_v38  ;;  %v3034_v27 = vadd.f32 %v3033_v13, %v3032_v26  ;;  %v2923_v36 = vpop.f32.mrb[66].mxu0  ;;  %v3035_v22 = vpop.f32.mrb[66].mxu1 }
 0x2b3   : > { %v2924_v19 = vpop.f32.mrb[67].mxu0  ;;  %v3036_v31 = vpop.f32.mrb[67].mxu1 }
 0x2b4   : > { %v2328_v25 = vadd.f32 %v3034_v27, %v2922_v3  ;;  %v2925_v23 = vadd.f32 %v2924_v19, %v2923_v36  ;;  %v3037_v63 = vadd.f32 %v3036_v31, %v3035_v22  ;;  %v1787_v3 = vld [vmem:[#allocation2 + $0x38] sm:$0xff] }
 0x2b6   : > { %v2454_v1 = vadd.f32 %v2328_v25, %v1780_v51  ;;  %v2331_v28 = vadd.f32 %v3037_v63, %v2925_v23 }
 0x2b8   : > { %2486 = vst [vmem:[#allocation2] sm:$0xff] %v2454_v1  ;;  %v2455_v12 = vadd.f32 %v2331_v28, %v1781_v58 }
 0x2ba   : > { %2487 = vst [vmem:[#allocation2 + $0x8] sm:$0xff] %v2455_v12 }
 0x2bf   : > { %v2926_v10 = vpop.f32.mrb[68].mxu0 }
 0x2c0   : > { %v2927_v39 = vpop.f32.mrb[69].mxu0 }
 0x2c1   : > { %v3038_v29 = vpop.f32.mrb[68].mxu1  ;;  %v2928_v40 = vadd.f32 %v2927_v39, %v2926_v10  ;;  %v2929_v11 = vpop.f32.mrb[70].mxu0  ;;  %v1788_v10 = vld [vmem:[#allocation2 + $0x40] sm:$0xff] }
 0x2c2   : > { %v3039_v6 = vpop.f32.mrb[69].mxu1  ;;  %v2930_v21 = vpop.f32.mrb[71].mxu0 }
 0x2c3   : > { %v3040_v59 = vadd.f32 %v3039_v6, %v3038_v29  ;;  %v3041_v35 = vpop.f32.mrb[70].mxu1  ;;  %v2931_v37 = vadd.f32 %v2930_v21, %v2929_v11 }
 0x2c4   : > { %v3042_v61 = vpop.f32.mrb[71].mxu1 }
 0x2c5   : > { %v2336_v30 = vadd.f32 %v3040_v59, %v2928_v40  ;;  %v3043_v8 = vadd.f32 %v3042_v61, %v3041_v35  ;;  %v1789_v40 = vld [vmem:[#allocation2 + $0x48] sm:$0xff] }
 0x2c7   : > { %v2456_v2 = vadd.f32 %v2336_v30, %v1782_v17  ;;  %v2339_v54 = vadd.f32 %v3043_v8, %v2931_v37 }
 0x2c9   : > { %2488 = vst [vmem:[#allocation2 + $0x10] sm:$0xff] %v2456_v2  ;;  %v2457_v46 = vadd.f32 %v2339_v54, %v1783_v45 }
 0x2cb   : > { %2489 = vst [vmem:[#allocation2 + $0x18] sm:$0xff] %v2457_v46 }
 0x2ce   : > { %v2932_v4 = vpop.f32.mrb[72].mxu0  ;;  %v3044_v24 = vpop.f32.mrb[72].mxu1 }
 0x2cf   : > { %v2933_v52 = vpop.f32.mrb[73].mxu0  ;;  %v3045_v56 = vpop.f32.mrb[73].mxu1 }
 0x2d0   : > { %v2934_v32 = vadd.f32 %v2933_v52, %v2932_v4  ;;  %v3046_v18 = vadd.f32 %v3045_v56, %v3044_v24  ;;  %v2935_v48 = vpop.f32.mrb[74].mxu0  ;;  %v3047_v7 = vpop.f32.mrb[74].mxu1  ;;  %v1790_v4 = vld [vmem:[#allocation2 + $0x50] sm:$0xff] }
 0x2d1   : > { %v2936_v41 = vpop.f32.mrb[75].mxu0  ;;  %v3048_v43 = vpop.f32.mrb[75].mxu1 }
 0x2d2   : > { %v2344_v57 = vadd.f32 %v3046_v18, %v2934_v32  ;;  %v2937_v20 = vadd.f32 %v2936_v41, %v2935_v48  ;;  %v3049_v15 = vadd.f32 %v3048_v43, %v3047_v7  ;;  %v1791_v32 = vld [vmem:[#allocation2 + $0x58] sm:$0xff] }
 0x2d4   : > { %v2458_v34 = vadd.f32 %v2344_v57, %v1784_v5  ;;  %v2347_v53 = vadd.f32 %v3049_v15, %v2937_v20 }
 0x2d6   : > { %2490 = vst [vmem:[#allocation2 + $0x20] sm:$0xff] %v2458_v34  ;;  %v2459_v44 = vadd.f32 %v2347_v53, %v1785_v16 }
 0x2d8   : > { %2491 = vst [vmem:[#allocation2 + $0x28] sm:$0xff] %v2459_v44 }
 0x2d9   : > { %v2938_v60 = vpop.f32.mrb[76].mxu0  ;;  %v3050_v9 = vpop.f32.mrb[76].mxu1 }
 0x2da   : > { %v2939_v14 = vpop.f32.mrb[77].mxu0  ;;  %v3051_v0 = vpop.f32.mrb[77].mxu1 }
 0x2db   : > { %v2940_v33 = vadd.f32 %v2939_v14, %v2938_v60  ;;  %v2941_v42 = vpop.f32.mrb[78].mxu0  ;;  %v3052_v49 = vadd.f32 %v3051_v0, %v3050_v9  ;;  %v3053_v55 = vpop.f32.mrb[78].mxu1  ;;  %v1792_v60 = vld [vmem:[#allocation2 + $0x60] sm:$0xff]  ;;  %v1793_v0 = vld [vmem:[#allocation2 + $0x68] sm:$0xff] }
 0x2dc   : > { %v2942_v47 = vpop.f32.mrb[79].mxu0  ;;  %v3054_v26 = vpop.f32.mrb[79].mxu1 }
 0x2dd   : > { %v2943_v38 = vadd.f32 %v2942_v47, %v2941_v42  ;;  %v2352_v50 = vadd.f32 %v3052_v49, %v2940_v33  ;;  %v3055_v13 = vadd.f32 %v3054_v26, %v3053_v55 }
 0x2df   : > { %v2460_v27 = vadd.f32 %v2352_v50, %v1786_v62  ;;  %v2355_v36 = vadd.f32 %v3055_v13, %v2943_v38 }
 0x2e1   : > { %2492 = vst [vmem:[#allocation2 + $0x30] sm:$0xff] %v2460_v27  ;;  %v2461_v22 = vadd.f32 %v2355_v36, %v1787_v3 }
 0x2e3   : > { %2493 = vst [vmem:[#allocation2 + $0x38] sm:$0xff] %v2461_v22 }
 0x2e7   : > { %v2944_v51 = vpop.f32.mrb[80].mxu0 }
 0x2e8   : > { %v2945_v19 = vpop.f32.mrb[81].mxu0 }
 0x2e9   : > { %v2946_v31 = vadd.f32 %v2945_v19, %v2944_v51  ;;  %v2947_v25 = vpop.f32.mrb[82].mxu0  ;;  %v1794_v51 = vld [vmem:[#allocation2 + $0x70] sm:$0xff] }
 0x2ea   : > { %v3056_v23 = vpop.f32.mrb[80].mxu1  ;;  %v2948_v63 = vpop.f32.mrb[83].mxu0 }
 0x2eb   : > { %v3057_v58 = vpop.f32.mrb[81].mxu1  ;;  %v2949_v1 = vadd.f32 %v2948_v63, %v2947_v25 }
 0x2ec   : > { %v3058_v28 = vadd.f32 %v3057_v58, %v3056_v23  ;;  %v3059_v12 = vpop.f32.mrb[82].mxu1  ;;  %v1795_v23 = vld [vmem:[#allocation2 + $0x78] sm:$0xff] }
 0x2ed   : > { %v3060_v29 = vpop.f32.mrb[83].mxu1 }
 0x2ee   : > { %v2360_v39 = vadd.f32 %v3058_v28, %v2946_v31  ;;  %v3061_v6 = vadd.f32 %v3060_v29, %v3059_v12 }
 0x2f0   : > { %v2462_v59 = vadd.f32 %v2360_v39, %v1788_v10  ;;  %v2363_v11 = vadd.f32 %v3061_v6, %v2949_v1 }
 0x2f2   : > { %2494 = vst [vmem:[#allocation2 + $0x40] sm:$0xff] %v2462_v59  ;;  %v2463_v35 = vadd.f32 %v2363_v11, %v1789_v40 }
 0x2f4   : > { %2495 = vst [vmem:[#allocation2 + $0x48] sm:$0xff] %v2463_v35 }
 0x2f5   : > { %v2950_v17 = vpop.f32.mrb[84].mxu0 }
 0x2f6   : > { %v2951_v21 = vpop.f32.mrb[85].mxu0  ;;  %v3062_v37 = vpop.f32.mrb[84].mxu1 }
 0x2f7   : > { %v2952_v61 = vadd.f32 %v2951_v21, %v2950_v17  ;;  %v2953_v30 = vpop.f32.mrb[86].mxu0  ;;  %v3063_v45 = vpop.f32.mrb[85].mxu1  ;;  %v1796_v17 = vld [vmem:[#allocation2 + $0x80] sm:$0xff] }
 0x2f8   : > { %v2954_v8 = vpop.f32.mrb[87].mxu0  ;;  %v3064_v54 = vadd.f32 %v3063_v45, %v3062_v37  ;;  %v3065_v46 = vpop.f32.mrb[86].mxu1  ;;  %v1797_v37 = vld [vmem:[#allocation2 + $0x88] sm:$0xff] }
 0x2f9   : > { %v2955_v2 = vadd.f32 %v2954_v8, %v2953_v30  ;;  %v3066_v24 = vpop.f32.mrb[87].mxu1 }
 0x2fa   : > { %v2368_v52 = vadd.f32 %v3064_v54, %v2952_v61  ;;  %v3067_v56 = vadd.f32 %v3066_v24, %v3065_v46 }
 0x2fc   : > { %v2464_v18 = vadd.f32 %v2368_v52, %v1790_v4  ;;  %v2371_v48 = vadd.f32 %v3067_v56, %v2955_v2 }
 0x2fe   : > { %2496 = vst [vmem:[#allocation2 + $0x50] sm:$0xff] %v2464_v18  ;;  %v2465_v7 = vadd.f32 %v2371_v48, %v1791_v32 }
 0x300   : > { %2497 = vst [vmem:[#allocation2 + $0x58] sm:$0xff] %v2465_v7 }
 0x302   : > { %v2956_v5 = vpop.f32.mrb[88].mxu0 }
 0x303   : > { %v2957_v41 = vpop.f32.mrb[89].mxu0 }
 0x304   : > { %v2958_v43 = vadd.f32 %v2957_v41, %v2956_v5  ;;  %v2959_v57 = vpop.f32.mrb[90].mxu0  ;;  %v1798_v5 = vld [vmem:[#allocation2 + $0x90] sm:$0xff] }
 0x305   : > { %v3068_v20 = vpop.f32.mrb[88].mxu1  ;;  %v2960_v15 = vpop.f32.mrb[91].mxu0 }
 0x306   : > { %v3069_v16 = vpop.f32.mrb[89].mxu1  ;;  %v2961_v34 = vadd.f32 %v2960_v15, %v2959_v57 }
 0x307   : > { %v3070_v53 = vadd.f32 %v3069_v16, %v3068_v20  ;;  %v3071_v44 = vpop.f32.mrb[90].mxu1  ;;  %v1799_v20 = vld [vmem:[#allocation2 + $0x98] sm:$0xff] }
 0x308   : > { %v3072_v9 = vpop.f32.mrb[91].mxu1 }
 0x309   : > { %v2376_v14 = vadd.f32 %v3070_v53, %v2958_v43  ;;  %v3073_v33 = vadd.f32 %v3072_v9, %v3071_v44 }
 0x30b   : > { %v2466_v42 = vadd.f32 %v2376_v14, %v1792_v60  ;;  %v2379_v49 = vadd.f32 %v3073_v33, %v2961_v34 }
 0x30d   : > { %2498 = vst [vmem:[#allocation2 + $0x60] sm:$0xff] %v2466_v42  ;;  %v2467_v55 = vadd.f32 %v2379_v49, %v1793_v0 }
 0x30f   : > { %2499 = vst [vmem:[#allocation2 + $0x68] sm:$0xff] %v2467_v55  ;;  %v2962_v47 = vpop.f32.mrb[92].mxu0 }
 0x310   : > { %v2963_v62 = vpop.f32.mrb[93].mxu0 }
 0x311   : > { %v3074_v38 = vpop.f32.mrb[92].mxu1  ;;  %v2964_v26 = vadd.f32 %v2963_v62, %v2962_v47  ;;  %v2965_v50 = vpop.f32.mrb[94].mxu0  ;;  %v1800_v47 = vld [vmem:[#allocation2 + $0xa0] sm:$0xff] }
 0x312   : > { %v3075_v13 = vpop.f32.mrb[93].mxu1  ;;  %v2966_v3 = vpop.f32.mrb[95].mxu0 }
 0x313   : > { %v3076_v27 = vadd.f32 %v3075_v13, %v3074_v38  ;;  %v3077_v36 = vpop.f32.mrb[94].mxu1  ;;  %v2967_v22 = vadd.f32 %v2966_v3, %v2965_v50  ;;  %v1801_v50 = vld [vmem:[#allocation2 + $0xa8] sm:$0xff] }
 0x314   : > { %v3078_v19 = vpop.f32.mrb[95].mxu1 }
 0x315   : > { %v2384_v31 = vadd.f32 %v3076_v27, %v2964_v26  ;;  %v3079_v25 = vadd.f32 %v3078_v19, %v3077_v36 }
 0x317   : > { %v2468_v63 = vadd.f32 %v2384_v31, %v1794_v51  ;;  %v2387_v58 = vadd.f32 %v3079_v25, %v2967_v22 }
 0x319   : > { %2500 = vst [vmem:[#allocation2 + $0x70] sm:$0xff] %v2468_v63  ;;  %v2469_v1 = vadd.f32 %v2387_v58, %v1795_v23 }
 0x31b   : > { %2501 = vst [vmem:[#allocation2 + $0x78] sm:$0xff] %v2469_v1 }
 0x31c   : > { %v2968_v28 = vpop.f32.mrb[96].mxu0 }
 0x31d   : > { %v2969_v12 = vpop.f32.mrb[97].mxu0 }
 0x31e   : > { %v2970_v10 = vadd.f32 %v2969_v12, %v2968_v28  ;;  %v2971_v29 = vpop.f32.mrb[98].mxu0  ;;  %v1802_v28 = vld [vmem:[#allocation2 + $0xb0] sm:$0xff] }
 0x31f   : > { %v3080_v39 = vpop.f32.mrb[96].mxu1  ;;  %v2972_v6 = vpop.f32.mrb[99].mxu0 }
 0x320   : > { %v3081_v40 = vpop.f32.mrb[97].mxu1  ;;  %v2973_v59 = vadd.f32 %v2972_v6, %v2971_v29 }
 0x321   : > { %v3082_v11 = vadd.f32 %v3081_v40, %v3080_v39  ;;  %v3083_v35 = vpop.f32.mrb[98].mxu1  ;;  %v1803_v39 = vld [vmem:[#allocation2 + $0xb8] sm:$0xff] }
 0x322   : > { %v3084_v21 = vpop.f32.mrb[99].mxu1 }
 0x323   : > { %v2392_v61 = vadd.f32 %v3082_v11, %v2970_v10  ;;  %v3085_v30 = vadd.f32 %v3084_v21, %v3083_v35 }
 0x325   : > { %v2470_v8 = vadd.f32 %v2392_v61, %v1796_v17  ;;  %v2395_v45 = vadd.f32 %v3085_v30, %v2973_v59 }
 0x327   : > { %2502 = vst [vmem:[#allocation2 + $0x80] sm:$0xff] %v2470_v8  ;;  %v2471_v2 = vadd.f32 %v2395_v45, %v1797_v37 }
 0x329   : > { %2503 = vst [vmem:[#allocation2 + $0x88] sm:$0xff] %v2471_v2  ;;  %v2974_v54 = vpop.f32.mrb[100].mxu0 }
 0x32a   : > { %v2975_v46 = vpop.f32.mrb[101].mxu0 }
 0x32b   : > { %v3086_v4 = vpop.f32.mrb[100].mxu1  ;;  %v2976_v24 = vadd.f32 %v2975_v46, %v2974_v54  ;;  %v2977_v52 = vpop.f32.mrb[102].mxu0  ;;  %v1804_v54 = vld [vmem:[#allocation2 + $0xc0] sm:$0xff] }
 0x32c   : > { %v3087_v56 = vpop.f32.mrb[101].mxu1  ;;  %v2978_v32 = vpop.f32.mrb[103].mxu0 }
 0x32d   : > { %v3088_v18 = vadd.f32 %v3087_v56, %v3086_v4  ;;  %v3089_v48 = vpop.f32.mrb[102].mxu1  ;;  %v2979_v7 = vadd.f32 %v2978_v32, %v2977_v52  ;;  %v1805_v52 = vld [vmem:[#allocation2 + $0xc8] sm:$0xff] }
 0x32e   : > { %v3090_v41 = vpop.f32.mrb[103].mxu1 }
 0x32f   : > { %v2400_v43 = vadd.f32 %v3088_v18, %v2976_v24  ;;  %v3091_v57 = vadd.f32 %v3090_v41, %v3089_v48 }
 0x331   : > { %v2472_v15 = vadd.f32 %v2400_v43, %v1798_v5  ;;  %v2403_v16 = vadd.f32 %v3091_v57, %v2979_v7 }
 0x333   : > { %2504 = vst [vmem:[#allocation2 + $0x90] sm:$0xff] %v2472_v15  ;;  %v2473_v34 = vadd.f32 %v2403_v16, %v1799_v20 }
 0x335   : > { %2505 = vst [vmem:[#allocation2 + $0x98] sm:$0xff] %v2473_v34 }
 0x336   : > { %v2980_v53 = vpop.f32.mrb[104].mxu0 }
 0x337   : > { %v2981_v44 = vpop.f32.mrb[105].mxu0 }
 0x338   : > { %v2982_v60 = vadd.f32 %v2981_v44, %v2980_v53  ;;  %v2983_v9 = vpop.f32.mrb[106].mxu0  ;;  %v1806_v53 = vld [vmem:[#allocation2 + $0xd0] sm:$0xff] }
 0x339   : > { %v3092_v14 = vpop.f32.mrb[104].mxu1  ;;  %v2984_v33 = vpop.f32.mrb[107].mxu0 }
 0x33a   : > { %v3093_v0 = vpop.f32.mrb[105].mxu1  ;;  %v2985_v42 = vadd.f32 %v2984_v33, %v2983_v9 }
 0x33b   : > { %v3094_v49 = vadd.f32 %v3093_v0, %v3092_v14  ;;  %v3095_v55 = vpop.f32.mrb[106].mxu1  ;;  %v1807_v14 = vld [vmem:[#allocation2 + $0xd8] sm:$0xff] }
 0x33c   : > { %v3096_v62 = vpop.f32.mrb[107].mxu1 }
 0x33d   : > { %v2408_v38 = vadd.f32 %v3094_v49, %v2982_v60  ;;  %v3097_v26 = vadd.f32 %v3096_v62, %v3095_v55 }
 0x33f   : > { %v2474_v13 = vadd.f32 %v2408_v38, %v1800_v47  ;;  %v2411_v3 = vadd.f32 %v3097_v26, %v2985_v42 }
 0x341   : > { %2506 = vst [vmem:[#allocation2 + $0xa0] sm:$0xff] %v2474_v13  ;;  %v2475_v27 = vadd.f32 %v2411_v3, %v1801_v50 }
 0x343   : > { %2507 = vst [vmem:[#allocation2 + $0xa8] sm:$0xff] %v2475_v27  ;;  %v2986_v36 = vpop.f32.mrb[108].mxu0 }
 0x344   : > { %v2987_v22 = vpop.f32.mrb[109].mxu0 }
 0x345   : > { %v3098_v51 = vpop.f32.mrb[108].mxu1  ;;  %v2988_v19 = vadd.f32 %v2987_v22, %v2986_v36  ;;  %v2989_v31 = vpop.f32.mrb[110].mxu0  ;;  %v1808_v36 = vld [vmem:[#allocation2 + $0xe0] sm:$0xff] }
 0x346   : > { %v3099_v25 = vpop.f32.mrb[109].mxu1  ;;  %v2990_v23 = vpop.f32.mrb[111].mxu0 }
 0x347   : > { %v3100_v63 = vadd.f32 %v3099_v25, %v3098_v51  ;;  %v3101_v58 = vpop.f32.mrb[110].mxu1  ;;  %v2991_v1 = vadd.f32 %v2990_v23, %v2989_v31  ;;  %v1809_v31 = vld [vmem:[#allocation2 + $0xe8] sm:$0xff] }
 0x348   : > { %v3102_v12 = vpop.f32.mrb[111].mxu1 }
 0x349   : > { %v2416_v10 = vadd.f32 %v3100_v63, %v2988_v19  ;;  %v3103_v29 = vadd.f32 %v3102_v12, %v3101_v58 }
 0x34b   : > { %v2476_v6 = vadd.f32 %v2416_v10, %v1802_v28  ;;  %v2419_v40 = vadd.f32 %v3103_v29, %v2991_v1 }
 0x34d   : > { %2508 = vst [vmem:[#allocation2 + $0xb0] sm:$0xff] %v2476_v6  ;;  %v2477_v59 = vadd.f32 %v2419_v40, %v1803_v39 }
 0x34f   : > { %2509 = vst [vmem:[#allocation2 + $0xb8] sm:$0xff] %v2477_v59 }
 0x350   : > { %v2992_v11 = vpop.f32.mrb[112].mxu0 }
 0x351   : > { %v2993_v35 = vpop.f32.mrb[113].mxu0 }
 0x352   : > { %v2994_v17 = vadd.f32 %v2993_v35, %v2992_v11  ;;  %v2995_v21 = vpop.f32.mrb[114].mxu0  ;;  %v3104_v61 = vpop.f32.mrb[112].mxu1  ;;  %v1810_v11 = vld [vmem:[#allocation2 + $0xf0] sm:$0xff] }
 0x353   : > { %v2996_v30 = vpop.f32.mrb[115].mxu0  ;;  %v3105_v37 = vpop.f32.mrb[113].mxu1 }
 0x354   : > { %v2997_v8 = vadd.f32 %v2996_v30, %v2995_v21  ;;  %v3106_v45 = vadd.f32 %v3105_v37, %v3104_v61  ;;  %v3107_v2 = vpop.f32.mrb[114].mxu1  ;;  %v1811_v61 = vld [vmem:[#allocation2 + $0xf8] sm:$0xff] }
 0x355   : > { %v3108_v46 = vpop.f32.mrb[115].mxu1 }
 0x356   : > { %v2424_v4 = vadd.f32 %v3106_v45, %v2994_v17  ;;  %v3109_v24 = vadd.f32 %v3108_v46, %v3107_v2  ;;  %v2522_v45 = vld [vmem:[#allocation2] sm:$0xff] (!%p2892_p4) }
 0x357   : > { %v5472_v2 = vld [vmem:[%s5753_s12] ss:$0 sm:$0xff] (!%p2892_p4) }
 0x358   : > { %v2998_v56 = vpop.f32.mrb[116].mxu0  ;;  %v2478_v32 = vadd.f32 %v2424_v4, %v1804_v54  ;;  %v2427_v18 = vadd.f32 %v3109_v24, %v2997_v8  ;;  %v2523_v54 = vld [vmem:[#allocation2 + $0x8] sm:$0xff] (!%p2892_p4)  ;;  %v2561_v46 = vadd.f32 (!%p2892_p4), %v5472_v2, %v2522_v45  ;;  %v2524_v24 = vld [vmem:[#allocation2 + $0x10] sm:$0xff] (!%p2892_p4) }
 0x359   : > { %v2999_v48 = vpop.f32.mrb[117].mxu0  ;;  %v2562_v4 = vadd.f32 (!%p2892_p4), %v5472_v2, %v2523_v54 }
 0x35a   : > { %v3000_v7 = vadd.f32 %v2999_v48, %v2998_v56  ;;  %v3001_v5 = vpop.f32.mrb[118].mxu0  ;;  %2510 = vst [vmem:[#allocation2 + $0xc0] sm:$0xff] %v2478_v32  ;;  %v2479_v41 = vadd.f32 %v2427_v18, %v1805_v52  ;;  %v3110_v43 = vpop.f32.mrb[116].mxu1  ;;  %v2525_v52 = vld [vmem:[#allocation2 + $0x18] sm:$0xff] (!%p2892_p4)  ;;  %v2526_v56 = vld [vmem:[#allocation2 + $0x20] sm:$0xff] (!%p2892_p4)  ;;  %v2563_v32 = vadd.f32 (!%p2892_p4), %v5472_v2, %v2524_v24  ;;  %2593 = vst [vmem:[%s4234_s13] sm:$0xff] (!%p2892_p4), %v2561_v46 }
 0x35b   : > { %v3002_v57 = vpop.f32.mrb[119].mxu0  ;;  %v3111_v20 = vpop.f32.mrb[117].mxu1  ;;  %v2564_v18 = vadd.f32 (!%p2892_p4), %v5472_v2, %v2525_v52  ;;  %v2565_v48 = vadd.f32 (!%p2892_p4), %v5472_v2, %v2526_v56  ;;  %2594 = vst [vmem:[%s4234_s13 + $0x8] sm:$0xff] (!%p2892_p4), %v2562_v4 }
 0x35c   : > { %v3003_v15 = vadd.f32 %v3002_v57, %v3001_v5  ;;  %2511 = vst [vmem:[#allocation2 + $0xc8] sm:$0xff] %v2479_v41  ;;  %v3112_v16 = vadd.f32 %v3111_v20, %v3110_v43  ;;  %v3113_v34 = vpop.f32.mrb[118].mxu1  ;;  %v2528_v5 = vld [vmem:[#allocation2 + $0x30] sm:$0xff] (!%p2892_p4)  ;;  %v2529_v41 = vld [vmem:[#allocation2 + $0x38] sm:$0xff] (!%p2892_p4)  ;;  %2595 = vst [vmem:[%s4234_s13 + $0x10] sm:$0xff] (!%p2892_p4), %v2563_v32 }
 0x35d   : > { %v3114_v44 = vpop.f32.mrb[119].mxu1  ;;  %v2567_v57 = vadd.f32 (!%p2892_p4), %v5472_v2, %v2528_v5  ;;  %v2568_v20 = vadd.f32 (!%p2892_p4), %v5472_v2, %v2529_v41  ;;  %2596 = vst [vmem:[%s4234_s13 + $0x18] sm:$0xff] (!%p2892_p4), %v2564_v18  ;;  %2597 = vst [vmem:[%s4234_s13 + $0x20] sm:$0xff] (!%p2892_p4), %v2565_v48 }
 0x35e   : > { %v2432_v60 = vadd.f32 %v3112_v16, %v3000_v7  ;;  %v3115_v9 = vadd.f32 %v3114_v44, %v3113_v34  ;;  %v2527_v7 = vld [vmem:[#allocation2 + $0x28] sm:$0xff] (!%p2892_p4)  ;;  %v2532_v34 = vld [vmem:[#allocation2 + $0x50] sm:$0xff] (!%p2892_p4) }
 0x35f   : > { %v2566_v43 = vadd.f32 (!%p2892_p4), %v5472_v2, %v2527_v7  ;;  %v2531_v16 = vld [vmem:[#allocation2 + $0x48] sm:$0xff] (!%p2892_p4)  ;;  %2599 = vst [vmem:[%s4234_s13 + $0x30] sm:$0xff] (!%p2892_p4), %v2567_v57  ;;  %2600 = vst [vmem:[%s4234_s13 + $0x38] sm:$0xff] (!%p2892_p4), %v2568_v20 }
 0x360   : > { %v3004_v33 = vpop.f32.mrb[120].mxu0  ;;  %v2480_v0 = vadd.f32 %v2432_v60, %v1806_v53  ;;  %v2435_v42 = vadd.f32 %v3115_v9, %v3003_v15  ;;  %v2530_v15 = vld [vmem:[#allocation2 + $0x40] sm:$0xff] (!%p2892_p4)  ;;  %v2570_v44 = vadd.f32 (!%p2892_p4), %v5472_v2, %v2531_v16  ;;  %v2571_v60 = vadd.f32 (!%p2892_p4), %v5472_v2, %v2532_v34  ;;  %v2533_v9 = vld [vmem:[#allocation2 + $0x58] sm:$0xff] (!%p2892_p4) }
 0x361   : > { %v3005_v49 = vpop.f32.mrb[121].mxu0  ;;  %v2569_v53 = vadd.f32 (!%p2892_p4), %v5472_v2, %v2530_v15  ;;  %2598 = vst [vmem:[%s4234_s13 + $0x28] sm:$0xff] (!%p2892_p4), %v2566_v43 }
 0x362   : > { %v3006_v55 = vadd.f32 %v3005_v49, %v3004_v33  ;;  %v3007_v47 = vpop.f32.mrb[122].mxu0  ;;  %2512 = vst [vmem:[#allocation2 + $0xd0] sm:$0xff] %v2480_v0  ;;  %v2481_v62 = vadd.f32 %v2435_v42, %v1807_v14  ;;  %v3116_v38 = vpop.f32.mrb[120].mxu1  ;;  %v2534_v14 = vld [vmem:[#allocation2 + $0x60] sm:$0xff] (!%p2892_p4)  ;;  %v2535_v33 = vld [vmem:[#allocation2 + $0x68] sm:$0xff] (!%p2892_p4)  ;;  %v2572_v0 = vadd.f32 (!%p2892_p4), %v5472_v2, %v2533_v9  ;;  %2602 = vst [vmem:[%s4234_s13 + $0x48] sm:$0xff] (!%p2892_p4), %v2570_v44 }
 0x363   : > { %v3008_v26 = vpop.f32.mrb[123].mxu0  ;;  %v3117_v50 = vpop.f32.mrb[121].mxu1  ;;  %v2573_v42 = vadd.f32 (!%p2892_p4), %v5472_v2, %v2534_v14  ;;  %v2574_v49 = vadd.f32 (!%p2892_p4), %v5472_v2, %v2535_v33  ;;  %2601 = vst [vmem:[%s4234_s13 + $0x40] sm:$0xff] (!%p2892_p4), %v2569_v53  ;;  %2603 = vst [vmem:[%s4234_s13 + $0x50] sm:$0xff] (!%p2892_p4), %v2571_v60 }
 0x364   : > { %v3009_v13 = vadd.f32 %v3008_v26, %v3007_v47  ;;  %2513 = vst [vmem:[#allocation2 + $0xd8] sm:$0xff] %v2481_v62  ;;  %v3118_v3 = vadd.f32 %v3117_v50, %v3116_v38  ;;  %v3119_v27 = vpop.f32.mrb[122].mxu1  ;;  %v2537_v47 = vld [vmem:[#allocation2 + $0x78] sm:$0xff] (!%p2892_p4)  ;;  %v2538_v62 = vld [vmem:[#allocation2 + $0x80] sm:$0xff] (!%p2892_p4)  ;;  %2604 = vst [vmem:[%s4234_s13 + $0x58] sm:$0xff] (!%p2892_p4), %v2572_v0 }
 0x365   : > { %v3120_v22 = vpop.f32.mrb[123].mxu1  ;;  %v2576_v26 = vadd.f32 (!%p2892_p4), %v5472_v2, %v2537_v47  ;;  %v2577_v50 = vadd.f32 (!%p2892_p4), %v5472_v2, %v2538_v62  ;;  %2605 = vst [vmem:[%s4234_s13 + $0x60] sm:$0xff] (!%p2892_p4), %v2573_v42  ;;  %2606 = vst [vmem:[%s4234_s13 + $0x68] sm:$0xff] (!%p2892_p4), %v2574_v49 }
 0x366   : > { %v2440_v51 = vadd.f32 %v3118_v3, %v3006_v55  ;;  %v3121_v19 = vadd.f32 %v3120_v22, %v3119_v27  ;;  %v2536_v55 = vld [vmem:[#allocation2 + $0x70] sm:$0xff] (!%p2892_p4)  ;;  %v2541_v27 = vld [vmem:[#allocation2 + $0x98] sm:$0xff] (!%p2892_p4) }
 0x367   : > { %v2575_v38 = vadd.f32 (!%p2892_p4), %v5472_v2, %v2536_v55  ;;  %v2540_v3 = vld [vmem:[#allocation2 + $0x90] sm:$0xff] (!%p2892_p4)  ;;  %2608 = vst [vmem:[%s4234_s13 + $0x78] sm:$0xff] (!%p2892_p4), %v2576_v26  ;;  %2609 = vst [vmem:[%s4234_s13 + $0x80] sm:$0xff] (!%p2892_p4), %v2577_v50 }
 0x368   : > { %v3010_v25 = vpop.f32.mrb[124].mxu0  ;;  %v2482_v23 = vadd.f32 %v2440_v51, %v1808_v36  ;;  %v2443_v63 = vadd.f32 %v3121_v19, %v3009_v13  ;;  %v2539_v13 = vld [vmem:[#allocation2 + $0x88] sm:$0xff] (!%p2892_p4)  ;;  %v2579_v22 = vadd.f32 (!%p2892_p4), %v5472_v2, %v2540_v3  ;;  %v2580_v51 = vadd.f32 (!%p2892_p4), %v5472_v2, %v2541_v27  ;;  %v2542_v19 = vld [vmem:[#allocation2 + $0xa0] sm:$0xff] (!%p2892_p4) }
 0x369   : > { %v3011_v58 = vpop.f32.mrb[125].mxu0  ;;  %v2578_v36 = vadd.f32 (!%p2892_p4), %v5472_v2, %v2539_v13  ;;  %2607 = vst [vmem:[%s4234_s13 + $0x70] sm:$0xff] (!%p2892_p4), %v2575_v38 }
 0x36a   : > { %v3012_v1 = vadd.f32 %v3011_v58, %v3010_v25  ;;  %v3013_v28 = vpop.f32.mrb[126].mxu0  ;;  %2514 = vst [vmem:[#allocation2 + $0xe0] sm:$0xff] %v2482_v23  ;;  %v2483_v12 = vadd.f32 %v2443_v63, %v1809_v31  ;;  %v3122_v10 = vpop.f32.mrb[124].mxu1  ;;  %v2543_v31 = vld [vmem:[#allocation2 + $0xa8] sm:$0xff] (!%p2892_p4)  ;;  %v2544_v25 = vld [vmem:[#allocation2 + $0xb0] sm:$0xff] (!%p2892_p4)  ;;  %v2581_v23 = vadd.f32 (!%p2892_p4), %v5472_v2, %v2542_v19  ;;  %2611 = vst [vmem:[%s4234_s13 + $0x90] sm:$0xff] (!%p2892_p4), %v2579_v22 }
 0x36b   : > { %v3014_v29 = vpop.f32.mrb[127].mxu0  ;;  %v3123_v39 = vpop.f32.mrb[125].mxu1  ;;  %v2582_v63 = vadd.f32 (!%p2892_p4), %v5472_v2, %v2543_v31  ;;  %v2583_v58 = vadd.f32 (!%p2892_p4), %v5472_v2, %v2544_v25  ;;  %2610 = vst [vmem:[%s4234_s13 + $0x88] sm:$0xff] (!%p2892_p4), %v2578_v36  ;;  %2612 = vst [vmem:[%s4234_s13 + $0x98] sm:$0xff] (!%p2892_p4), %v2580_v51 }
 0x36c   : > { %v3015_v6 = vadd.f32 %v3014_v29, %v3013_v28  ;;  %2515 = vst [vmem:[#allocation2 + $0xe8] sm:$0xff] %v2483_v12  ;;  %v3124_v40 = vadd.f32 %v3123_v39, %v3122_v10  ;;  %v3125_v59 = vpop.f32.mrb[126].mxu1  ;;  %v2546_v28 = vld [vmem:[#allocation2 + $0xc0] sm:$0xff] (!%p2892_p4)  ;;  %v2547_v12 = vld [vmem:[#allocation2 + $0xc8] sm:$0xff] (!%p2892_p4)  ;;  %2613 = vst [vmem:[%s4234_s13 + $0xa0] sm:$0xff] (!%p2892_p4), %v2581_v23 }
 0x36d   : > { %v3126_v35 = vpop.f32.mrb[127].mxu1  ;;  %v2585_v29 = vadd.f32 (!%p2892_p4), %v5472_v2, %v2546_v28  ;;  %v2586_v39 = vadd.f32 (!%p2892_p4), %v5472_v2, %v2547_v12  ;;  %2614 = vst [vmem:[%s4234_s13 + $0xa8] sm:$0xff] (!%p2892_p4), %v2582_v63  ;;  %2615 = vst [vmem:[%s4234_s13 + $0xb0] sm:$0xff] (!%p2892_p4), %v2583_v58 }
 0x36e   : > { %v2448_v17 = vadd.f32 %v3124_v40, %v3012_v1  ;;  %v3127_v21 = vadd.f32 %v3126_v35, %v3125_v59  ;;  %2521 = sbr.rel (%p2892_p4) target bundleno = 895 (0x37f), region = 64  ;;  %v2545_v1 = vld [vmem:[#allocation2 + $0xb8] sm:$0xff] (!%p2892_p4) }
 0x36f   : > { %v2584_v10 = vadd.f32 (!%p2892_p4), %v5472_v2, %v2545_v1  ;;  %v2549_v40 = vld [vmem:[#allocation2 + $0xd8] sm:$0xff] (!%p2892_p4)  ;;  %2617 = vst [vmem:[%s4234_s13 + $0xc0] sm:$0xff] (!%p2892_p4), %v2585_v29  ;;  %2618 = vst [vmem:[%s4234_s13 + $0xc8] sm:$0xff] (!%p2892_p4), %v2586_v39 }
 0x370   : > { %v2484_v30 = vadd.f32 %v2448_v17, %v1810_v11  ;;  %v2451_v37 = vadd.f32 %v3127_v21, %v3015_v6  ;;  %v2548_v6 = vld [vmem:[#allocation2 + $0xd0] sm:$0xff] (!%p2892_p4)  ;;  %v2588_v35 = vadd.f32 (!%p2892_p4), %v5472_v2, %v2549_v40 }
 0x371   : > { %v2550_v59 = vld [vmem:[#allocation2 + $0xe0] sm:$0xff] (!%p2892_p4)  ;;  %v2587_v11 = vadd.f32 (!%p2892_p4), %v5472_v2, %v2548_v6  ;;  %2616 = vst [vmem:[%s4234_s13 + $0xb8] sm:$0xff] (!%p2892_p4), %v2584_v10 }
 0x372   : > { %2516 = vst [vmem:[#allocation2 + $0xf0] sm:$0xff] %v2484_v30  ;;  %v2485_v8 = vadd.f32 %v2451_v37, %v1811_v61  ;;  %v2589_v17 = vadd.f32 (!%p2892_p4), %v5472_v2, %v2550_v59  ;;  %2620 = vst [vmem:[%s4234_s13 + $0xd8] sm:$0xff] (!%p2892_p4), %v2588_v35 }
 0x373   : > { %v2551_v21 = vld [vmem:[#allocation2 + $0xe8] sm:$0xff] (!%p2892_p4)  ;;  %2619 = vst [vmem:[%s4234_s13 + $0xd0] sm:$0xff] (!%p2892_p4), %v2587_v11 }
 0x374   : > { %2517 = vst [vmem:[#allocation2 + $0xf8] sm:$0xff] %v2485_v8  ;;  %v2590_v37 = vadd.f32 (!%p2892_p4), %v5472_v2, %v2551_v21  ;;  %2621 = vst [vmem:[%s4234_s13 + $0xe0] sm:$0xff] (!%p2892_p4), %v2589_v17 }
 0x376   : > { %2622 = vst [vmem:[%s4234_s13 + $0xe8] sm:$0xff] %v2590_v37 }
 0x379   : > { %v2552_v61 = vld [vmem:[#allocation2 + $0xf0] sm:$0xff] }
 0x37a   : > { %v2591_v8 = vadd.f32 %v5472_v2, %v2552_v61 }
 0x37b   : > { %v2553_v30 = vld [vmem:[#allocation2 + $0xf8] sm:$0xff] }
 0x37c   : > { %v2592_v45 = vadd.f32 %v5472_v2, %v2553_v30  ;;  %2623 = vst [vmem:[%s4234_s13 + $0xf0] sm:$0xff] %v2591_v8 }
 0x37e   : > { %2624 = vst [vmem:[%s4234_s13 + $0xf8] sm:$0xff] %v2592_v45 }
 0x37f PF: > { %s5754_s24 = sld [smem:[#allocation18_spill]]  ;;  %s2639_s0 = sshll.u32 %s4234_s13, 4  ;;  %s5545_s0 = int_to_ptr.vmem [resolvable:$true] %s2639_s0 }
 0x380   : > { %s5755_s9 = sld [smem:[#allocation57_spill]]  ;;  %s2626_s14 = scalar_lea.sflag [#allocation5], %s4207_s17 }
 0x381   : > { %s3726_s6 = scalar_lea.vmem %s5545_s0, 4096  ;;  %p5756_p11 = scmp.ne.s32.totalorder %s5653_s4, 0 }
 0x382   : > { %p3727_p12 = scmp.ne.s32.totalorder %s5545_s0, %s3726_s6  ;;  %s3869_s30 = smov [#allocation11]  }
 0x383   : > { %s3730_s20 = sshll.u32 %s3869_s30, 4  ;;  %s3731_s20 = int_to_ptr.vmem [resolvable:$false] %s3730_s20 }
 0x384   : > { %p3728_p5 = pnand %p3727_p12, %p5756_p11  ;;  %s3732_s18 = scalar_lea.vmem %s3731_s20, 8192 }
 0x385   : > { %s2903_s16 = sshll.u32 %s5754_s24, 12  ;;  %p3733_p9 = scmp.lt.s32.totalorder %s5545_s0, %s3731_s20 }
 0x386   : > { %s5542_s7 = scalar_lea.hbm %s5755_s9, %s2903_s16  ;;  %p3729_p3 = pneg %p3728_p5 }
 0x387   : > { %p3734_p2 = scmp.lt.s32.totalorder %s3732_s18, %s3726_s6 }
 0x389   : > { %p3735_p0 = por %p3734_p2, %p3733_p9 }
 0x38b   : > { %p3736_p10 = pnand %p3735_p0, %p3729_p3 }
 0x38d   : > { %3739 = shalt.err (!%p3736_p10)
}
 0x38e   : > { %s3740_s11 = scalar_lea.hbm %s5542_s7, 4096  ;;  %s3744_s10 = scalar_lea.hbm %s5755_s9, 16384 }
 0x38f   : > { %p3741_p7 = scmp.ne.s32.totalorder %s5542_s7, %s3740_s11  ;;  %p3745_p13 = scmp.lt.u32.totalorder %s5542_s7, %s5755_s9 }
 0x390   : > { %p3746_p6 = scmp.lt.u32.totalorder %s3744_s10, %s3740_s11  ;;  %p3748_p12 = scmp.lt.u32.totalorder %s3740_s11, %s5542_s7 }
 0x391   : > { %p3742_p8 = pnand %p3741_p7, %p5756_p11 }
 0x392   : > { %p3747_p4 = por %p3746_p6, %p3745_p13 }
 0x393   : > { %p3743_p1 = pneg %p3742_p8 }
 0x394   : > { %p3749_p5 = por %p3748_p12, %p3747_p4 }
 0x396   : > { %p3750_p3 = pnand %p3749_p5, %p3743_p1 }
 0x398   : > { %3753 = shalt.err (!%p3750_p3)
}
 0x399   : > { %s3870_s13 = smov 128   ;;  %s3871_s25 = smov 8  }
 0x39a   : > { %3136 = dma.vmem_to_hbm [thread:$0]  (%p5756_p11), %s5545_s0, 4096, %s5542_s7, %s2626_s14, %s3870_s13, %s3870_s13, %s3871_s25  }
 0x39b PF: > { %s5757_s23 = sld [smem:[#allocation24_spill]]  ;;  %p3156_p9 = scmp.ge.s32.totalorder %s3856_s28, 2 }
 0x39c   : > { %s2654_s12 = sand.u32 1, %s3828_s21  }
 0x39d   : > { %s2655_s24 = scalar_lea.sflag [#allocation5], %s2654_s12 }
 0x3a1   : > { %p5758_p2 = scmp.ne.s32.totalorder %s5757_s23, 0 }
 0x3a3   : > { %p3152_p0 = pnand %p3156_p9, %p5758_p2 }
 0x3a5   : > { %3811 = dma.done.wait (!%p3152_p0), %s2655_s24, 4096  }
 0x3a6   : > { %3813 = vsyncadd (!%p3152_p0), %s2655_s24, 4294963200  ;;  %s27_s28 = sadd.s32 1, %s3856_s28   ;;  %s5759_s16 = sld [smem:[#allocation16_spill]] }
 0x3a7   : > { %p24_p10 = scmp.ge.s32.totalorder %s27_s28, 10   ;;  %s5760_s20 = sld [smem:[#allocation22_spill]] }
 0x3a8   : > { %s5761_s4 = sld [smem:[#allocation17_spill]]  ;;  %s5762_s23 = sld [smem:[#allocation23_spill]] }
 0x3a9   : > { %s5763_s25 = sld [smem:[#allocation19_spill]]  ;;  %s5764_s17 = sld [smem:[#allocation20_spill]] }
 0x3aa   : > { %s5765_s27 = sld [smem:[#allocation21_spill]]  ;;  %s5766_s18 = smov %s3820_s19 }
 0x3ab   : > { %s5768_s21 = smov %s3832_s22  ;;  %s5770_s24 = smov %s3848_s26 }
 0x3ac   : > { %s5767_s19 = smov %s5759_s16  ;;  %26 = sbr.rel (!%p24_p10) target bundleno = 18 (0x12), region = 130 }
 0x3ae   : > { %s5769_s22 = smov %s5761_s4 }
 0x3af   : > { %s5771_s26 = smov %s5764_s17 }
 0x3b3   :  { %2660 = vsyncpa [#allocation4], 1 }
 0x3b4   :  { %2662 = vsyncpa [#allocation4 + $0x1], 1 }
 0x3b5   :  { %2663 = vsyncpa [#allocation7], 1 }
 0x3b6   :  { %2665 = vsyncpa [#allocation7 + $0x1], 1 }
 0x3b7   :  { %2666 = vsyncpa [#allocation10], 1 }
 0x3b8   :  { %2668 = vsyncpa [#allocation10 + $0x1], 1 }
 0x3b9   :  { %2669 = vsyncpa [#allocation5], 1 }
 0x3ba   :  { %2671 = vsyncpa [#allocation5 + $0x1], 1 }

</bundles_post_ra>
